<compile_context>
chip_gen: v6e
topology: v6e:2x2x1
jax: 0.10.0
libtpu: 0.0.40
codegen_flags: <defaults>
</compile_context>

<pallas_src>
import numpy as np
import jax
import jax.numpy as jnp
from jax.experimental import pallas as pl
from jax.experimental.pallas import tpu as pltpu

D = 2        # num_inputs (features of each 2-D point)
H = 100      # hidden1 == hidden2 == 100
L = 4        # num_couplings
HP = 128     # hidden width padded to a full lane tile
DP = 128     # feature lanes of the z / s / t slabs (z lives in lanes 0..D-1)


def _round_up(n, m):
    return (n + m - 1) // m * m


def flow_kernel(x_ref, w_ref, b_ref, out_ref):
    """All coupling layers fused; one batch block of TB rows per grid step."""
    n_layers = w_ref.shape[0]
    z = x_ref[...]                                    # (TB, DP), z in lanes 0..1
    ldj = jnp.zeros_like(z)                           # full-lane ldj accumulator

    for l in range(n_layers):                         # static unroll (L = 4)
        w1 = w_ref[l, :, 0 * HP:1 * HP]               # (DP, HP)  mask folded in
        w2 = w_ref[l, :, 1 * HP:2 * HP]               # (HP, HP)
        w3s = w_ref[l, :, 2 * HP:2 * HP + DP]         # (HP, DP)  s col @ free lane
        w3t = w_ref[l, :, 2 * HP + DP:2 * HP + 2 * DP]
        b1 = b_ref[l, 0:1, :]                         # (1, HP)
        b2 = b_ref[l, 1:2, :]
        b3s = b_ref[l, 2:3, :]                        # (1, DP)   bias @ free lane
        b3t = b_ref[l, 3:4, :]

        # MXU: (z * mask) @ W1  (mask pre-folded into W1 rows; padded lanes of z
        # are zero so the padding contributes exactly 0).
        h1 = jnp.maximum(
            jnp.dot(z, w1, preferred_element_type=jnp.float32) + b1, 0.0)
        # MXU: hidden Linear.
        h2 = jnp.maximum(
            jnp.dot(h1, w2, preferred_element_type=jnp.float32) + b2, 0.0)
        # MXU: output Linear.  s/t columns are pre-placed at the free lane so
        # these ARE s*(1-mask) and t*(1-mask) in z's lane layout already.
        s_full = jnp.dot(h2, w3s, preferred_element_type=jnp.float32) + b3s
        t_full = jnp.dot(h2, w3t, preferred_element_type=jnp.float32) + b3t

        # Coupling update (reverse=False).  Masked/padded lanes: s = t = 0, so
        # exp(s) = 1 and z passes through unchanged (padded lanes stay 0).
        z = (z + t_full) * jnp.exp(s_full)
        ldj = ldj + s_full                            # VPU add; no XLU reduce

    # Single lane-dense output slab: [ z | ldj accumulator ].
    out_ref[:, 0:DP] = z
    out_ref[:, DP:2 * DP] = ldj


def _pack_params(masks, w1, b1, w2, b2, w3, b3):
    """Pack everything into one weight slab and one bias slab (zero-padded)."""
    n_layers, _, d = masks.shape
    h = w1.shape[2]
    assert d == 2, "packing relies on strictly one-hot coupling masks (D == 2)"
    m = masks[:, 0, :]                                # (L, D) one-hot
    inv = 1.0 - m                                     # (L, D) one-hot (free lane)

    # Input Linear with the mask folded into its rows; pad D->DP, H->HP.
    w1m = jnp.pad(w1 * m[:, :, None], ((0, 0), (0, DP - d), (0, HP - h)))
    b1p = jnp.pad(b1, ((0, 0), (0, 0), (0, HP - h)))
    # Hidden Linear, exact zero padding H->HP.
    w2p = jnp.pad(w2, ((0, 0), (0, HP - h), (0, HP - h)))
    b2p = jnp.pad(b2, ((0, 0), (0, 0), (0, HP - h)))
    # Output Linear: drop the s (col 0) / t (col 1) columns onto the free lane
    # so the matmul directly produces s*(1-mask) / t*(1-mask).
    w3s = jnp.pad(w3[:, :, 0:1] * inv[:, None, :],
                  ((0, 0), (0, HP - h), (0, DP - d)))
    w3t = jnp.pad(w3[:, :, 1:2] * inv[:, None, :],
                  ((0, 0), (0, HP - h), (0, DP - d)))
    b3s = jnp.pad(b3[:, :, 0:1] * inv[:, None, :], ((0, 0), (0, 0), (0, DP - d)))
    b3t = jnp.pad(b3[:, :, 1:2] * inv[:, None, :], ((0, 0), (0, 0), (0, DP - d)))

    w_slab = jnp.concatenate([w1m, w2p, w3s, w3t], axis=2)   # (L, 128, 512)
    b_slab = jnp.concatenate([b1p, b2p, b3s, b3t], axis=1)   # (L, 4, 128)
    return w_slab, b_slab


def flow_forward(x, masks, w1, b1, w2, b2, w3, b3, *, block_b=256):
    n_layers, _, d = masks.shape
    assert d == D == 2, "kernel specialised to num_inputs == 2 (one-hot masks)"
    b = x.shape[0]

    w_slab, b_slab = _pack_params(masks, w1, b1, w2, b2, w3, b3)

    tb = min(block_b, _round_up(b, 8))                # batch rows per grid step
    bp = _round_up(b, tb)
    x_pad = jnp.pad(x.astype(jnp.float32), ((0, bp - b), (0, DP - d)))

    flops = 2 * bp * n_layers * (DP * HP + HP * HP + 2 * HP * DP)
    bytes_accessed = (x_pad.size + w_slab.size + b_slab.size + bp * 2 * DP) * 4
    cost = pl.CostEstimate(flops=flops,
                           transcendentals=bp * n_layers * DP,
                           bytes_accessed=bytes_accessed)

    out = pl.pallas_call(
        flow_kernel,
        out_shape=jax.ShapeDtypeStruct((bp, 2 * DP), jnp.float32),
        grid=(bp // tb,),
        in_specs=[
            pl.BlockSpec((tb, DP), lambda i: (i, 0)),
            pl.BlockSpec(w_slab.shape, lambda i: (0, 0, 0)),  # resident, DMA'd once
            pl.BlockSpec(b_slab.shape, lambda i: (0, 0, 0)),  # resident, DMA'd once
        ],
        out_specs=pl.BlockSpec((tb, 2 * DP), lambda i: (i, 0)),
        compiler_params=pltpu.CompilerParams(
            dimension_semantics=("parallel",)),
        cost_estimate=cost,
    )(x_pad, w_slab, b_slab)

    z = out[:b, :d]
    ldj = out[:b, DP] + out[:b, DP + 1]   # one-hot masks -> ldj lives in 2 lanes
    return z, ldj


def flow_reference(x, masks, w1, b1, w2, b2, w3, b3):
    """Pure-JAX reference mirroring the PyTorch Flow.forward (reverse=False)."""
    z = x
    ldj = jnp.zeros((x.shape[0],), jnp.float32)
    for l in range(masks.shape[0]):
        m = masks[l, 0]                         # (D,)
        z_in = z * m
        h1 = jax.nn.relu(z_in @ w1[l] + b1[l, 0])
        h2 = jax.nn.relu(h1 @ w2[l] + b2[l, 0])
        st = h2 @ w3[l] + b3[l, 0]
        half = st.shape[1] // 2
        s = st[:, :half] * (1.0 - m)
        t = st[:, half:] * (1.0 - m)
        z = (z + t) * jnp.exp(s)
        ldj = ldj + s.sum(axis=1)
    return z, ldj


def init_params(key):
    """Deterministic nn.Linear-style init (uniform +/- 1/sqrt(fan_in)) per layer."""
    ks = jax.random.split(key, 6 * L)
    w1 = jnp.stack([jax.random.uniform(ks[6 * l + 0], (D, H), jnp.float32,
                                       -1.0 / np.sqrt(D), 1.0 / np.sqrt(D)) for l in range(L)])
    b1 = jnp.stack([jax.random.uniform(ks[6 * l + 1], (1, H), jnp.float32,
                                       -1.0 / np.sqrt(D), 1.0 / np.sqrt(D)) for l in range(L)])
    w2 = jnp.stack([jax.random.uniform(ks[6 * l + 2], (H, H), jnp.float32,
                                       -1.0 / np.sqrt(H), 1.0 / np.sqrt(H)) for l in range(L)])
    b2 = jnp.stack([jax.random.uniform(ks[6 * l + 3], (1, H), jnp.float32,
                                       -1.0 / np.sqrt(H), 1.0 / np.sqrt(H)) for l in range(L)])
    w3 = jnp.stack([jax.random.uniform(ks[6 * l + 4], (H, D), jnp.float32,
                                       -1.0 / np.sqrt(H), 1.0 / np.sqrt(H)) for l in range(L)])
    b3 = jnp.stack([jax.random.uniform(ks[6 * l + 5], (1, D), jnp.float32,
                                       -1.0 / np.sqrt(H), 1.0 / np.sqrt(H)) for l in range(L)])
    # Flow.make_mask(D, l % 2): mask[i] = (i + pattern) % 2  -> one-hot for D=2.
    masks = jnp.stack([
        jnp.array([(i + (l % 2)) % 2 for i in range(D)], jnp.float32).reshape(1, D)
        for l in range(L)
    ])
    return masks, w1, b1, w2, b2, w3, b3


if __name__ == "__main__":
    key = jax.random.PRNGKey(0)
    k_x, k_p = jax.random.split(key)
    B = 300                                   # pads to 512 -> 2 batch grid blocks
    x = jax.random.normal(k_x, (B, D), jnp.float32)
    masks, w1, b1, w2, b2, w3, b3 = init_params(k_p)

    z, ldj = flow_forward(x, masks, w1, b1, w2, b2, w3, b3)
    z = jax.block_until_ready(z)
    ldj = jax.block_until_ready(ldj)

    z_ref, ldj_ref = flow_reference(x, masks, w1, b1, w2, b2, w3, b3)
    np.testing.assert_allclose(np.asarray(z), np.asarray(z_ref), rtol=1e-4, atol=1e-5)
    np.testing.assert_allclose(np.asarray(ldj), np.asarray(ldj_ref), rtol=1e-4, atol=1e-5)

    print("KERNEL_OK")
</pallas_src>

<mosaic_0001>
module attributes {stable_mosaic.version = 11 : i64} {
  func.func @flow_kernel(%arg0: i32, %arg1: memref<256x128xf32, #tpu.memory_space<vmem>>, %arg2: memref<4x128x512xf32, #tpu.memory_space<vmem>>, %arg3: memref<4x4x128xf32, #tpu.memory_space<vmem>>, %arg4: memref<256x256xf32, #tpu.memory_space<vmem>>) attributes {dimension_semantics = [#tpu.dimension_semantics<parallel>], iteration_bounds = array<i64: 2>, scalar_prefetch = 0 : i64, scratch_operands = 0 : i64, tpu.core_type = #tpu.core_type<tc>, window_params = [{transform_indices = @transform_0, window_bounds = array<i64: 256, 128>}, {pipeline_mode = #tpu.pipeline_mode<synchronous>, transform_indices = @transform_1, window_bounds = array<i64: 4, 128, 512>}, {pipeline_mode = #tpu.pipeline_mode<synchronous>, transform_indices = @transform_2, window_bounds = array<i64: 4, 4, 128>}, {transform_indices = @transform_3, window_bounds = array<i64: 256, 256>}]} {
    %c0 = arith.constant 0 : index
    %c0_0 = arith.constant 0 : index
    %0 = vector.load %arg1[%c0, %c0_0] : memref<256x128xf32, #tpu.memory_space<vmem>>, vector<256x128xf32>
    %cst = arith.constant 0.000000e+00 : f32
    %1 = vector.broadcast %cst : f32 to vector<256x128xf32>
    %c0_1 = arith.constant 0 : index
    %c0_2 = arith.constant 0 : index
    %c0_3 = arith.constant 0 : index
    %2 = vector.load %arg2[%c0_1, %c0_2, %c0_3] : memref<4x128x512xf32, #tpu.memory_space<vmem>>, vector<1x128x128xf32>
    %3 = vector.shape_cast %2 : vector<1x128x128xf32> to vector<128x128xf32>
    %c0_4 = arith.constant 0 : index
    %c0_5 = arith.constant 0 : index
    %c128 = arith.constant 128 : index
    %4 = vector.load %arg2[%c0_4, %c0_5, %c128] : memref<4x128x512xf32, #tpu.memory_space<vmem>>, vector<1x128x128xf32>
    %5 = vector.shape_cast %4 : vector<1x128x128xf32> to vector<128x128xf32>
    %c0_6 = arith.constant 0 : index
    %c0_7 = arith.constant 0 : index
    %c256 = arith.constant 256 : index
    %6 = vector.load %arg2[%c0_6, %c0_7, %c256] : memref<4x128x512xf32, #tpu.memory_space<vmem>>, vector<1x128x128xf32>
    %7 = vector.shape_cast %6 : vector<1x128x128xf32> to vector<128x128xf32>
    %c0_8 = arith.constant 0 : index
    %c0_9 = arith.constant 0 : index
    %c384 = arith.constant 384 : index
    %8 = vector.load %arg2[%c0_8, %c0_9, %c384] : memref<4x128x512xf32, #tpu.memory_space<vmem>>, vector<1x128x128xf32>
    %9 = vector.shape_cast %8 : vector<1x128x128xf32> to vector<128x128xf32>
    %c0_10 = arith.constant 0 : index
    %c0_11 = arith.constant 0 : index
    %c0_12 = arith.constant 0 : index
    %10 = vector.load %arg3[%c0_10, %c0_11, %c0_12] : memref<4x4x128xf32, #tpu.memory_space<vmem>>, vector<1x1x128xf32>
    %11 = vector.shape_cast %10 : vector<1x1x128xf32> to vector<1x128xf32>
    %c0_13 = arith.constant 0 : index
    %c1 = arith.constant 1 : index
    %c0_14 = arith.constant 0 : index
    %12 = vector.load %arg3[%c0_13, %c1, %c0_14] : memref<4x4x128xf32, #tpu.memory_space<vmem>>, vector<1x1x128xf32>
    %13 = vector.shape_cast %12 : vector<1x1x128xf32> to vector<1x128xf32>
    %c0_15 = arith.constant 0 : index
    %c2 = arith.constant 2 : index
    %c0_16 = arith.constant 0 : index
    %14 = vector.load %arg3[%c0_15, %c2, %c0_16] : memref<4x4x128xf32, #tpu.memory_space<vmem>>, vector<1x1x128xf32>
    %15 = vector.shape_cast %14 : vector<1x1x128xf32> to vector<1x128xf32>
    %c0_17 = arith.constant 0 : index
    %c3 = arith.constant 3 : index
    %c0_18 = arith.constant 0 : index
    %16 = vector.load %arg3[%c0_17, %c3, %c0_18] : memref<4x4x128xf32, #tpu.memory_space<vmem>>, vector<1x1x128xf32>
    %17 = vector.shape_cast %16 : vector<1x1x128xf32> to vector<1x128xf32>
    %cst_19 = arith.constant dense<0.000000e+00> : vector<256x128xf32>
    %18 = tpu.matmul %0, %3, %cst_19 {dimension_numbers = #tpu.dot_dimension_numbers<[1], [0], [0], [1], [0, 0, 1, 1], [], []>} : vector<256x128xf32>, vector<128x128xf32>, vector<256x128xf32> -> vector<256x128xf32>
    %19 = vector.broadcast %11 : vector<1x128xf32> to vector<256x128xf32>
    %20 = arith.addf %18, %19 : vector<256x128xf32>
    %cst_20 = arith.constant 0.000000e+00 : f32
    %21 = vector.broadcast %cst_20 : f32 to vector<256x128xf32>
    %22 = arith.maximumf %20, %21 : vector<256x128xf32>
    %cst_21 = arith.constant dense<0.000000e+00> : vector<256x128xf32>
    %23 = tpu.matmul %22, %5, %cst_21 {dimension_numbers = #tpu.dot_dimension_numbers<[1], [0], [0], [1], [0, 0, 1, 1], [], []>} : vector<256x128xf32>, vector<128x128xf32>, vector<256x128xf32> -> vector<256x128xf32>
    %24 = vector.broadcast %13 : vector<1x128xf32> to vector<256x128xf32>
    %25 = arith.addf %23, %24 : vector<256x128xf32>
    %cst_22 = arith.constant 0.000000e+00 : f32
    %26 = vector.broadcast %cst_22 : f32 to vector<256x128xf32>
    %27 = arith.maximumf %25, %26 : vector<256x128xf32>
    %cst_23 = arith.constant dense<0.000000e+00> : vector<256x128xf32>
    %28 = tpu.matmul %27, %7, %cst_23 {dimension_numbers = #tpu.dot_dimension_numbers<[1], [0], [0], [1], [0, 0, 1, 1], [], []>} : vector<256x128xf32>, vector<128x128xf32>, vector<256x128xf32> -> vector<256x128xf32>
    %29 = vector.broadcast %15 : vector<1x128xf32> to vector<256x128xf32>
    %30 = arith.addf %28, %29 : vector<256x128xf32>
    %cst_24 = arith.constant dense<0.000000e+00> : vector<256x128xf32>
    %31 = tpu.matmul %27, %9, %cst_24 {dimension_numbers = #tpu.dot_dimension_numbers<[1], [0], [0], [1], [0, 0, 1, 1], [], []>} : vector<256x128xf32>, vector<128x128xf32>, vector<256x128xf32> -> vector<256x128xf32>
    %32 = vector.broadcast %17 : vector<1x128xf32> to vector<256x128xf32>
    %33 = arith.addf %31, %32 : vector<256x128xf32>
    %34 = arith.addf %0, %33 : vector<256x128xf32>
    %35 = math.exp %30 : vector<256x128xf32>
    %36 = arith.mulf %34, %35 : vector<256x128xf32>
    %37 = arith.addf %1, %30 : vector<256x128xf32>
    %c1_25 = arith.constant 1 : index
    %c0_26 = arith.constant 0 : index
    %c0_27 = arith.constant 0 : index
    %38 = vector.load %arg2[%c1_25, %c0_26, %c0_27] : memref<4x128x512xf32, #tpu.memory_space<vmem>>, vector<1x128x128xf32>
    %39 = vector.shape_cast %38 : vector<1x128x128xf32> to vector<128x128xf32>
    %c1_28 = arith.constant 1 : index
    %c0_29 = arith.constant 0 : index
    %c128_30 = arith.constant 128 : index
    %40 = vector.load %arg2[%c1_28, %c0_29, %c128_30] : memref<4x128x512xf32, #tpu.memory_space<vmem>>, vector<1x128x128xf32>
    %41 = vector.shape_cast %40 : vector<1x128x128xf32> to vector<128x128xf32>
    %c1_31 = arith.constant 1 : index
    %c0_32 = arith.constant 0 : index
    %c256_33 = arith.constant 256 : index
    %42 = vector.load %arg2[%c1_31, %c0_32, %c256_33] : memref<4x128x512xf32, #tpu.memory_space<vmem>>, vector<1x128x128xf32>
    %43 = vector.shape_cast %42 : vector<1x128x128xf32> to vector<128x128xf32>
    %c1_34 = arith.constant 1 : index
    %c0_35 = arith.constant 0 : index
    %c384_36 = arith.constant 384 : index
    %44 = vector.load %arg2[%c1_34, %c0_35, %c384_36] : memref<4x128x512xf32, #tpu.memory_space<vmem>>, vector<1x128x128xf32>
    %45 = vector.shape_cast %44 : vector<1x128x128xf32> to vector<128x128xf32>
    %c1_37 = arith.constant 1 : index
    %c0_38 = arith.constant 0 : index
    %c0_39 = arith.constant 0 : index
    %46 = vector.load %arg3[%c1_37, %c0_38, %c0_39] : memref<4x4x128xf32, #tpu.memory_space<vmem>>, vector<1x1x128xf32>
    %47 = vector.shape_cast %46 : vector<1x1x128xf32> to vector<1x128xf32>
    %c1_40 = arith.constant 1 : index
    %c1_41 = arith.constant 1 : index
    %c0_42 = arith.constant 0 : index
    %48 = vector.load %arg3[%c1_40, %c1_41, %c0_42] : memref<4x4x128xf32, #tpu.memory_space<vmem>>, vector<1x1x128xf32>
    %49 = vector.shape_cast %48 : vector<1x1x128xf32> to vector<1x128xf32>
    %c1_43 = arith.constant 1 : index
    %c2_44 = arith.constant 2 : index
    %c0_45 = arith.constant 0 : index
    %50 = vector.load %arg3[%c1_43, %c2_44, %c0_45] : memref<4x4x128xf32, #tpu.memory_space<vmem>>, vector<1x1x128xf32>
    %51 = vector.shape_cast %50 : vector<1x1x128xf32> to vector<1x128xf32>
    %c1_46 = arith.constant 1 : index
    %c3_47 = arith.constant 3 : index
    %c0_48 = arith.constant 0 : index
    %52 = vector.load %arg3[%c1_46, %c3_47, %c0_48] : memref<4x4x128xf32, #tpu.memory_space<vmem>>, vector<1x1x128xf32>
    %53 = vector.shape_cast %52 : vector<1x1x128xf32> to vector<1x128xf32>
    %cst_49 = arith.constant dense<0.000000e+00> : vector<256x128xf32>
    %54 = tpu.matmul %36, %39, %cst_49 {dimension_numbers = #tpu.dot_dimension_numbers<[1], [0], [0], [1], [0, 0, 1, 1], [], []>} : vector<256x128xf32>, vector<128x128xf32>, vector<256x128xf32> -> vector<256x128xf32>
    %55 = vector.broadcast %47 : vector<1x128xf32> to vector<256x128xf32>
    %56 = arith.addf %54, %55 : vector<256x128xf32>
    %cst_50 = arith.constant 0.000000e+00 : f32
    %57 = vector.broadcast %cst_50 : f32 to vector<256x128xf32>
    %58 = arith.maximumf %56, %57 : vector<256x128xf32>
    %cst_51 = arith.constant dense<0.000000e+00> : vector<256x128xf32>
    %59 = tpu.matmul %58, %41, %cst_51 {dimension_numbers = #tpu.dot_dimension_numbers<[1], [0], [0], [1], [0, 0, 1, 1], [], []>} : vector<256x128xf32>, vector<128x128xf32>, vector<256x128xf32> -> vector<256x128xf32>
    %60 = vector.broadcast %49 : vector<1x128xf32> to vector<256x128xf32>
    %61 = arith.addf %59, %60 : vector<256x128xf32>
    %cst_52 = arith.constant 0.000000e+00 : f32
    %62 = vector.broadcast %cst_52 : f32 to vector<256x128xf32>
    %63 = arith.maximumf %61, %62 : vector<256x128xf32>
    %cst_53 = arith.constant dense<0.000000e+00> : vector<256x128xf32>
    %64 = tpu.matmul %63, %43, %cst_53 {dimension_numbers = #tpu.dot_dimension_numbers<[1], [0], [0], [1], [0, 0, 1, 1], [], []>} : vector<256x128xf32>, vector<128x128xf32>, vector<256x128xf32> -> vector<256x128xf32>
    %65 = vector.broadcast %51 : vector<1x128xf32> to vector<256x128xf32>
    %66 = arith.addf %64, %65 : vector<256x128xf32>
    %cst_54 = arith.constant dense<0.000000e+00> : vector<256x128xf32>
    %67 = tpu.matmul %63, %45, %cst_54 {dimension_numbers = #tpu.dot_dimension_numbers<[1], [0], [0], [1], [0, 0, 1, 1], [], []>} : vector<256x128xf32>, vector<128x128xf32>, vector<256x128xf32> -> vector<256x128xf32>
    %68 = vector.broadcast %53 : vector<1x128xf32> to vector<256x128xf32>
    %69 = arith.addf %67, %68 : vector<256x128xf32>
    %70 = arith.addf %36, %69 : vector<256x128xf32>
    %71 = math.exp %66 : vector<256x128xf32>
    %72 = arith.mulf %70, %71 : vector<256x128xf32>
    %73 = arith.addf %37, %66 : vector<256x128xf32>
    %c2_55 = arith.constant 2 : index
    %c0_56 = arith.constant 0 : index
    %c0_57 = arith.constant 0 : index
    %74 = vector.load %arg2[%c2_55, %c0_56, %c0_57] : memref<4x128x512xf32, #tpu.memory_space<vmem>>, vector<1x128x128xf32>
    %75 = vector.shape_cast %74 : vector<1x128x128xf32> to vector<128x128xf32>
    %c2_58 = arith.constant 2 : index
    %c0_59 = arith.constant 0 : index
    %c128_60 = arith.constant 128 : index
    %76 = vector.load %arg2[%c2_58, %c0_59, %c128_60] : memref<4x128x512xf32, #tpu.memory_space<vmem>>, vector<1x128x128xf32>
    %77 = vector.shape_cast %76 : vector<1x128x128xf32> to vector<128x128xf32>
    %c2_61 = arith.constant 2 : index
    %c0_62 = arith.constant 0 : index
    %c256_63 = arith.constant 256 : index
    %78 = vector.load %arg2[%c2_61, %c0_62, %c256_63] : memref<4x128x512xf32, #tpu.memory_space<vmem>>, vector<1x128x128xf32>
    %79 = vector.shape_cast %78 : vector<1x128x128xf32> to vector<128x128xf32>
    %c2_64 = arith.constant 2 : index
    %c0_65 = arith.constant 0 : index
    %c384_66 = arith.constant 384 : index
    %80 = vector.load %arg2[%c2_64, %c0_65, %c384_66] : memref<4x128x512xf32, #tpu.memory_space<vmem>>, vector<1x128x128xf32>
    %81 = vector.shape_cast %80 : vector<1x128x128xf32> to vector<128x128xf32>
    %c2_67 = arith.constant 2 : index
    %c0_68 = arith.constant 0 : index
    %c0_69 = arith.constant 0 : index
    %82 = vector.load %arg3[%c2_67, %c0_68, %c0_69] : memref<4x4x128xf32, #tpu.memory_space<vmem>>, vector<1x1x128xf32>
    %83 = vector.shape_cast %82 : vector<1x1x128xf32> to vector<1x128xf32>
    %c2_70 = arith.constant 2 : index
    %c1_71 = arith.constant 1 : index
    %c0_72 = arith.constant 0 : index
    %84 = vector.load %arg3[%c2_70, %c1_71, %c0_72] : memref<4x4x128xf32, #tpu.memory_space<vmem>>, vector<1x1x128xf32>
    %85 = vector.shape_cast %84 : vector<1x1x128xf32> to vector<1x128xf32>
    %c2_73 = arith.constant 2 : index
    %c2_74 = arith.constant 2 : index
    %c0_75 = arith.constant 0 : index
    %86 = vector.load %arg3[%c2_73, %c2_74, %c0_75] : memref<4x4x128xf32, #tpu.memory_space<vmem>>, vector<1x1x128xf32>
    %87 = vector.shape_cast %86 : vector<1x1x128xf32> to vector<1x128xf32>
    %c2_76 = arith.constant 2 : index
    %c3_77 = arith.constant 3 : index
    %c0_78 = arith.constant 0 : index
    %88 = vector.load %arg3[%c2_76, %c3_77, %c0_78] : memref<4x4x128xf32, #tpu.memory_space<vmem>>, vector<1x1x128xf32>
    %89 = vector.shape_cast %88 : vector<1x1x128xf32> to vector<1x128xf32>
    %cst_79 = arith.constant dense<0.000000e+00> : vector<256x128xf32>
    %90 = tpu.matmul %72, %75, %cst_79 {dimension_numbers = #tpu.dot_dimension_numbers<[1], [0], [0], [1], [0, 0, 1, 1], [], []>} : vector<256x128xf32>, vector<128x128xf32>, vector<256x128xf32> -> vector<256x128xf32>
    %91 = vector.broadcast %83 : vector<1x128xf32> to vector<256x128xf32>
    %92 = arith.addf %90, %91 : vector<256x128xf32>
    %cst_80 = arith.constant 0.000000e+00 : f32
    %93 = vector.broadcast %cst_80 : f32 to vector<256x128xf32>
    %94 = arith.maximumf %92, %93 : vector<256x128xf32>
    %cst_81 = arith.constant dense<0.000000e+00> : vector<256x128xf32>
    %95 = tpu.matmul %94, %77, %cst_81 {dimension_numbers = #tpu.dot_dimension_numbers<[1], [0], [0], [1], [0, 0, 1, 1], [], []>} : vector<256x128xf32>, vector<128x128xf32>, vector<256x128xf32> -> vector<256x128xf32>
    %96 = vector.broadcast %85 : vector<1x128xf32> to vector<256x128xf32>
    %97 = arith.addf %95, %96 : vector<256x128xf32>
    %cst_82 = arith.constant 0.000000e+00 : f32
    %98 = vector.broadcast %cst_82 : f32 to vector<256x128xf32>
    %99 = arith.maximumf %97, %98 : vector<256x128xf32>
    %cst_83 = arith.constant dense<0.000000e+00> : vector<256x128xf32>
    %100 = tpu.matmul %99, %79, %cst_83 {dimension_numbers = #tpu.dot_dimension_numbers<[1], [0], [0], [1], [0, 0, 1, 1], [], []>} : vector<256x128xf32>, vector<128x128xf32>, vector<256x128xf32> -> vector<256x128xf32>
    %101 = vector.broadcast %87 : vector<1x128xf32> to vector<256x128xf32>
    %102 = arith.addf %100, %101 : vector<256x128xf32>
    %cst_84 = arith.constant dense<0.000000e+00> : vector<256x128xf32>
    %103 = tpu.matmul %99, %81, %cst_84 {dimension_numbers = #tpu.dot_dimension_numbers<[1], [0], [0], [1], [0, 0, 1, 1], [], []>} : vector<256x128xf32>, vector<128x128xf32>, vector<256x128xf32> -> vector<256x128xf32>
    %104 = vector.broadcast %89 : vector<1x128xf32> to vector<256x128xf32>
    %105 = arith.addf %103, %104 : vector<256x128xf32>
    %106 = arith.addf %72, %105 : vector<256x128xf32>
    %107 = math.exp %102 : vector<256x128xf32>
    %108 = arith.mulf %106, %107 : vector<256x128xf32>
    %109 = arith.addf %73, %102 : vector<256x128xf32>
    %c3_85 = arith.constant 3 : index
    %c0_86 = arith.constant 0 : index
    %c0_87 = arith.constant 0 : index
    %110 = vector.load %arg2[%c3_85, %c0_86, %c0_87] : memref<4x128x512xf32, #tpu.memory_space<vmem>>, vector<1x128x128xf32>
    %111 = vector.shape_cast %110 : vector<1x128x128xf32> to vector<128x128xf32>
    %c3_88 = arith.constant 3 : index
    %c0_89 = arith.constant 0 : index
    %c128_90 = arith.constant 128 : index
    %112 = vector.load %arg2[%c3_88, %c0_89, %c128_90] : memref<4x128x512xf32, #tpu.memory_space<vmem>>, vector<1x128x128xf32>
    %113 = vector.shape_cast %112 : vector<1x128x128xf32> to vector<128x128xf32>
    %c3_91 = arith.constant 3 : index
    %c0_92 = arith.constant 0 : index
    %c256_93 = arith.constant 256 : index
    %114 = vector.load %arg2[%c3_91, %c0_92, %c256_93] : memref<4x128x512xf32, #tpu.memory_space<vmem>>, vector<1x128x128xf32>
    %115 = vector.shape_cast %114 : vector<1x128x128xf32> to vector<128x128xf32>
    %c3_94 = arith.constant 3 : index
    %c0_95 = arith.constant 0 : index
    %c384_96 = arith.constant 384 : index
    %116 = vector.load %arg2[%c3_94, %c0_95, %c384_96] : memref<4x128x512xf32, #tpu.memory_space<vmem>>, vector<1x128x128xf32>
    %117 = vector.shape_cast %116 : vector<1x128x128xf32> to vector<128x128xf32>
    %c3_97 = arith.constant 3 : index
    %c0_98 = arith.constant 0 : index
    %c0_99 = arith.constant 0 : index
    %118 = vector.load %arg3[%c3_97, %c0_98, %c0_99] : memref<4x4x128xf32, #tpu.memory_space<vmem>>, vector<1x1x128xf32>
    %119 = vector.shape_cast %118 : vector<1x1x128xf32> to vector<1x128xf32>
    %c3_100 = arith.constant 3 : index
    %c1_101 = arith.constant 1 : index
    %c0_102 = arith.constant 0 : index
    %120 = vector.load %arg3[%c3_100, %c1_101, %c0_102] : memref<4x4x128xf32, #tpu.memory_space<vmem>>, vector<1x1x128xf32>
    %121 = vector.shape_cast %120 : vector<1x1x128xf32> to vector<1x128xf32>
    %c3_103 = arith.constant 3 : index
    %c2_104 = arith.constant 2 : index
    %c0_105 = arith.constant 0 : index
    %122 = vector.load %arg3[%c3_103, %c2_104, %c0_105] : memref<4x4x128xf32, #tpu.memory_space<vmem>>, vector<1x1x128xf32>
    %123 = vector.shape_cast %122 : vector<1x1x128xf32> to vector<1x128xf32>
    %c3_106 = arith.constant 3 : index
    %c3_107 = arith.constant 3 : index
    %c0_108 = arith.constant 0 : index
    %124 = vector.load %arg3[%c3_106, %c3_107, %c0_108] : memref<4x4x128xf32, #tpu.memory_space<vmem>>, vector<1x1x128xf32>
    %125 = vector.shape_cast %124 : vector<1x1x128xf32> to vector<1x128xf32>
    %cst_109 = arith.constant dense<0.000000e+00> : vector<256x128xf32>
    %126 = tpu.matmul %108, %111, %cst_109 {dimension_numbers = #tpu.dot_dimension_numbers<[1], [0], [0], [1], [0, 0, 1, 1], [], []>} : vector<256x128xf32>, vector<128x128xf32>, vector<256x128xf32> -> vector<256x128xf32>
    %127 = vector.broadcast %119 : vector<1x128xf32> to vector<256x128xf32>
    %128 = arith.addf %126, %127 : vector<256x128xf32>
    %cst_110 = arith.constant 0.000000e+00 : f32
    %129 = vector.broadcast %cst_110 : f32 to vector<256x128xf32>
    %130 = arith.maximumf %128, %129 : vector<256x128xf32>
    %cst_111 = arith.constant dense<0.000000e+00> : vector<256x128xf32>
    %131 = tpu.matmul %130, %113, %cst_111 {dimension_numbers = #tpu.dot_dimension_numbers<[1], [0], [0], [1], [0, 0, 1, 1], [], []>} : vector<256x128xf32>, vector<128x128xf32>, vector<256x128xf32> -> vector<256x128xf32>
    %132 = vector.broadcast %121 : vector<1x128xf32> to vector<256x128xf32>
    %133 = arith.addf %131, %132 : vector<256x128xf32>
    %cst_112 = arith.constant 0.000000e+00 : f32
    %134 = vector.broadcast %cst_112 : f32 to vector<256x128xf32>
    %135 = arith.maximumf %133, %134 : vector<256x128xf32>
    %cst_113 = arith.constant dense<0.000000e+00> : vector<256x128xf32>
    %136 = tpu.matmul %135, %115, %cst_113 {dimension_numbers = #tpu.dot_dimension_numbers<[1], [0], [0], [1], [0, 0, 1, 1], [], []>} : vector<256x128xf32>, vector<128x128xf32>, vector<256x128xf32> -> vector<256x128xf32>
    %137 = vector.broadcast %123 : vector<1x128xf32> to vector<256x128xf32>
    %138 = arith.addf %136, %137 : vector<256x128xf32>
    %cst_114 = arith.constant dense<0.000000e+00> : vector<256x128xf32>
    %139 = tpu.matmul %135, %117, %cst_114 {dimension_numbers = #tpu.dot_dimension_numbers<[1], [0], [0], [1], [0, 0, 1, 1], [], []>} : vector<256x128xf32>, vector<128x128xf32>, vector<256x128xf32> -> vector<256x128xf32>
    %140 = vector.broadcast %125 : vector<1x128xf32> to vector<256x128xf32>
    %141 = arith.addf %139, %140 : vector<256x128xf32>
    %142 = arith.addf %108, %141 : vector<256x128xf32>
    %143 = math.exp %138 : vector<256x128xf32>
    %144 = arith.mulf %142, %143 : vector<256x128xf32>
    %145 = arith.addf %109, %138 : vector<256x128xf32>
    %c0_115 = arith.constant 0 : index
    %c0_116 = arith.constant 0 : index
    %146 = vector.load %arg4[%c0_115, %c0_116] : memref<256x256xf32, #tpu.memory_space<vmem>>, vector<256x128xf32>
    tpu.vector_store %arg4[%c0_115, %c0_116], %144 {strides = array<i32>} : memref<256x256xf32, #tpu.memory_space<vmem>>, vector<256x128xf32>,
    %c0_117 = arith.constant 0 : index
    %c128_118 = arith.constant 128 : index
    %147 = vector.load %arg4[%c0_117, %c128_118] : memref<256x256xf32, #tpu.memory_space<vmem>>, vector<256x128xf32>
    tpu.vector_store %arg4[%c0_117, %c128_118], %145 {strides = array<i32>} : memref<256x256xf32, #tpu.memory_space<vmem>>, vector<256x128xf32>,
    return
  }
  func.func @transform_0(%arg0: i32) -> (i32, i32) {
    %c0_i32 = arith.constant 0 : i32
    %c0_i32_0 = arith.constant 0 : i32
    return %arg0, %c0_i32 : i32, i32
  }
  func.func @transform_1(%arg0: i32) -> (i32, i32, i32) {
    %c0_i32 = arith.constant 0 : i32
    %c0_i32_0 = arith.constant 0 : i32
    %c0_i32_1 = arith.constant 0 : i32
    %c0_i32_2 = arith.constant 0 : i32
    return %c0_i32, %c0_i32_0, %c0_i32_1 : i32, i32, i32
  }
  func.func @transform_2(%arg0: i32) -> (i32, i32, i32) {
    %c0_i32 = arith.constant 0 : i32
    %c0_i32_0 = arith.constant 0 : i32
    %c0_i32_1 = arith.constant 0 : i32
    %c0_i32_2 = arith.constant 0 : i32
    return %c0_i32, %c0_i32_0, %c0_i32_1 : i32, i32, i32
  }
  func.func @transform_3(%arg0: i32) -> (i32, i32) {
    %c0_i32 = arith.constant 0 : i32
    %c0_i32_0 = arith.constant 0 : i32
    return %arg0, %c0_i32 : i32, i32
  }
}

</mosaic_0001>

<bundles_post_ra>
// kernel: tpu_custom_call.1
= control target key start
LH: loop header
LB: loop body
LE: loop exit
PB: predicated region body
PF: predicated region fallthrough
CT: control target
= control target key end

     0   :  { %8 = vsyncpa [#allocation3], 0  ;;  %s9737_s0 = inlined_call_operand.hbm [shape: f32[512,128], index: 0, kind: input, shape index: {}]   ;;  %s9738_s1 = inlined_call_operand.hbm [shape: f32[4,128,512], index: 1, kind: input, shape index: {}]   ;;  %s9739_s2 = inlined_call_operand.hbm [shape: f32[4,4,128], index: 2, kind: input, shape index: {}]   ;;  %s9740_s3 = inlined_call_operand.hbm [shape: f32[512,256], index: 3, kind: output, shape index: {}]  }
   0x1   :  { %10 = vsyncpa [#allocation3 + $0x1], 0 }
   0x2   :  { %11 = vsyncpa [#allocation6], 0 }
   0x3   :  { %12 = vsyncpa [#allocation4], 0 }
   0x4   :  { %14 = vsyncpa [#allocation4 + $0x1], 0  ;;  %s7892_s12 = smov 0   ;;  %s7894_s13 = smov 0  }
   0x5   :  { %s7896_s14 = smov 0   ;;  %s7898_s15 = smov 0  }
   0x6 LB: > { %s7913_s16 = sadd.s32 4294967295, %s7858_s15   ;;  %s5261_s17 = sadd.s32 4294967294, %s7858_s15   ;;  %s7858_s15 = sphi %s7898_s15, %s9990_s15   ;;  %s7854_s14 = sphi %s7896_s14, %s9989_s14   ;;  %s7850_s13 = sphi %s7894_s13, %s9988_s13   ;;  %s7846_s12 = sphi %s7892_s12, %s9987_s12  }
   0x7   : > { %p40_p0 = scmp.ne.s32.totalorder %s7850_s13, %s7846_s12  ;;  %p9741_p1 = scmp.eq.s32.totalorder %s7913_s16, 0 }
   0x8   : > { %p112_p3 = scmp.eq.s32.totalorder %s5261_s17, 1  ;;  %p5262_p5 = scmp.ge.s32.totalorder %s7858_s15, 1 }
   0x9   : > { %p7922_p4 = por %p9741_p1, %p40_p0  ;;  %p119_p7 = scmp.lt.s32.totalorder %s7858_s15, 3 }
   0xa   : > { %p7927_p6 = por %p112_p3, %p40_p0  ;;  %s7860_s21 = smov [#allocation5]  }
   0xb   : > { %s9807_s18 = scalar_select %p7922_p4, 1, 0 }
   0xc   : > { %s9808_s19 = scalar_select %p7927_p6, 1, 0 }
   0xd   : > { %p7932_p8 = pnand %p5262_p5, %p119_p7  ;;  %s131_s22 = sshll.u32 %s7860_s21, 4  ;;  %s132_s22 = int_to_ptr.vmem [resolvable:$true] %s131_s22 }
   0xe   : > { %s7861_s24 = smov [#allocation7]   ;;  %s7721_s26 = scalar_lea.vmem %s132_s22, 32768 }
   0xf   : > { %s9809_s20 = scalar_select %p7932_p8, 1, 0 }
  0x10   : > { %p7359_p9 = pneg %p7932_p8  ;;  %s144_s25 = sshll.u32 %s7861_s24, 4  ;;  %s145_s25 = int_to_ptr.vmem [resolvable:$true] %s144_s25 }
  0x11   : > { %p7722_p13 = scmp.ne.s32.totalorder %s132_s22, %s7721_s26  ;;  %p7729_p5 = scmp.lt.s32.totalorder %s132_s22, %s132_s22 }
  0x12   : > { %p7941_p11 = pnand %p7359_p9, %p9741_p1  ;;  %p7730_p7 = scmp.lt.s32.totalorder %s7721_s26, %s7721_s26 }
  0x14   : > { %p7712_p12 = pneg %p7941_p11  ;;  %p7731_p10 = por %p7730_p7, %p7729_p5 }
  0x16   : > { %p7724_p0 = pnand %p7722_p13, %p7712_p12 }
  0x18   : > { %p7725_p3 = pneg %p7724_p0 }
  0x1a   : > { %p7732_p9 = pnand %p7731_p10, %p7725_p3 }
  0x1c   : > { %7735 = shalt.err (!%p7732_p9)
}
  0x1d   : > { %s7862_s27 = smov 512   ;;  %s7863_s28 = smov 32  }
  0x1e   : > { %7362 = dma.hbm_to_vmem [thread:$0]  (!%p7941_p11), %s9738_s1, 32768, %s132_s22, [#allocation6], %s7862_s27, %s7862_s27, %s7863_s28  }
  0x1f   : > { %s7747_s4 = scalar_lea.vmem %s145_s25, 256  ;;  %p7755_p2 = scmp.lt.s32.totalorder %s145_s25, %s145_s25 }
  0x20   : > { %p7748_p1 = scmp.ne.s32.totalorder %s145_s25, %s7747_s4  ;;  %p7756_p6 = scmp.lt.s32.totalorder %s7747_s4, %s7747_s4 }
  0x22   : > { %p7750_p13 = pnand %p7748_p1, %p7712_p12  ;;  %p7757_p5 = por %p7756_p6, %p7755_p2 }
  0x24   : > { %p7751_p0 = pneg %p7750_p13 }
  0x26   : > { %p7758_p10 = pnand %p7757_p5, %p7751_p0 }
  0x28   : > { %7761 = shalt.err (!%p7758_p10)
}
  0x29   : > { %s7864_s5 = smov 64   ;;  %s7865_s6 = smov 4  }
  0x2a   : > { %7365 = dma.hbm_to_vmem [thread:$0]  (!%p7941_p11), %s9739_s2, 256, %s145_s25, [#allocation6], %s7864_s5, %s7864_s5, %s7865_s6  }
  0x2b   : > { %s7964_s9 = sadd.s32 1, %s7858_s15   ;;  %s27_s11 = sadd.s32 1, %s7854_s14 }
  0x2c   : > { %s24_s10 = ssub.s32 %s7858_s15, %s7964_s9  ;;  %p34_p2 = scmp.ne.s32.totalorder %s7854_s14, %s7850_s13 }
  0x2d   : > { %p25_p1 = scmp.eq.s32.totalorder %s24_s10, 0  ;;  %p35_p6 = scmp.eq.s32.totalorder %s7858_s15, 0 }
  0x2e   : > { %p9811_p3 = scmp.eq.s32.totalorder %s7913_s16, 1  ;;  %p7376_p9 = scmp.lt.s32.totalorder %s7858_s15, 2 }
  0x2f   : > { %s7973_s17 = scalar_select %p25_p1, %s7854_s14, %s27_s11  }
  0x30   : > { %p36_p12 = por %p35_p6, %p34_p2  ;;  %p7977_p7 = por %p9811_p3, %p34_p2 }
  0x31   : > { %s158_s22 = sand.u32 1, %s7854_s14   ;;  %s5296_s24 = sshll.u32 %s7858_s15, 12 }
  0x32   : > { %s9812_s21 = scalar_select %p7977_p7, 1, 0 }
  0x33   : > { %s5266_s23 = sshll.u32 %s158_s22, 8  ;;  %s7987_s27 = scalar_lea.hbm %s9737_s0, %s5296_s24 }
  0x34   : > { %s162_s28 = scalar_lea.vmem [#allocation2], %s5266_s23  ;;  %p7991_p11 = pnand %p7376_p9, %p36_p12 }
  0x35   : > { %s169_s29 = sshll.u32 %s162_s28, 4  ;;  %s7995_s4 = scalar_lea.sflag [#allocation3], %s158_s22  ;;  %s7989_s29 = int_to_ptr.vmem [resolvable:$true] %s169_s29 }
  0x36   : > { %s7762_s5 = scalar_lea.hbm %s7987_s27, 4096  ;;  %p7764_p0 = pneg %p7991_p11 }
  0x37   : > { %p7763_p13 = scmp.ne.s32.totalorder %s7987_s27, %s7762_s5  ;;  %s7767_s8 = scalar_lea.hbm %s9737_s0, 8192 }
  0x38   : > { %p7768_p1 = scmp.lt.s32.totalorder %s7987_s27, %s9737_s0  ;;  %p7769_p2 = scmp.lt.s32.totalorder %s7767_s8, %s7762_s5 }
  0x39   : > { %p7765_p5 = pnand %p7764_p0, %p7763_p13 }
  0x3a   : > { %p7770_p6 = por %p7769_p2, %p7768_p1 }
  0x3b   : > { %p7766_p10 = pneg %p7765_p5 }
  0x3d   : > { %p7771_p12 = pnand %p7770_p6, %p7766_p10 }
  0x3f   : > { %7774 = shalt.err (!%p7771_p12)
}
  0x40   : > { %s7775_s22 = scalar_lea.vmem %s7989_s29, 4096  ;;  %s7866_s23 = smov [#allocation2]  }
  0x41   : > { %p7776_p3 = scmp.ne.s32.totalorder %s7989_s29, %s7775_s22  ;;  %s7780_s24 = sshll.u32 %s7866_s23, 4  ;;  %s7781_s24 = int_to_ptr.vmem [resolvable:$false] %s7780_s24 }
  0x42   : > { %s7782_s25 = scalar_lea.vmem %s7781_s24, 8192  ;;  %p7783_p5 = scmp.lt.s32.totalorder %s7989_s29, %s7781_s24 }
  0x43   : > { %p7778_p9 = pnand %p7776_p3, %p7764_p0  ;;  %p7784_p7 = scmp.lt.s32.totalorder %s7782_s25, %s7775_s22 }
  0x45   : > { %p7779_p13 = pneg %p7778_p9  ;;  %p7785_p4 = por %p7784_p7, %p7783_p5 }
  0x47   : > { %p7786_p8 = pnand %p7785_p4, %p7779_p13 }
  0x49   : > { %7789 = shalt.err (!%p7786_p8)
}
  0x4a   : > { %s7867_s26 = smov 128   ;;  %s7868_s28 = smov 8  }
  0x4b   : > { %7369 = dma.hbm_to_vmem [thread:$0]  (!%p7991_p11), %s7987_s27, 4096, %s7989_s29, %s7995_s4, %s7867_s26, %s7867_s26, %s7868_s28  }
  0x4c   : > { %p9814_p0 = scmp.ne.s32.totalorder %s9809_s20, 0 }
  0x4e   : > { %181 = sbr.rel (%p9814_p0) target bundleno = 2660 (0xa64), region = 32 }
  0x53   : > { %s8019_s5 = sand.u32 1, %s7850_s13   ;;  %p9815_p4 = scmp.ne.s32.totalorder %s9807_s18, 0 }
  0x54   : > { %s5270_s6 = sshll.u32 %s8019_s5, 8  ;;  %s184_s7 = scalar_lea.sflag [#allocation3], %s8019_s5 }
  0x55   : > { %s8023_s8 = scalar_lea.vmem [#allocation2], %s5270_s6 }
  0x56   : > { %7833 = dma.done.wait (%p9815_p4), %s184_s7, 4096  }
  0x57   : > { %7835 = vsyncadd (%p9815_p4), %s184_s7, 4294963200  ;;  %p9816_p8 = scmp.eq.s32.totalorder %s7913_s16, 0 }
  0x59   : > { %7837 = dma.done.wait (%p9816_p8), [#allocation6], 33024   ;;  %p9817_p7 = pmov %p9816_p8 }
  0x5a   : > { %v267_v0 = vld [vmem:[#allocation5 + $0x1e0] sm:$0xff]  ;;  %v283_v11 = vld [vmem:[#allocation5 + $0x1e8] sm:$0xff]  ;;  %v222_v27 = vld [vmem:[%s8023_s8 + $0x10] sm:$0xff]  ;;  %s5273_s18 = sshll.u32 %s8019_s5, 9  ;;  %s5298_s27 = sshll.u32 %s7913_s16, 13 }
  0x5b   : > { %7839 = vsyncadd (%p9817_p7), [#allocation6], 4294934272  ;;  %v266_v1 = vld [vmem:[#allocation5 + $0x1c0] sm:$0xff]  ;;  %6067 = vmatprep.subr.mxu0 %v267_v0  ;;  %v282_v12 = vld [vmem:[#allocation5 + $0x1c8] sm:$0xff]  ;;  %6147 = vmatprep.subr.mxu1 %v283_v11  ;;  %s9434_s20 = scalar_lea.vmem [#allocation8], %s5273_s18  ;;  %s9691_s10 = scalar_lea.hbm %s9740_s3, %s5298_s27 }
  0x5c   : > { %6068 = vmatpush3.msra.mxu0 %v267_v0  ;;  %v265_v2 = vld [vmem:[#allocation5 + $0x1a0] sm:$0xff]  ;;  %6148 = vmatpush3.msra.mxu1 %v283_v11  ;;  %v281_v14 = vld [vmem:[#allocation5 + $0x1a8] sm:$0xff]  ;;  %v223_v29 = vld [vmem:[%s8023_s8 + $0x18] sm:$0xff]  ;;  %s5169_s29 = sshll.u32 %s9434_s20, 4  ;;  %s5155_s16 = scalar_lea.sflag [#allocation4], %s8019_s5  ;;  %s9693_s29 = int_to_ptr.vmem [resolvable:$true] %s5169_s29 }
  0x5d   : > { %6069 = vmatprep.subr.mxu0 %v266_v1  ;;  %v264_v3 = vld [vmem:[#allocation5 + $0x180] sm:$0xff]  ;;  %6149 = vmatprep.subr.mxu1 %v282_v12  ;;  %v280_v16 = vld [vmem:[#allocation5 + $0x188] sm:$0xff]  ;;  %v226_v34 = vld [vmem:[%s8023_s8 + $0x30] sm:$0xff]  ;;  %s7790_s11 = scalar_lea.vmem %s9693_s29, 8192  ;;  %p9984_p10 = scmp.ne.s32.totalorder %s9812_s21, 0 }
  0x5e   : > { %6070 = vmatpush3.msra.mxu0 %v266_v1  ;;  %v220_v4 = vld [vmem:[%s8023_s8] sm:$0xff]  ;;  %6150 = vmatpush3.msra.mxu1 %v282_v12  ;;  %v279_v18 = vld [vmem:[#allocation5 + $0x168] sm:$0xff]  ;;  %v227_v35 = vld [vmem:[%s8023_s8 + $0x38] sm:$0xff]  ;;  %p7791_p11 = scmp.ne.s32.totalorder %s9693_s29, %s7790_s11  ;;  %s7869_s22 = smov [#allocation8]  }
  0x5f   : > { %6071 = vmatprep.subr.mxu0 %v265_v2  ;;  %v263_v5 = vld [vmem:[#allocation5 + $0x160] sm:$0xff]  ;;  %6099 = vmatprep.mubr.f32.mxu0 %v220_v4  ;;  %v278_v20 = vld [vmem:[#allocation5 + $0x148] sm:$0xff]  ;;  %v230_v38 = vld [vmem:[%s8023_s8 + $0x50] sm:$0xff]  ;;  %s7794_s23 = sshll.u32 %s7869_s22, 4  ;;  %s7795_s23 = int_to_ptr.vmem [resolvable:$false] %s7794_s23 }
  0x60   : > { %6072 = vmatpush3.msra.mxu0 %v265_v2  ;;  %v262_v6 = vld [vmem:[#allocation5 + $0x140] sm:$0xff]  ;;  %6151 = vmatprep.subr.mxu1 %v281_v14  ;;  %v277_v22 = vld [vmem:[#allocation5 + $0x128] sm:$0xff]  ;;  %v231_v39 = vld [vmem:[%s8023_s8 + $0x58] sm:$0xff]  ;;  %p7792_p1 = pnand %p7791_p11, %p9984_p10  ;;  %s7796_s24 = scalar_lea.vmem %s7795_s23, 16384 }
  0x61   : > { %6073 = vmatprep.subr.mxu0 %v264_v3  ;;  %v261_v7 = vld [vmem:[#allocation5 + $0x120] sm:$0xff]  ;;  %6152 = vmatpush3.msra.mxu1 %v281_v14  ;;  %v276_v24 = vld [vmem:[#allocation5 + $0x108] sm:$0xff]  ;;  %v234_v42 = vld [vmem:[%s8023_s8 + $0x70] sm:$0xff]  ;;  %p7797_p6 = scmp.lt.s32.totalorder %s9693_s29, %s7795_s23  ;;  %p7798_p12 = scmp.lt.s32.totalorder %s7796_s24, %s7790_s11 }
  0x62   : > { %6074 = vmatpush3.msra.mxu0 %v264_v3  ;;  %v260_v8 = vld [vmem:[#allocation5 + $0x100] sm:$0xff]  ;;  %6153 = vmatprep.subr.mxu1 %v280_v16  ;;  %v221_v25 = vld [vmem:[%s8023_s8 + $0x8] sm:$0xff]  ;;  %v235_v43 = vld [vmem:[%s8023_s8 + $0x78] sm:$0xff]  ;;  %p7793_p2 = pneg %p7792_p1 }
  0x63   : > { %6075 = vmatprep.subr.mxu0 %v263_v5  ;;  %v259_v9 = vld [vmem:[#allocation5 + $0xe0] sm:$0xff]  ;;  %6154 = vmatpush3.msra.mxu1 %v280_v16  ;;  %v275_v26 = vld [vmem:[#allocation5 + $0xe8] sm:$0xff]  ;;  %v238_v46 = vld [vmem:[%s8023_s8 + $0x90] sm:$0xff]  ;;  %p7799_p3 = por %p7798_p12, %p7797_p6 }
  0x64   : > { %6076 = vmatpush3.msra.mxu0 %v263_v5  ;;  %v258_v10 = vld [vmem:[#allocation5 + $0xc0] sm:$0xff]  ;;  %6155 = vmatprep.subr.mxu1 %v279_v18  ;;  %v274_v28 = vld [vmem:[#allocation5 + $0xc8] sm:$0xff]  ;;  %v239_v47 = vld [vmem:[%s8023_s8 + $0x98] sm:$0xff] }
  0x65   : > { %6077 = vmatprep.subr.mxu0 %v262_v6  ;;  %v257_v13 = vld [vmem:[#allocation5 + $0xa0] sm:$0xff]  ;;  %6156 = vmatpush3.msra.mxu1 %v279_v18  ;;  %v273_v30 = vld [vmem:[#allocation5 + $0xa8] sm:$0xff]  ;;  %v242_v50 = vld [vmem:[%s8023_s8 + $0xb0] sm:$0xff]  ;;  %p7800_p9 = pnand %p7799_p3, %p7793_p2 }
  0x66   : > { %6078 = vmatpush3.msra.mxu0 %v262_v6  ;;  %v256_v15 = vld [vmem:[#allocation5 + $0x80] sm:$0xff]  ;;  %6157 = vmatprep.subr.mxu1 %v278_v20  ;;  %v272_v32 = vld [vmem:[#allocation5 + $0x88] sm:$0xff]  ;;  %v243_v51 = vld [vmem:[%s8023_s8 + $0xb8] sm:$0xff] }
  0x67   : > { %6079 = vmatprep.subr.mxu0 %v261_v7  ;;  %v255_v17 = vld [vmem:[#allocation5 + $0x60] sm:$0xff]  ;;  %6158 = vmatpush3.msra.mxu1 %v278_v20  ;;  %v225_v33 = vld [vmem:[%s8023_s8 + $0x28] sm:$0xff]  ;;  %v246_v54 = vld [vmem:[%s8023_s8 + $0xd0] sm:$0xff] }
  0x68   : > { %6080 = vmatpush3.msra.mxu0 %v261_v7  ;;  %v254_v19 = vld [vmem:[#allocation5 + $0x40] sm:$0xff]  ;;  %6159 = vmatprep.subr.mxu1 %v277_v22  ;;  %v229_v37 = vld [vmem:[%s8023_s8 + $0x48] sm:$0xff]  ;;  %v247_v55 = vld [vmem:[%s8023_s8 + $0xd8] sm:$0xff] }
  0x69   : > { %6081 = vmatprep.subr.mxu0 %v260_v8  ;;  %v253_v21 = vld [vmem:[#allocation5 + $0x20] sm:$0xff]  ;;  %6160 = vmatpush3.msra.mxu1 %v277_v22  ;;  %v233_v41 = vld [vmem:[%s8023_s8 + $0x68] sm:$0xff]  ;;  %v250_v58 = vld [vmem:[%s8023_s8 + $0xf0] sm:$0xff] }
  0x6a   : > { %6082 = vmatpush3.msra.mxu0 %v260_v8  ;;  %v252_v23 = vld [vmem:[#allocation5] sm:$0xff]  ;;  %6161 = vmatprep.subr.mxu1 %v276_v24  ;;  %v237_v45 = vld [vmem:[%s8023_s8 + $0x88] sm:$0xff]  ;;  %v251_v59 = vld [vmem:[%s8023_s8 + $0xf8] sm:$0xff] }
  0x6b   : > { %6083 = vmatprep.subr.mxu0 %v259_v9  ;;  %6162 = vmatpush3.msra.mxu1 %v276_v24  ;;  %v224_v31 = vld [vmem:[%s8023_s8 + $0x20] sm:$0xff]  ;;  %v241_v49 = vld [vmem:[%s8023_s8 + $0xa8] sm:$0xff]  ;;  %v299_v0 = vld [vmem:[#allocation5 + $0x1f0] sm:$0xff] }
  0x6c   : > { %6084 = vmatpush3.msra.mxu0 %v259_v9  ;;  %6163 = vmatprep.subr.mxu1 %v275_v26  ;;  %v228_v36 = vld [vmem:[%s8023_s8 + $0x40] sm:$0xff]  ;;  %v245_v53 = vld [vmem:[%s8023_s8 + $0xc8] sm:$0xff]  ;;  %v298_v1 = vld [vmem:[#allocation5 + $0x1d0] sm:$0xff] }
  0x6d   : > { %6085 = vmatprep.subr.mxu0 %v258_v10  ;;  %6164 = vmatpush3.msra.mxu1 %v275_v26  ;;  %v232_v40 = vld [vmem:[%s8023_s8 + $0x60] sm:$0xff]  ;;  %v249_v57 = vld [vmem:[%s8023_s8 + $0xe8] sm:$0xff]  ;;  %v315_v2 = vld [vmem:[#allocation5 + $0x1f8] sm:$0xff] }
  0x6e   : > { %6086 = vmatpush3.msra.mxu0 %v258_v10  ;;  %6165 = vmatprep.subr.mxu1 %v274_v28  ;;  %v236_v44 = vld [vmem:[%s8023_s8 + $0x80] sm:$0xff]  ;;  %v271_v60 = vld [vmem:[#allocation5 + $0x68] sm:$0xff]  ;;  %v297_v3 = vld [vmem:[#allocation5 + $0x1b0] sm:$0xff] }
  0x6f   : > { %6087 = vmatprep.subr.mxu0 %v257_v13  ;;  %6166 = vmatpush3.msra.mxu1 %v274_v28  ;;  %v240_v48 = vld [vmem:[%s8023_s8 + $0xa0] sm:$0xff]  ;;  %v270_v61 = vld [vmem:[#allocation5 + $0x48] sm:$0xff]  ;;  %v296_v4 = vld [vmem:[#allocation5 + $0x190] sm:$0xff] }
  0x70   : > { %6088 = vmatpush3.msra.mxu0 %v257_v13  ;;  %6167 = vmatprep.subr.mxu1 %v273_v30  ;;  %v244_v52 = vld [vmem:[%s8023_s8 + $0xc0] sm:$0xff]  ;;  %v269_v62 = vld [vmem:[#allocation5 + $0x28] sm:$0xff]  ;;  %v295_v5 = vld [vmem:[#allocation5 + $0x170] sm:$0xff] }
  0x71   : > { %6089 = vmatprep.subr.mxu0 %v256_v15  ;;  %6168 = vmatpush3.msra.mxu1 %v273_v30  ;;  %v248_v56 = vld [vmem:[%s8023_s8 + $0xe0] sm:$0xff]  ;;  %v268_v63 = vld [vmem:[#allocation5 + $0x8] sm:$0xff]  ;;  %v294_v6 = vld [vmem:[#allocation5 + $0x150] sm:$0xff] }
  0x72   : > { %6090 = vmatpush3.msra.mxu0 %v256_v15  ;;  %6169 = vmatprep.subr.mxu1 %v272_v32  ;;  %v293_v7 = vld [vmem:[#allocation5 + $0x130] sm:$0xff]  ;;  %v8065_v16 = vld [vmem:[#allocation7] ss:$0 sm:$0xff]  ;;  %v313_v30 = vld [vmem:[#allocation5 + $0x1b8] sm:$0xff] }
  0x73   : > { %6091 = vmatprep.subr.mxu0 %v255_v17  ;;  %6170 = vmatpush3.msra.mxu1 %v272_v32  ;;  %v292_v8 = vld [vmem:[#allocation5 + $0x110] sm:$0xff] }
  0x74   : > { %6092 = vmatpush3.msra.mxu0 %v255_v17  ;;  %6171 = vmatprep.subr.mxu1 %v271_v60  ;;  %v291_v9 = vld [vmem:[#allocation5 + $0xf0] sm:$0xff] }
  0x75   : > { %6093 = vmatprep.subr.mxu0 %v254_v19  ;;  %6172 = vmatpush3.msra.mxu1 %v271_v60  ;;  %v290_v10 = vld [vmem:[#allocation5 + $0xd0] sm:$0xff] }
  0x76   : > { %6094 = vmatpush3.msra.mxu0 %v254_v19  ;;  %6173 = vmatprep.subr.mxu1 %v270_v61  ;;  %v289_v11 = vld [vmem:[#allocation5 + $0xb0] sm:$0xff] }
  0x77   : > { %6095 = vmatprep.subr.mxu0 %v253_v21  ;;  %6174 = vmatpush3.msra.mxu1 %v270_v61  ;;  %v288_v12 = vld [vmem:[#allocation5 + $0x90] sm:$0xff] }
  0x78   : > { %6096 = vmatpush3.msra.mxu0 %v253_v21  ;;  %6175 = vmatprep.subr.mxu1 %v269_v62  ;;  %v287_v13 = vld [vmem:[#allocation5 + $0x70] sm:$0xff] }
  0x79   : > { %6097 = vmatprep.subr.mxu0 %v252_v23  ;;  %6176 = vmatpush3.msra.mxu1 %v269_v62  ;;  %v286_v14 = vld [vmem:[#allocation5 + $0x50] sm:$0xff]  ;;  %v305_v62 = vld [vmem:[#allocation5 + $0xb8] sm:$0xff] }
  0x7a   : > { %6098 = vmatpush3.msra.mxu0 %v252_v23  ;;  %6177 = vmatprep.subr.mxu1 %v268_v63  ;;  %v285_v15 = vld [vmem:[#allocation5 + $0x30] sm:$0xff] }
  0x7b   : > { %6100 = vmatmul.mubr.f32.vlgmr.msra.gmra.mxu0 %v221_v25  ;;  %6178 = vmatpush3.msra.mxu1 %v268_v63 }
  0x7c   : > { %6102 = vmatprep.mubr.f32.mxu0 %v222_v27  ;;  %6227 = vmatprep.subr.mxu0 %v299_v0  ;;  %v314_v27 = vld [vmem:[#allocation5 + $0x1d8] sm:$0xff] }
  0x7d   : > { %6228 = vmatpush3.msra.mxu0 %v299_v0  ;;  %6307 = vmatprep.subr.mxu1 %v315_v2 }
  0x7e   : > { %6229 = vmatprep.subr.mxu0 %v298_v1 }
  0x7f   : > { %6103 = vmatmul.mubr.f32.gmra.mxu0 %v223_v29 }
  0x80   : > { %6105 = vmatprep.mubr.f32.mxu0 %v224_v31  ;;  %6230 = vmatpush3.msra.mxu0 %v298_v1 }
  0x81   : > { %6231 = vmatprep.subr.mxu0 %v297_v3 }
  0x82   : > { %6232 = vmatpush3.msra.mxu0 %v297_v3  ;;  %v304_v3 = vld [vmem:[#allocation5 + $0x98] sm:$0xff] }
  0x83   : > { %6106 = vmatmul.mubr.f32.gmra.mxu0 %v225_v33  ;;  %6233 = vmatprep.subr.mxu0 %v296_v4 }
  0x84   : > { %6108 = vmatprep.mubr.f32.mxu0 %v226_v34  ;;  %6234 = vmatpush3.msra.mxu0 %v296_v4 }
  0x85   : > { %6235 = vmatprep.subr.mxu0 %v295_v5 }
  0x86   : > { %6236 = vmatpush3.msra.mxu0 %v295_v5 }
  0x87   : > { %6109 = vmatmul.mubr.f32.gmra.mxu0 %v227_v35  ;;  %6237 = vmatprep.subr.mxu0 %v294_v6  ;;  %v312_v35 = vld [vmem:[#allocation5 + $0x198] sm:$0xff] }
  0x88   : > { %6111 = vmatprep.mubr.f32.mxu0 %v228_v36  ;;  %6238 = vmatpush3.msra.mxu0 %v294_v6 }
  0x89   : > { %6239 = vmatprep.subr.mxu0 %v293_v7 }
  0x8a   : > { %6240 = vmatpush3.msra.mxu0 %v293_v7 }
  0x8b   : > { %6112 = vmatmul.mubr.f32.gmra.mxu0 %v229_v37  ;;  %6241 = vmatprep.subr.mxu0 %v292_v8 }
  0x8c   : > { %6114 = vmatprep.mubr.f32.mxu0 %v230_v38  ;;  %6242 = vmatpush3.msra.mxu0 %v292_v8  ;;  %v311_v38 = vld [vmem:[#allocation5 + $0x178] sm:$0xff] }
  0x8d   : > { %6243 = vmatprep.subr.mxu0 %v291_v9 }
  0x8e   : > { %6244 = vmatpush3.msra.mxu0 %v291_v9 }
  0x8f   : > { %6115 = vmatmul.mubr.f32.gmra.mxu0 %v231_v39  ;;  %6245 = vmatprep.subr.mxu0 %v290_v10 }
  0x90   : > { %6117 = vmatprep.mubr.f32.mxu0 %v232_v40  ;;  %6246 = vmatpush3.msra.mxu0 %v290_v10 }
  0x91   : > { %6247 = vmatprep.subr.mxu0 %v289_v11 }
  0x92   : > { %6248 = vmatpush3.msra.mxu0 %v289_v11 }
  0x93   : > { %6118 = vmatmul.mubr.f32.gmra.mxu0 %v233_v41  ;;  %6249 = vmatprep.subr.mxu0 %v288_v12 }
  0x94   : > { %6120 = vmatprep.mubr.f32.mxu0 %v234_v42  ;;  %6250 = vmatpush3.msra.mxu0 %v288_v12 }
  0x95   : > { %6251 = vmatprep.subr.mxu0 %v287_v13 }
  0x96   : > { %6252 = vmatpush3.msra.mxu0 %v287_v13 }
  0x97   : > { %6121 = vmatmul.mubr.f32.gmra.mxu0 %v235_v43  ;;  %6253 = vmatprep.subr.mxu0 %v286_v14  ;;  %v310_v43 = vld [vmem:[#allocation5 + $0x158] sm:$0xff] }
  0x98   : > { %6123 = vmatprep.mubr.f32.mxu0 %v236_v44  ;;  %6254 = vmatpush3.msra.mxu0 %v286_v14 }
  0x99   : > { %6255 = vmatprep.subr.mxu0 %v285_v15 }
  0x9a   : > { %6256 = vmatpush3.msra.mxu0 %v285_v15 }
  0x9b   : > { %6124 = vmatmul.mubr.f32.gmra.mxu0 %v237_v45 }
  0x9c   : > { %6126 = vmatprep.mubr.f32.mxu0 %v238_v46  ;;  %v309_v46 = vld [vmem:[#allocation5 + $0x138] sm:$0xff] }
  0x9f   : > { %6127 = vmatmul.mubr.f32.gmra.mxu0 %v239_v47 }
  0xa0   : > { %6129 = vmatprep.mubr.f32.mxu0 %v240_v48 }
  0xa3   : > { %6130 = vmatmul.mubr.f32.gmra.mxu0 %v241_v49 }
  0xa4   : > { %6132 = vmatprep.mubr.f32.mxu0 %v242_v50 }
  0xa7   : > { %6133 = vmatmul.mubr.f32.gmra.mxu0 %v243_v51  ;;  %v308_v51 = vld [vmem:[#allocation5 + $0x118] sm:$0xff] }
  0xa8   : > { %6135 = vmatprep.mubr.f32.mxu0 %v244_v52 }
  0xab   : > { %6136 = vmatmul.mubr.f32.gmra.mxu0 %v245_v53 }
  0xac   : > { %6138 = vmatprep.mubr.f32.mxu0 %v246_v54  ;;  %v307_v54 = vld [vmem:[#allocation5 + $0xf8] sm:$0xff] }
  0xaf   : > { %6139 = vmatmul.mubr.f32.gmra.mxu0 %v247_v55 }
  0xb0   : > { %6141 = vmatprep.mubr.f32.mxu0 %v248_v56 }
  0xb3   : > { %6142 = vmatmul.mubr.f32.gmra.mxu0 %v249_v57 }
  0xb4   : > { %6144 = vmatprep.mubr.f32.mxu0 %v250_v58 }
  0xb7   : > { %6145 = vmatmul.mubr.f32.gmra.mxu0 %v251_v59  ;;  %v306_v59 = vld [vmem:[#allocation5 + $0xd8] sm:$0xff] }
 0x13b   : > { %v6101_v17 = vpop.f32.mrf.mxu0 }
 0x13c   : > { %v396_v18 = vadd.f32 %v6101_v17, %v8065_v16 }
 0x13d   : > { %v390_v19 = vpop.f32.mrf.mxu0 }
 0x13e   : > { %v391_v20 = vadd.f32 %v8065_v16, %v390_v19  ;;  %v550_v23 = vmax.f32 %v396_v18, 0.0 }
 0x13f   : > { %v6104_v21 = vpop.f32.mrf.mxu0 }
 0x140   : > { %v549_v22 = vmax.f32 %v391_v20, 0.0  ;;  %v406_v24 = vadd.f32 %v6104_v21, %v8065_v16 }
 0x141   : > { %v400_v25 = vpop.f32.mrf.mxu0 }
 0x142   : > { %v401_v26 = vadd.f32 %v8065_v16, %v400_v25  ;;  %6179 = vmatprep.mubr.f32.mxu1 %v549_v22  ;;  %v552_v31 = vmax.f32 %v406_v24, 0.0 }
 0x143   : > { %v6107_v28 = vpop.f32.mrf.mxu0  ;;  %6180 = vmatmul.mubr.f32.vlgmr.msra.gmra.mxu1 %v550_v23 }
 0x144   : > { %v551_v29 = vmax.f32 %v401_v26, 0.0  ;;  %6308 = vmatpush3.msra.mxu1 %v315_v2  ;;  %v416_v32 = vadd.f32 %v6107_v28, %v8065_v16 }
 0x145   : > { %v410_v33 = vpop.f32.mrf.mxu0  ;;  %6309 = vmatprep.subr.mxu1 %v314_v27 }
 0x146   : > { %v411_v34 = vadd.f32 %v8065_v16, %v410_v33  ;;  %6182 = vmatprep.mubr.f32.mxu1 %v551_v29  ;;  %6310 = vmatpush3.msra.mxu1 %v314_v27  ;;  %v554_v39 = vmax.f32 %v416_v32, 0.0 }
 0x147   : > { %v6110_v36 = vpop.f32.mrf.mxu0  ;;  %6183 = vmatmul.mubr.f32.gmra.mxu1 %v552_v31  ;;  %6311 = vmatprep.subr.mxu1 %v313_v30 }
 0x148   : > { %v553_v37 = vmax.f32 %v411_v34, 0.0  ;;  %6312 = vmatpush3.msra.mxu1 %v313_v30  ;;  %v426_v40 = vadd.f32 %v6110_v36, %v8065_v16 }
 0x149   : > { %v420_v41 = vpop.f32.mrf.mxu0  ;;  %6313 = vmatprep.subr.mxu1 %v312_v35 }
 0x14a   : > { %v421_v42 = vadd.f32 %v8065_v16, %v420_v41  ;;  %6185 = vmatprep.mubr.f32.mxu1 %v553_v37  ;;  %6314 = vmatpush3.msra.mxu1 %v312_v35  ;;  %v556_v47 = vmax.f32 %v426_v40, 0.0 }
 0x14b   : > { %v6113_v44 = vpop.f32.mrf.mxu0  ;;  %6186 = vmatmul.mubr.f32.gmra.mxu1 %v554_v39  ;;  %6315 = vmatprep.subr.mxu1 %v311_v38 }
 0x14c   : > { %v555_v45 = vmax.f32 %v421_v42, 0.0  ;;  %6316 = vmatpush3.msra.mxu1 %v311_v38  ;;  %v436_v48 = vadd.f32 %v6113_v44, %v8065_v16 }
 0x14d   : > { %v430_v49 = vpop.f32.mrf.mxu0  ;;  %6317 = vmatprep.subr.mxu1 %v310_v43 }
 0x14e   : > { %v431_v50 = vadd.f32 %v8065_v16, %v430_v49  ;;  %6188 = vmatprep.mubr.f32.mxu1 %v555_v45  ;;  %6318 = vmatpush3.msra.mxu1 %v310_v43  ;;  %v558_v55 = vmax.f32 %v436_v48, 0.0 }
 0x14f   : > { %v6116_v52 = vpop.f32.mrf.mxu0  ;;  %6189 = vmatmul.mubr.f32.gmra.mxu1 %v556_v47  ;;  %6319 = vmatprep.subr.mxu1 %v309_v46 }
 0x150   : > { %v557_v53 = vmax.f32 %v431_v50, 0.0  ;;  %6320 = vmatpush3.msra.mxu1 %v309_v46  ;;  %v446_v56 = vadd.f32 %v6116_v52, %v8065_v16 }
 0x151   : > { %v440_v57 = vpop.f32.mrf.mxu0  ;;  %6321 = vmatprep.subr.mxu1 %v308_v51 }
 0x152   : > { %v441_v58 = vadd.f32 %v8065_v16, %v440_v57  ;;  %6191 = vmatprep.mubr.f32.mxu1 %v557_v53  ;;  %6322 = vmatpush3.msra.mxu1 %v308_v51  ;;  %v560_v63 = vmax.f32 %v446_v56, 0.0 }
 0x153   : > { %v6119_v60 = vpop.f32.mrf.mxu0  ;;  %6192 = vmatmul.mubr.f32.gmra.mxu1 %v558_v55  ;;  %6323 = vmatprep.subr.mxu1 %v307_v54 }
 0x154   : > { %v559_v61 = vmax.f32 %v441_v58, 0.0  ;;  %6324 = vmatpush3.msra.mxu1 %v307_v54  ;;  %v456_v0 = vadd.f32 %v6119_v60, %v8065_v16 }
 0x155   : > { %v450_v1 = vpop.f32.mrf.mxu0  ;;  %6325 = vmatprep.subr.mxu1 %v306_v59 }
 0x156   : > { %v451_v2 = vadd.f32 %v8065_v16, %v450_v1  ;;  %6194 = vmatprep.mubr.f32.mxu1 %v559_v61  ;;  %6326 = vmatpush3.msra.mxu1 %v306_v59  ;;  %v562_v6 = vmax.f32 %v456_v0, 0.0  ;;  %v303_v61 = vld [vmem:[#allocation5 + $0x78] sm:$0xff]  ;;  %v284_v0 = vld [vmem:[#allocation5 + $0x10] sm:$0xff] }
 0x157   : > { %v6122_v4 = vpop.f32.mrf.mxu0  ;;  %6195 = vmatmul.mubr.f32.gmra.mxu1 %v560_v63  ;;  %6327 = vmatprep.subr.mxu1 %v305_v62  ;;  %v301_v63 = vld [vmem:[#allocation5 + $0x38] sm:$0xff] }
 0x158   : > { %v561_v5 = vmax.f32 %v451_v2, 0.0  ;;  %6328 = vmatpush3.msra.mxu1 %v305_v62  ;;  %v466_v7 = vadd.f32 %v6122_v4, %v8065_v16  ;;  %v302_v62 = vld [vmem:[#allocation5 + $0x58] sm:$0xff]  ;;  %6257 = vmatprep.subr.mxu0 %v284_v0  ;;  %v8099_v2 = vld [vmem:[#allocation7 + $0x1] ss:$0 sm:$0xff] }
 0x159   : > { %v460_v8 = vpop.f32.mrf.mxu0  ;;  %6329 = vmatprep.subr.mxu1 %v304_v3  ;;  %v300_v1 = vld [vmem:[#allocation5 + $0x18] sm:$0xff]  ;;  %6258 = vmatpush3.msra.mxu0 %v284_v0 }
 0x15a   : > { %v461_v9 = vadd.f32 %v8065_v16, %v460_v8  ;;  %6197 = vmatprep.mubr.f32.mxu1 %v561_v5  ;;  %6330 = vmatpush3.msra.mxu1 %v304_v3  ;;  %v564_v12 = vmax.f32 %v466_v7, 0.0 }
 0x15b   : > { %v6125_v10 = vpop.f32.mrf.mxu0  ;;  %6198 = vmatmul.mubr.f32.gmra.mxu1 %v562_v6  ;;  %6331 = vmatprep.subr.mxu1 %v303_v61 }
 0x15c   : > { %v563_v11 = vmax.f32 %v461_v9, 0.0  ;;  %v476_v13 = vadd.f32 %v6125_v10, %v8065_v16  ;;  %6332 = vmatpush3.msra.mxu1 %v303_v61 }
 0x15d   : > { %v470_v14 = vpop.f32.mrf.mxu0  ;;  %6333 = vmatprep.subr.mxu1 %v302_v62 }
 0x15e   : > { %v471_v15 = vadd.f32 %v8065_v16, %v470_v14  ;;  %6200 = vmatprep.mubr.f32.mxu1 %v563_v11  ;;  %v566_v19 = vmax.f32 %v476_v13, 0.0  ;;  %6334 = vmatpush3.msra.mxu1 %v302_v62  ;;  %v1475_v13 = vld [vmem:[#allocation5 + $0x3c0] sm:$0xff] }
 0x15f   : > { %v6128_v17 = vpop.f32.mrf.mxu0  ;;  %6201 = vmatmul.mubr.f32.gmra.mxu1 %v564_v12  ;;  %6335 = vmatprep.subr.mxu1 %v301_v63 }
 0x160   : > { %v565_v18 = vmax.f32 %v471_v15, 0.0  ;;  %v486_v20 = vadd.f32 %v6128_v17, %v8065_v16  ;;  %6336 = vmatpush3.msra.mxu1 %v301_v63  ;;  %v1468_v63 = vld [vmem:[#allocation5 + $0x2e0] sm:$0xff] }
 0x161   : > { %v480_v21 = vpop.f32.mrf.mxu0  ;;  %6337 = vmatprep.subr.mxu1 %v300_v1 }
 0x162   : > { %v481_v22 = vadd.f32 %v8065_v16, %v480_v21  ;;  %6203 = vmatprep.mubr.f32.mxu1 %v565_v18  ;;  %v568_v25 = vmax.f32 %v486_v20, 0.0  ;;  %6338 = vmatpush3.msra.mxu1 %v300_v1  ;;  %v1474_v21 = vld [vmem:[#allocation5 + $0x3a0] sm:$0xff] }
 0x163   : > { %v6131_v23 = vpop.f32.mrf.mxu0  ;;  %6204 = vmatmul.mubr.f32.gmra.mxu1 %v566_v19 }
 0x164   : > { %v567_v24 = vmax.f32 %v481_v22, 0.0  ;;  %v496_v26 = vadd.f32 %v6131_v23, %v8065_v16 }
 0x165   : > { %v490_v27 = vpop.f32.mrf.mxu0 }
 0x166   : > { %v491_v28 = vadd.f32 %v8065_v16, %v490_v27  ;;  %6206 = vmatprep.mubr.f32.mxu1 %v567_v24  ;;  %v570_v31 = vmax.f32 %v496_v26, 0.0 }
 0x167   : > { %v6134_v29 = vpop.f32.mrf.mxu0  ;;  %6207 = vmatmul.mubr.f32.gmra.mxu1 %v568_v25 }
 0x168   : > { %v569_v30 = vmax.f32 %v491_v28, 0.0  ;;  %v506_v32 = vadd.f32 %v6134_v29, %v8065_v16  ;;  %v1473_v28 = vld [vmem:[#allocation5 + $0x380] sm:$0xff] }
 0x169   : > { %v500_v33 = vpop.f32.mrf.mxu0 }
 0x16a   : > { %v501_v34 = vadd.f32 %v8065_v16, %v500_v33  ;;  %6209 = vmatprep.mubr.f32.mxu1 %v569_v30  ;;  %v572_v37 = vmax.f32 %v506_v32, 0.0 }
 0x16b   : > { %v6137_v35 = vpop.f32.mrf.mxu0  ;;  %6210 = vmatmul.mubr.f32.gmra.mxu1 %v570_v31 }
 0x16c   : > { %v571_v36 = vmax.f32 %v501_v34, 0.0  ;;  %v516_v38 = vadd.f32 %v6137_v35, %v8065_v16  ;;  %v1472_v35 = vld [vmem:[#allocation5 + $0x360] sm:$0xff] }
 0x16d   : > { %v510_v39 = vpop.f32.mrf.mxu0 }
 0x16e   : > { %v511_v40 = vadd.f32 %v8065_v16, %v510_v39  ;;  %6212 = vmatprep.mubr.f32.mxu1 %v571_v36  ;;  %v574_v43 = vmax.f32 %v516_v38, 0.0 }
 0x16f   : > { %v6140_v41 = vpop.f32.mrf.mxu0  ;;  %6213 = vmatmul.mubr.f32.gmra.mxu1 %v572_v37 }
 0x170   : > { %v573_v42 = vmax.f32 %v511_v40, 0.0  ;;  %v526_v44 = vadd.f32 %v6140_v41, %v8065_v16 }
 0x171   : > { %v520_v45 = vpop.f32.mrf.mxu0 }
 0x172   : > { %v521_v46 = vadd.f32 %v8065_v16, %v520_v45  ;;  %6215 = vmatprep.mubr.f32.mxu1 %v573_v42  ;;  %v576_v49 = vmax.f32 %v526_v44, 0.0  ;;  %v1471_v42 = vld [vmem:[#allocation5 + $0x340] sm:$0xff] }
 0x173   : > { %v6143_v47 = vpop.f32.mrf.mxu0  ;;  %6216 = vmatmul.mubr.f32.gmra.mxu1 %v574_v43 }
 0x174   : > { %v575_v48 = vmax.f32 %v521_v46, 0.0  ;;  %v536_v50 = vadd.f32 %v6143_v47, %v8065_v16 }
 0x175   : > { %v530_v51 = vpop.f32.mrf.mxu0 }
 0x176   : > { %v531_v52 = vadd.f32 %v8065_v16, %v530_v51  ;;  %6218 = vmatprep.mubr.f32.mxu1 %v575_v48  ;;  %v578_v55 = vmax.f32 %v536_v50, 0.0 }
 0x177   : > { %v6146_v53 = vpop.f32.mrf.mxu0  ;;  %6219 = vmatmul.mubr.f32.gmra.mxu1 %v576_v49  ;;  %v1470_v49 = vld [vmem:[#allocation5 + $0x320] sm:$0xff] }
 0x178   : > { %v577_v54 = vmax.f32 %v531_v52, 0.0  ;;  %v546_v56 = vadd.f32 %v6146_v53, %v8065_v16 }
 0x179   : > { %v540_v57 = vpop.f32.mrf.mxu0 }
 0x17a   : > { %v541_v58 = vadd.f32 %v8065_v16, %v540_v57  ;;  %6221 = vmatprep.mubr.f32.mxu1 %v577_v54  ;;  %v580_v60 = vmax.f32 %v546_v56, 0.0  ;;  %v1476_v16 = vld [vmem:[#allocation5 + $0x3e0] sm:$0xff] }
 0x17b   : > { %6222 = vmatmul.mubr.f32.gmra.mxu1 %v578_v55  ;;  %6387 = vmatprep.subr.mxu0 %v1476_v16  ;;  %v1469_v56 = vld [vmem:[#allocation5 + $0x300] sm:$0xff] }
 0x17c   : > { %v579_v59 = vmax.f32 %v541_v58, 0.0 }
 0x17e   : > { %6224 = vmatprep.mubr.f32.mxu1 %v579_v59 }
 0x17f   : > { %6225 = vmatmul.mubr.f32.gmra.mxu1 %v580_v60 }
 0x203   : > { %v6181_v3 = vpop.f32.mrf.mxu1 }
 0x204   : > { %v657_v4 = vadd.f32 %v6181_v3, %v8099_v2 }
 0x205   : > { %v651_v5 = vpop.f32.mrf.mxu1 }
 0x206   : > { %v652_v6 = vadd.f32 %v8099_v2, %v651_v5  ;;  %v811_v9 = vmax.f32 %v657_v4, 0.0 }
 0x207   : > { %v6184_v7 = vpop.f32.mrf.mxu1 }
 0x208   : > { %v810_v8 = vmax.f32 %v652_v6, 0.0  ;;  %v667_v10 = vadd.f32 %v6184_v7, %v8099_v2  ;;  %v1467_v6 = vld [vmem:[#allocation5 + $0x2c0] sm:$0xff] }
 0x209   : > { %v661_v11 = vpop.f32.mrf.mxu1 }
 0x20a   : > { %v662_v12 = vadd.f32 %v8099_v2, %v661_v11  ;;  %6259 = vmatprep.mubr.f32.mxu0 %v810_v8  ;;  %6339 = vmatprep.mubr.f32.mxu1 %v810_v8  ;;  %v813_v17 = vmax.f32 %v667_v10, 0.0 }
 0x20b   : > { %v6187_v14 = vpop.f32.mrf.mxu1  ;;  %6260 = vmatmul.mubr.f32.vlgmr.msra.gmra.mxu0 %v811_v9  ;;  %6340 = vmatmul.mubr.f32.vlgmr.msra.gmra.mxu1 %v811_v9 }
 0x20c   : > { %v812_v15 = vmax.f32 %v662_v12, 0.0  ;;  %6388 = vmatpush3.msra.mxu0 %v1476_v16  ;;  %v677_v18 = vadd.f32 %v6187_v14, %v8099_v2 }
 0x20d   : > { %v671_v19 = vpop.f32.mrf.mxu1  ;;  %6389 = vmatprep.subr.mxu0 %v1475_v13 }
 0x20e   : > { %v672_v20 = vadd.f32 %v8099_v2, %v671_v19  ;;  %6262 = vmatprep.mubr.f32.mxu0 %v812_v15  ;;  %6342 = vmatprep.mubr.f32.mxu1 %v812_v15  ;;  %v815_v24 = vmax.f32 %v677_v18, 0.0 }
 0x20f   : > { %v6190_v22 = vpop.f32.mrf.mxu1  ;;  %6263 = vmatmul.mubr.f32.gmra.mxu0 %v813_v17  ;;  %6343 = vmatmul.mubr.f32.gmra.mxu1 %v813_v17 }
 0x210   : > { %v814_v23 = vmax.f32 %v672_v20, 0.0  ;;  %6390 = vmatpush3.msra.mxu0 %v1475_v13  ;;  %v687_v25 = vadd.f32 %v6190_v22, %v8099_v2  ;;  %v1466_v13 = vld [vmem:[#allocation5 + $0x2a0] sm:$0xff] }
 0x211   : > { %v681_v26 = vpop.f32.mrf.mxu1  ;;  %6391 = vmatprep.subr.mxu0 %v1474_v21 }
 0x212   : > { %v682_v27 = vadd.f32 %v8099_v2, %v681_v26  ;;  %6265 = vmatprep.mubr.f32.mxu0 %v814_v23  ;;  %6345 = vmatprep.mubr.f32.mxu1 %v814_v23  ;;  %v817_v31 = vmax.f32 %v687_v25, 0.0 }
 0x213   : > { %v6193_v29 = vpop.f32.mrf.mxu1  ;;  %6266 = vmatmul.mubr.f32.gmra.mxu0 %v815_v24  ;;  %6346 = vmatmul.mubr.f32.gmra.mxu1 %v815_v24 }
 0x214   : > { %v816_v30 = vmax.f32 %v682_v27, 0.0  ;;  %6392 = vmatpush3.msra.mxu0 %v1474_v21  ;;  %v697_v32 = vadd.f32 %v6193_v29, %v8099_v2 }
 0x215   : > { %v691_v33 = vpop.f32.mrf.mxu1  ;;  %6393 = vmatprep.subr.mxu0 %v1473_v28 }
 0x216   : > { %v692_v34 = vadd.f32 %v8099_v2, %v691_v33  ;;  %6268 = vmatprep.mubr.f32.mxu0 %v816_v30  ;;  %6348 = vmatprep.mubr.f32.mxu1 %v816_v30  ;;  %v819_v38 = vmax.f32 %v697_v32, 0.0 }
 0x217   : > { %v6196_v36 = vpop.f32.mrf.mxu1  ;;  %6269 = vmatmul.mubr.f32.gmra.mxu0 %v817_v31  ;;  %6349 = vmatmul.mubr.f32.gmra.mxu1 %v817_v31 }
 0x218   : > { %v818_v37 = vmax.f32 %v692_v34, 0.0  ;;  %6394 = vmatpush3.msra.mxu0 %v1473_v28  ;;  %v707_v39 = vadd.f32 %v6196_v36, %v8099_v2 }
 0x219   : > { %v701_v40 = vpop.f32.mrf.mxu1  ;;  %6395 = vmatprep.subr.mxu0 %v1472_v35 }
 0x21a   : > { %v702_v41 = vadd.f32 %v8099_v2, %v701_v40  ;;  %6271 = vmatprep.mubr.f32.mxu0 %v818_v37  ;;  %6351 = vmatprep.mubr.f32.mxu1 %v818_v37  ;;  %v821_v45 = vmax.f32 %v707_v39, 0.0 }
 0x21b   : > { %v6199_v43 = vpop.f32.mrf.mxu1  ;;  %6272 = vmatmul.mubr.f32.gmra.mxu0 %v819_v38  ;;  %6352 = vmatmul.mubr.f32.gmra.mxu1 %v819_v38 }
 0x21c   : > { %v820_v44 = vmax.f32 %v702_v41, 0.0  ;;  %6396 = vmatpush3.msra.mxu0 %v1472_v35  ;;  %v717_v46 = vadd.f32 %v6199_v43, %v8099_v2 }
 0x21d   : > { %v711_v47 = vpop.f32.mrf.mxu1  ;;  %6397 = vmatprep.subr.mxu0 %v1471_v42 }
 0x21e   : > { %v712_v48 = vadd.f32 %v8099_v2, %v711_v47  ;;  %6274 = vmatprep.mubr.f32.mxu0 %v820_v44  ;;  %6354 = vmatprep.mubr.f32.mxu1 %v820_v44  ;;  %v823_v52 = vmax.f32 %v717_v46, 0.0  ;;  %v1465_v47 = vld [vmem:[#allocation5 + $0x280] sm:$0xff] }
 0x21f   : > { %v6202_v50 = vpop.f32.mrf.mxu1  ;;  %6275 = vmatmul.mubr.f32.gmra.mxu0 %v821_v45  ;;  %6355 = vmatmul.mubr.f32.gmra.mxu1 %v821_v45 }
 0x220   : > { %v822_v51 = vmax.f32 %v712_v48, 0.0  ;;  %6398 = vmatpush3.msra.mxu0 %v1471_v42  ;;  %v727_v53 = vadd.f32 %v6202_v50, %v8099_v2  ;;  %v1464_v48 = vld [vmem:[#allocation5 + $0x260] sm:$0xff] }
 0x221   : > { %v721_v54 = vpop.f32.mrf.mxu1  ;;  %6399 = vmatprep.subr.mxu0 %v1470_v49  ;;  %v1462_v50 = vld [vmem:[#allocation5 + $0x220] sm:$0xff] }
 0x222   : > { %v722_v55 = vadd.f32 %v8099_v2, %v721_v54  ;;  %6277 = vmatprep.mubr.f32.mxu0 %v822_v51  ;;  %6357 = vmatprep.mubr.f32.mxu1 %v822_v51  ;;  %v825_v59 = vmax.f32 %v727_v53, 0.0  ;;  %v1492_v51 = vld [vmem:[#allocation5 + $0x3e8] sm:$0xff] }
 0x223   : > { %v6205_v57 = vpop.f32.mrf.mxu1  ;;  %6278 = vmatmul.mubr.f32.gmra.mxu0 %v823_v52  ;;  %6358 = vmatmul.mubr.f32.gmra.mxu1 %v823_v52  ;;  %v1491_v52 = vld [vmem:[#allocation5 + $0x3c8] sm:$0xff] }
 0x224   : > { %v824_v58 = vmax.f32 %v722_v55, 0.0  ;;  %6400 = vmatpush3.msra.mxu0 %v1470_v49  ;;  %v737_v60 = vadd.f32 %v6205_v57, %v8099_v2  ;;  %v1463_v49 = vld [vmem:[#allocation5 + $0x240] sm:$0xff]  ;;  %6467 = vmatprep.subr.mxu1 %v1492_v51  ;;  %v1490_v53 = vld [vmem:[#allocation5 + $0x3a8] sm:$0xff] }
 0x225   : > { %v731_v61 = vpop.f32.mrf.mxu1  ;;  %6401 = vmatprep.subr.mxu0 %v1469_v56  ;;  %6468 = vmatpush3.msra.mxu1 %v1492_v51  ;;  %v1489_v54 = vld [vmem:[#allocation5 + $0x388] sm:$0xff] }
 0x226   : > { %v732_v62 = vadd.f32 %v8099_v2, %v731_v61  ;;  %6280 = vmatprep.mubr.f32.mxu0 %v824_v58  ;;  %6360 = vmatprep.mubr.f32.mxu1 %v824_v58  ;;  %v827_v16 = vmax.f32 %v737_v60, 0.0  ;;  %v1488_v55 = vld [vmem:[#allocation5 + $0x368] sm:$0xff] }
 0x227   : > { %v6208_v0 = vpop.f32.mrf.mxu1  ;;  %6281 = vmatmul.mubr.f32.gmra.mxu0 %v825_v59  ;;  %6361 = vmatmul.mubr.f32.gmra.mxu1 %v825_v59  ;;  %v1486_v57 = vld [vmem:[#allocation5 + $0x328] sm:$0xff] }
 0x228   : > { %v826_v1 = vmax.f32 %v732_v62, 0.0  ;;  %6402 = vmatpush3.msra.mxu0 %v1469_v56  ;;  %v747_v3 = vadd.f32 %v6208_v0, %v8099_v2  ;;  %6469 = vmatprep.subr.mxu1 %v1491_v52  ;;  %v1487_v56 = vld [vmem:[#allocation5 + $0x348] sm:$0xff] }
 0x229   : > { %v741_v4 = vpop.f32.mrf.mxu1  ;;  %6403 = vmatprep.subr.mxu0 %v1468_v63  ;;  %6470 = vmatpush3.msra.mxu1 %v1491_v52  ;;  %v1485_v58 = vld [vmem:[#allocation5 + $0x308] sm:$0xff] }
 0x22a   : > { %v742_v5 = vadd.f32 %v8099_v2, %v741_v4  ;;  %6283 = vmatprep.mubr.f32.mxu0 %v826_v1  ;;  %6363 = vmatprep.mubr.f32.mxu1 %v826_v1  ;;  %v829_v9 = vmax.f32 %v747_v3, 0.0  ;;  %v1484_v59 = vld [vmem:[#allocation5 + $0x2e8] sm:$0xff] }
 0x22b   : > { %v6211_v7 = vpop.f32.mrf.mxu1  ;;  %6284 = vmatmul.mubr.f32.gmra.mxu0 %v827_v16  ;;  %6364 = vmatmul.mubr.f32.gmra.mxu1 %v827_v16  ;;  %v1483_v60 = vld [vmem:[#allocation5 + $0x2c8] sm:$0xff]  ;;  %v8133_v16 = vld [vmem:[#allocation7 + $0x2] ss:$0 sm:$0xff] }
 0x22c   : > { %v828_v8 = vmax.f32 %v742_v5, 0.0  ;;  %6404 = vmatpush3.msra.mxu0 %v1468_v63  ;;  %v757_v10 = vadd.f32 %v6211_v7, %v8099_v2  ;;  %6471 = vmatprep.subr.mxu1 %v1490_v53  ;;  %v1482_v61 = vld [vmem:[#allocation5 + $0x2a8] sm:$0xff] }
 0x22d   : > { %v751_v11 = vpop.f32.mrf.mxu1  ;;  %6405 = vmatprep.subr.mxu0 %v1467_v6  ;;  %6472 = vmatpush3.msra.mxu1 %v1490_v53  ;;  %v1481_v62 = vld [vmem:[#allocation5 + $0x288] sm:$0xff] }
 0x22e   : > { %v752_v12 = vadd.f32 %v8099_v2, %v751_v11  ;;  %6286 = vmatprep.mubr.f32.mxu0 %v828_v8  ;;  %6366 = vmatprep.mubr.f32.mxu1 %v828_v8  ;;  %v831_v17 = vmax.f32 %v757_v10, 0.0  ;;  %v1480_v63 = vld [vmem:[#allocation5 + $0x268] sm:$0xff] }
 0x22f   : > { %v6214_v14 = vpop.f32.mrf.mxu1  ;;  %6287 = vmatmul.mubr.f32.gmra.mxu0 %v829_v9  ;;  %6367 = vmatmul.mubr.f32.gmra.mxu1 %v829_v9  ;;  %v1479_v0 = vld [vmem:[#allocation5 + $0x248] sm:$0xff] }
 0x230   : > { %v830_v15 = vmax.f32 %v752_v12, 0.0  ;;  %6406 = vmatpush3.msra.mxu0 %v1467_v6  ;;  %v767_v18 = vadd.f32 %v6214_v14, %v8099_v2  ;;  %6473 = vmatprep.subr.mxu1 %v1489_v54  ;;  %v1478_v1 = vld [vmem:[#allocation5 + $0x228] sm:$0xff] }
 0x231   : > { %v761_v19 = vpop.f32.mrf.mxu1  ;;  %6407 = vmatprep.subr.mxu0 %v1466_v13  ;;  %6474 = vmatpush3.msra.mxu1 %v1489_v54  ;;  %v7679_v52 = vld [vmem:[%s8023_s8 + $0x8] sm:$0xff] }
 0x232   : > { %v762_v20 = vadd.f32 %v8099_v2, %v761_v19  ;;  %6289 = vmatprep.mubr.f32.mxu0 %v830_v15  ;;  %6369 = vmatprep.mubr.f32.mxu1 %v830_v15  ;;  %v833_v23 = vmax.f32 %v767_v18, 0.0 }
 0x233   : > { %v6217_v21 = vpop.f32.mrf.mxu1  ;;  %6290 = vmatmul.mubr.f32.gmra.mxu0 %v831_v17  ;;  %6370 = vmatmul.mubr.f32.gmra.mxu1 %v831_v17 }
 0x234   : > { %v832_v22 = vmax.f32 %v762_v20, 0.0  ;;  %6408 = vmatpush3.msra.mxu0 %v1466_v13  ;;  %v777_v24 = vadd.f32 %v6217_v21, %v8099_v2  ;;  %6475 = vmatprep.subr.mxu1 %v1488_v55 }
 0x235   : > { %v771_v25 = vpop.f32.mrf.mxu1  ;;  %6409 = vmatprep.subr.mxu0 %v1465_v47  ;;  %6476 = vmatpush3.msra.mxu1 %v1488_v55 }
 0x236   : > { %v772_v26 = vadd.f32 %v8099_v2, %v771_v25  ;;  %6292 = vmatprep.mubr.f32.mxu0 %v832_v22  ;;  %6372 = vmatprep.mubr.f32.mxu1 %v832_v22  ;;  %v835_v29 = vmax.f32 %v777_v24, 0.0 }
 0x237   : > { %v6220_v27 = vpop.f32.mrf.mxu1  ;;  %6293 = vmatmul.mubr.f32.gmra.mxu0 %v833_v23  ;;  %6373 = vmatmul.mubr.f32.gmra.mxu1 %v833_v23 }
 0x238   : > { %v834_v28 = vmax.f32 %v772_v26, 0.0  ;;  %v787_v30 = vadd.f32 %v6220_v27, %v8099_v2  ;;  %6410 = vmatpush3.msra.mxu0 %v1465_v47  ;;  %6477 = vmatprep.subr.mxu1 %v1487_v56 }
 0x239   : > { %v781_v31 = vpop.f32.mrf.mxu1  ;;  %6411 = vmatprep.subr.mxu0 %v1464_v48  ;;  %6478 = vmatpush3.msra.mxu1 %v1487_v56 }
 0x23a   : > { %v782_v32 = vadd.f32 %v8099_v2, %v781_v31  ;;  %6295 = vmatprep.mubr.f32.mxu0 %v834_v28  ;;  %6375 = vmatprep.mubr.f32.mxu1 %v834_v28  ;;  %v837_v35 = vmax.f32 %v787_v30, 0.0  ;;  %v8164_v31 = vld [vmem:[#allocation7 + $0x3] ss:$0 sm:$0xff] }
 0x23b   : > { %v6223_v33 = vpop.f32.mrf.mxu1  ;;  %6296 = vmatmul.mubr.f32.gmra.mxu0 %v835_v29  ;;  %6376 = vmatmul.mubr.f32.gmra.mxu1 %v835_v29 }
 0x23c   : > { %v836_v34 = vmax.f32 %v782_v32, 0.0  ;;  %v797_v36 = vadd.f32 %v6223_v33, %v8099_v2  ;;  %6412 = vmatpush3.msra.mxu0 %v1464_v48  ;;  %6479 = vmatprep.subr.mxu1 %v1486_v57  ;;  %v7678_v48 = vld [vmem:[%s8023_s8] sm:$0xff] }
 0x23d   : > { %v791_v37 = vpop.f32.mrf.mxu1  ;;  %6413 = vmatprep.subr.mxu0 %v1463_v49  ;;  %6480 = vmatpush3.msra.mxu1 %v1486_v57 }
 0x23e   : > { %v792_v38 = vadd.f32 %v8099_v2, %v791_v37  ;;  %6298 = vmatprep.mubr.f32.mxu0 %v836_v34  ;;  %6378 = vmatprep.mubr.f32.mxu1 %v836_v34  ;;  %v839_v41 = vmax.f32 %v797_v36, 0.0 }
 0x23f   : > { %v6226_v39 = vpop.f32.mrf.mxu1  ;;  %6299 = vmatmul.mubr.f32.gmra.mxu0 %v837_v35  ;;  %6379 = vmatmul.mubr.f32.gmra.mxu1 %v837_v35 }
 0x240   : > { %v838_v40 = vmax.f32 %v792_v38, 0.0  ;;  %v807_v42 = vadd.f32 %v6226_v39, %v8099_v2  ;;  %6414 = vmatpush3.msra.mxu0 %v1463_v49  ;;  %6481 = vmatprep.subr.mxu1 %v1485_v58 }
 0x241   : > { %v801_v43 = vpop.f32.mrf.mxu1  ;;  %6415 = vmatprep.subr.mxu0 %v1462_v50  ;;  %6482 = vmatpush3.msra.mxu1 %v1485_v58 }
 0x242   : > { %v802_v44 = vadd.f32 %v8099_v2, %v801_v43  ;;  %6301 = vmatprep.mubr.f32.mxu0 %v838_v40  ;;  %6381 = vmatprep.mubr.f32.mxu1 %v838_v40  ;;  %v841_v46 = vmax.f32 %v807_v42, 0.0  ;;  %v1461_v2 = vld [vmem:[#allocation5 + $0x200] sm:$0xff] }
 0x243   : > { %6302 = vmatmul.mubr.f32.gmra.mxu0 %v839_v41  ;;  %6382 = vmatmul.mubr.f32.gmra.mxu1 %v839_v41 }
 0x244   : > { %v840_v45 = vmax.f32 %v802_v44, 0.0  ;;  %6416 = vmatpush3.msra.mxu0 %v1462_v50  ;;  %6483 = vmatprep.subr.mxu1 %v1484_v59 }
 0x245   : > { %6417 = vmatprep.subr.mxu0 %v1461_v2  ;;  %6484 = vmatpush3.msra.mxu1 %v1484_v59 }
 0x246   : > { %6304 = vmatprep.mubr.f32.mxu0 %v840_v45  ;;  %6384 = vmatprep.mubr.f32.mxu1 %v840_v45 }
 0x247   : > { %6305 = vmatmul.mubr.f32.gmra.mxu0 %v841_v46  ;;  %6385 = vmatmul.mubr.f32.gmra.mxu1 %v841_v46 }
 0x248   : > { %6418 = vmatpush3.msra.mxu0 %v1461_v2  ;;  %6485 = vmatprep.subr.mxu1 %v1483_v60 }
 0x249   : > { %6486 = vmatpush3.msra.mxu1 %v1483_v60 }
 0x24a   : > { %6487 = vmatprep.subr.mxu1 %v1482_v61 }
 0x24b   : > { %6488 = vmatpush3.msra.mxu1 %v1482_v61 }
 0x24c   : > { %6489 = vmatprep.subr.mxu1 %v1481_v62 }
 0x24d   : > { %6490 = vmatpush3.msra.mxu1 %v1481_v62 }
 0x24e   : > { %6491 = vmatprep.subr.mxu1 %v1480_v63 }
 0x24f   : > { %6492 = vmatpush3.msra.mxu1 %v1480_v63 }
 0x250   : > { %6493 = vmatprep.subr.mxu1 %v1479_v0 }
 0x251   : > { %6494 = vmatpush3.msra.mxu1 %v1479_v0 }
 0x252   : > { %6495 = vmatprep.subr.mxu1 %v1478_v1 }
 0x253   : > { %6496 = vmatpush3.msra.mxu1 %v1478_v1  ;;  %v7680_v1 = vld [vmem:[%s8023_s8 + $0x10] sm:$0xff] }
 0x2cb   : > { %v6261_v3 = vpop.f32.mrf.mxu0  ;;  %v6341_v4 = vpop.f32.mrf.mxu1 }
 0x2cc   : > { %v8136_v5 = vadd.f32 %v6261_v3, %v8133_v16  ;;  %v1147_v39 = vadd.f32 %v6341_v4, %v8164_v31 }
 0x2cd   : > { %v912_v6 = vpop.f32.mrf.mxu0  ;;  %v1141_v7 = vpop.f32.mrf.mxu1 }
 0x2ce   : > { %v1334_v8 = vmul.f32 1.442695, %v8136_v5  ;;  %v8140_v9 = vadd.f32 %v8133_v16, %v912_v6  ;;  %v1142_v36 = vadd.f32 %v8164_v31, %v1141_v7  ;;  %v1301_v53 = vadd.f32 %v7679_v52, %v1147_v39  ;;  %v7684_v52 = vld [vmem:[%s8023_s8 + $0x30] sm:$0xff] }
 0x2cf   : > { %v6264_v10 = vpop.f32.mrf.mxu0  ;;  %v6344_v11 = vpop.f32.mrf.mxu1 }
 0x2d0   : > { %v1332_v12 = vmul.f32 1.442695, %v8140_v9  ;;  %v8144_v13 = vadd.f32 %v6264_v10, %v8133_v16  ;;  %7422 = vpow2.f32 %v1334_v8  ;;  %v1300_v49 = vadd.f32 %v7678_v48, %v1142_v36  ;;  %v7681_v8 = vld [vmem:[%s8023_s8 + $0x18] sm:$0xff] }
 0x2d1   : > { %v922_v14 = vpop.f32.mrf.mxu0  ;;  %v1151_v15 = vpop.f32.mrf.mxu1  ;;  %v1157_v54 = vadd.f32 %v6344_v11, %v8164_v31 }
 0x2d2   : > { %7424 = vpow2.f32 %v1332_v12  ;;  %v1338_v17 = vmul.f32 1.442695, %v8144_v13  ;;  %v8148_v18 = vadd.f32 %v8133_v16, %v922_v14  ;;  %v1152_v50 = vadd.f32 %v8164_v31, %v1151_v15 }
 0x2d3   : > { %v6267_v19 = vpop.f32.mrf.mxu0  ;;  %v6347_v20 = vpop.f32.mrf.mxu1  ;;  %v1303_v10 = vadd.f32 %v7681_v8, %v1157_v54 }
 0x2d4   : > { %9818 = vst [vmem:[#allocation12_spill] sm:$0xff] %v8148_v18  ;;  %v1336_v21 = vmul.f32 1.442695, %v8148_v18  ;;  %v8152_v22 = vadd.f32 %v6267_v19, %v8133_v16  ;;  %7426 = vpow2.f32 %v1338_v17  ;;  %v1302_v3 = vadd.f32 %v7680_v1, %v1152_v50 }
 0x2d5   : > { %v932_v23 = vpop.f32.mrf.mxu0  ;;  %v1161_v24 = vpop.f32.mrf.mxu1  ;;  %v1167_v11 = vadd.f32 %v6347_v20, %v8164_v31 }
 0x2d6   : > { %9819 = vst [vmem:[#allocation13_spill] sm:$0xff] %v8152_v22  ;;  %7428 = vpow2.f32 %v1336_v21  ;;  %v1342_v25 = vmul.f32 1.442695, %v8152_v22  ;;  %v8156_v26 = vadd.f32 %v8133_v16, %v932_v23  ;;  %v1162_v4 = vadd.f32 %v8164_v31, %v1161_v24 }
 0x2d7   : > { %v6270_v27 = vpop.f32.mrf.mxu0  ;;  %v8158_v28 = vpop.f32.mrf.mxu1 }
 0x2d8   : > { %9820 = vst [vmem:[#allocation14_spill] sm:$0xff] %v8156_v26  ;;  %v1340_v29 = vmul.f32 1.442695, %v8156_v26  ;;  %v8162_v30 = vadd.f32 %v6270_v27, %v8133_v16  ;;  %7430 = vpow2.f32 %v1342_v25  ;;  %v7682_v27 = vld [vmem:[%s8023_s8 + $0x20] sm:$0xff] }
 0x2d9   : > { %v942_v32 = vpop.f32.mrf.mxu0  ;;  %v1171_v33 = vpop.f32.mrf.mxu1 }
 0x2da   : > { %9821 = vst [vmem:[#allocation15_spill] sm:$0xff] %v8162_v30  ;;  %7432 = vpow2.f32 %v1340_v29  ;;  %v1346_v34 = vmul.f32 1.442695, %v8162_v30  ;;  %v8168_v35 = vadd.f32 %v8133_v16, %v942_v32  ;;  %v1304_v29 = vadd.f32 %v7682_v27, %v1162_v4 }
 0x2db   : > { %v6273_v37 = vpop.f32.mrf.mxu0  ;;  %v8171_v38 = vpop.f32.mrf.mxu1  ;;  %v1172_v32 = vadd.f32 %v8164_v31, %v1171_v33 }
 0x2dc   : > { %9822 = vst [vmem:[#allocation16_spill] sm:$0xff] %v8168_v35  ;;  %v1344_v40 = vmul.f32 1.442695, %v8168_v35  ;;  %v8176_v41 = vadd.f32 %v6273_v37, %v8133_v16  ;;  %7434 = vpow2.f32 %v1346_v34  ;;  %v7683_v37 = vld [vmem:[%s8023_s8 + $0x28] sm:$0xff] }
 0x2dd   : > { %v952_v42 = vpop.f32.mrf.mxu0  ;;  %v8178_v43 = vpop.f32.mrf.mxu1  ;;  %v1305_v39 = vadd.f32 %v7683_v37, %v1167_v11 }
 0x2de   : > { %9823 = vst [vmem:[#allocation17_spill] sm:$0xff] %v8176_v41  ;;  %v7423_v44 = vpop.eup %7422  ;;  %7436 = vpow2.f32 %v1344_v40  ;;  %v1350_v45 = vmul.f32 1.442695, %v8176_v41  ;;  %v8182_v46 = vadd.f32 %v8133_v16, %v952_v42  ;;  %v1177_v40 = vadd.f32 %v8158_v28, %v8164_v31 }
 0x2df   : > { %v7425_v47 = vpop.eup %7424  ;;  %v6276_v2 = vpop.f32.mrf.mxu0  ;;  %v8198_v61 = vmul.f32 %v7423_v44, %v1301_v53  ;;  %v1306_v53 = vadd.f32 %v7684_v52, %v1172_v32  ;;  %v1182_v54 = vadd.f32 %v8164_v31, %v8178_v43  ;;  %v7688_v52 = vld [vmem:[%s8023_s8 + $0x50] sm:$0xff] }
 0x2e0   : > { %9824 = vst [vmem:[#allocation18_spill] sm:$0xff] %v8182_v46  ;;  %v8186_v51 = vpop.f32.mrf.mxu1  ;;  %v1348_v55 = vmul.f32 1.442695, %v8182_v46  ;;  %v8192_v56 = vadd.f32 %v6276_v2, %v8133_v16  ;;  %7438 = vpow2.f32 %v1350_v45  ;;  %v8196_v59 = vmul.f32 %v7425_v47, %v1300_v49 }
 0x2e1   : > { %v962_v57 = vpop.f32.mrf.mxu0  ;;  %v7427_v60 = vpop.eup %7426 }
 0x2e2   : > { %9825 = vst [vmem:[#allocation19_spill] sm:$0xff] %v8192_v56  ;;  %v8194_v58 = vpop.f32.mrf.mxu1  ;;  %7440 = vpow2.f32 %v1348_v55  ;;  %v1354_v62 = vmul.f32 1.442695, %v8192_v56  ;;  %v8202_v63 = vadd.f32 %v8133_v16, %v962_v57  ;;  %6419 = vmatprep.mubr.f32.mxu0 %v8196_v59  ;;  %v8224_v24 = vmul.f32 %v7427_v60, %v1303_v10  ;;  %v7685_v60 = vld [vmem:[%s8023_s8 + $0x38] sm:$0xff] }
 0x2e3   : > { %v7429_v0 = vpop.eup %7428  ;;  %v6279_v6 = vpop.f32.mrf.mxu0  ;;  %6420 = vmatmul.mubr.f32.vlgmr.msra.gmra.mxu0 %v8198_v61 }
 0x2e4   : > { %9826 = vst [vmem:[#allocation20_spill] sm:$0xff] %v8202_v63  ;;  %v8207_v7 = vpop.f32.mrf.mxu1  ;;  %v1352_v12 = vmul.f32 1.442695, %v8202_v63  ;;  %v8213_v14 = vadd.f32 %v6279_v6, %v8133_v16  ;;  %7442 = vpow2.f32 %v1354_v62  ;;  %v8218_v19 = vmul.f32 %v7429_v0, %v1302_v3 }
 0x2e5   : > { %v972_v15 = vpop.f32.mrf.mxu0  ;;  %v7431_v21 = vpop.eup %7430  ;;  %v1307_v62 = vadd.f32 %v7685_v60, %v1177_v40  ;;  %v1187_v0 = vadd.f32 %v8171_v38, %v8164_v31 }
 0x2e6   : > { %9827 = vst [vmem:[#allocation21_spill] sm:$0xff] %v8213_v14  ;;  %v8216_v17 = vpop.f32.mrf.mxu1  ;;  %7444 = vpow2.f32 %v1352_v12  ;;  %v1358_v23 = vmul.f32 1.442695, %v8213_v14  ;;  %v8222_v20 = vadd.f32 %v8133_v16, %v972_v15  ;;  %6422 = vmatprep.mubr.f32.mxu0 %v8218_v19  ;;  %v8247_v50 = vmul.f32 %v7431_v21, %v1305_v39  ;;  %v7686_v15 = vld [vmem:[%s8023_s8 + $0x40] sm:$0xff] }
 0x2e7   : > { %v7433_v25 = vpop.eup %7432  ;;  %v6282_v34 = vpop.f32.mrf.mxu0  ;;  %6423 = vmatmul.mubr.f32.gmra.mxu0 %v8224_v24  ;;  %v1308_v21 = vadd.f32 %v7686_v15, %v1182_v54  ;;  %v1202_v54 = vadd.f32 %v8164_v31, %v8216_v17 }
 0x2e8   : > { %9828 = vst [vmem:[#allocation22_spill] sm:$0xff] %v8222_v20  ;;  %v8229_v36 = vpop.f32.mrf.mxu1  ;;  %v1356_v42 = vmul.f32 1.442695, %v8222_v20  ;;  %v8236_v44 = vadd.f32 %v6282_v34, %v8133_v16  ;;  %7446 = vpow2.f32 %v1358_v23  ;;  %v8241_v47 = vmul.f32 %v7433_v25, %v1304_v29  ;;  %v7687_v29 = vld [vmem:[%s8023_s8 + $0x48] sm:$0xff] }
 0x2e9   : > { %v982_v33 = vpop.f32.mrf.mxu0  ;;  %v7435_v48 = vpop.eup %7434  ;;  %v1192_v23 = vadd.f32 %v8164_v31, %v8194_v58  ;;  %v1309_v32 = vadd.f32 %v7687_v29, %v1187_v0  ;;  %v1197_v34 = vadd.f32 %v8186_v51, %v8164_v31  ;;  %v7690_v29 = vld [vmem:[%s8023_s8 + $0x60] sm:$0xff] }
 0x2ea   : > { %9829 = vst [vmem:[#allocation23_spill] sm:$0xff] %v8236_v44  ;;  %v8239_v45 = vpop.f32.mrf.mxu1  ;;  %7448 = vpow2.f32 %v1356_v42  ;;  %v1362_v49 = vmul.f32 1.442695, %v8236_v44  ;;  %v8245_v28 = vadd.f32 %v8133_v16, %v982_v33  ;;  %6425 = vmatprep.mubr.f32.mxu0 %v8241_v47  ;;  %v8271_v11 = vmul.f32 %v7435_v48, %v1307_v62  ;;  %v7689_v62 = vld [vmem:[%s8023_s8 + $0x58] sm:$0xff] }
 0x2eb   : > { %v7437_v2 = vpop.eup %7436  ;;  %v6285_v55 = vpop.f32.mrf.mxu0  ;;  %6426 = vmatmul.mubr.f32.gmra.mxu0 %v8247_v50  ;;  %v1311_v0 = vadd.f32 %v7689_v62, %v1197_v34  ;;  %v1212_v34 = vadd.f32 %v8164_v31, %v8239_v45 }
 0x2ec   : > { %9830 = vst [vmem:[#allocation24_spill] sm:$0xff] %v8245_v28  ;;  %v8253_v57 = vpop.f32.mrf.mxu1  ;;  %v1360_v1 = vmul.f32 1.442695, %v8245_v28  ;;  %v8260_v3 = vadd.f32 %v6285_v55, %v8133_v16  ;;  %7450 = vpow2.f32 %v1362_v49  ;;  %v8265_v6 = vmul.f32 %v7437_v2, %v1306_v53 }
 0x2ed   : > { %v992_v43 = vpop.f32.mrf.mxu0  ;;  %v7439_v8 = vpop.eup %7438  ;;  %v1310_v53 = vadd.f32 %v7688_v52, %v1192_v23  ;;  %v1217_v52 = vadd.f32 %v8229_v36, %v8164_v31 }
 0x2ee   : > { %9831 = vst [vmem:[#allocation25_spill] sm:$0xff] %v8260_v3  ;;  %v8263_v4 = vpop.f32.mrf.mxu1  ;;  %7452 = vpow2.f32 %v1360_v1  ;;  %v1366_v10 = vmul.f32 1.442695, %v8260_v3  ;;  %v8269_v38 = vadd.f32 %v8133_v16, %v992_v43  ;;  %6428 = vmatprep.mubr.f32.mxu0 %v8265_v6  ;;  %v8295_v49 = vmul.f32 %v7439_v8, %v1309_v32  ;;  %v1522_v3 = vld [vmem:[#allocation5 + $0x3b8] sm:$0xff] }
 0x2ef   : > { %v7441_v12 = vpop.eup %7440  ;;  %v6288_v25 = vpop.f32.mrf.mxu0  ;;  %6429 = vmatmul.mubr.f32.gmra.mxu0 %v8271_v11  ;;  %v1207_v1 = vadd.f32 %v8207_v7, %v8164_v31  ;;  %v1312_v32 = vadd.f32 %v7690_v29, %v1202_v54 }
 0x2f0   : > { %9832 = vst [vmem:[#allocation26_spill] sm:$0xff] %v8269_v38  ;;  %v8277_v27 = vpop.f32.mrf.mxu1  ;;  %v1364_v37 = vmul.f32 1.442695, %v8269_v38  ;;  %v8284_v39 = vadd.f32 %v6288_v25, %v8133_v16  ;;  %7454 = vpow2.f32 %v1366_v10  ;;  %v8289_v42 = vmul.f32 %v7441_v12, %v1308_v21 }
 0x2f1   : > { %v1002_v58 = vpop.f32.mrf.mxu0  ;;  %v7443_v33 = vpop.eup %7442 }
 0x2f2   : > { %9833 = vst [vmem:[#allocation27_spill] sm:$0xff] %v8284_v39  ;;  %v8287_v40 = vpop.f32.mrf.mxu1  ;;  %7456 = vpow2.f32 %v1364_v37  ;;  %v1370_v48 = vmul.f32 1.442695, %v8284_v39  ;;  %v8293_v51 = vadd.f32 %v8133_v16, %v1002_v58  ;;  %6431 = vmatprep.mubr.f32.mxu0 %v8289_v42  ;;  %v8319_v23 = vmul.f32 %v7443_v33, %v1311_v0 }
 0x2f3   : > { %v7445_v2 = vpop.eup %7444  ;;  %v6291_v55 = vpop.f32.mrf.mxu0  ;;  %6432 = vmatmul.mubr.f32.gmra.mxu0 %v8295_v49 }
 0x2f4   : > { %9834 = vst [vmem:[#allocation28_spill] sm:$0xff] %v8293_v51  ;;  %v8301_v60 = vpop.f32.mrf.mxu1  ;;  %v1368_v43 = vmul.f32 1.442695, %v8293_v51  ;;  %v8308_v8 = vadd.f32 %v6291_v55, %v8133_v16  ;;  %7458 = vpow2.f32 %v1370_v48  ;;  %v8313_v12 = vmul.f32 %v7445_v2, %v1310_v53  ;;  %v7691_v48 = vld [vmem:[%s8023_s8 + $0x68] sm:$0xff] }
 0x2f5   : > { %v1012_v17 = vpop.f32.mrf.mxu0  ;;  %v7447_v15 = vpop.eup %7446  ;;  %v1313_v2 = vadd.f32 %v7691_v48, %v1207_v1 }
 0x2f6   : > { %9835 = vst [vmem:[#allocation29_spill] sm:$0xff] %v8308_v8  ;;  %v8311_v10 = vpop.f32.mrf.mxu1  ;;  %7460 = vpow2.f32 %v1368_v43  ;;  %v1374_v21 = vmul.f32 1.442695, %v8308_v8  ;;  %v8317_v7 = vadd.f32 %v8133_v16, %v1012_v17  ;;  %6434 = vmatprep.mubr.f32.mxu0 %v8313_v12  ;;  %v7692_v17 = vld [vmem:[%s8023_s8 + $0x70] sm:$0xff] }
 0x2f7   : > { %v7449_v25 = vpop.eup %7448  ;;  %v6294_v37 = vpop.f32.mrf.mxu0  ;;  %6435 = vmatmul.mubr.f32.gmra.mxu0 %v8319_v23  ;;  %v8343_v1 = vmul.f32 %v7447_v15, %v1313_v2  ;;  %v1314_v29 = vadd.f32 %v7692_v17, %v1212_v34  ;;  %v1242_v8 = vadd.f32 %v8164_v31, %v8311_v10 }
 0x2f8   : > { %9836 = vst [vmem:[#allocation30_spill] sm:$0xff] %v8317_v7  ;;  %v8325_v58 = vpop.f32.mrf.mxu1  ;;  %v1372_v33 = vmul.f32 1.442695, %v8317_v7  ;;  %v8332_v53 = vadd.f32 %v6294_v37, %v8133_v16  ;;  %7462 = vpow2.f32 %v1374_v21  ;;  %v8337_v55 = vmul.f32 %v7449_v25, %v1312_v32  ;;  %v7693_v32 = vld [vmem:[%s8023_s8 + $0x78] sm:$0xff] }
 0x2f9   : > { %v1022_v45 = vpop.f32.mrf.mxu0  ;;  %v7451_v62 = vpop.eup %7450  ;;  %v1222_v21 = vadd.f32 %v8164_v31, %v8263_v4  ;;  %v1315_v48 = vadd.f32 %v7693_v32, %v1217_v52 }
 0x2fa   : > { %9837 = vst [vmem:[#allocation31_spill] sm:$0xff] %v8332_v53  ;;  %v8335_v54 = vpop.f32.mrf.mxu1  ;;  %7464 = vpow2.f32 %v1372_v33  ;;  %v1378_v0 = vmul.f32 1.442695, %v8332_v53  ;;  %v8341_v36 = vadd.f32 %v8133_v16, %v1022_v45  ;;  %6437 = vmatprep.mubr.f32.mxu0 %v8337_v55  ;;  %v1227_v33 = vadd.f32 %v8253_v57, %v8164_v31 }
 0x2fb   : > { %v7453_v43 = vpop.eup %7452  ;;  %v6297_v37 = vpop.f32.mrf.mxu0  ;;  %6438 = vmatmul.mubr.f32.gmra.mxu0 %v8343_v1  ;;  %v8367_v32 = vmul.f32 %v7451_v62, %v1315_v48  ;;  %v1252_v10 = vadd.f32 %v8164_v31, %v8335_v54 }
 0x2fc   : > { %9838 = vst [vmem:[#allocation32_spill] sm:$0xff] %v8341_v36  ;;  %v8349_v25 = vpop.f32.mrf.mxu1  ;;  %v1376_v15 = vmul.f32 1.442695, %v8341_v36  ;;  %v8356_v2 = vadd.f32 %v6297_v37, %v8133_v16  ;;  %7466 = vpow2.f32 %v1378_v0  ;;  %v8361_v45 = vmul.f32 %v7453_v43, %v1314_v29  ;;  %v7694_v36 = vld [vmem:[%s8023_s8 + $0x80] sm:$0xff]  ;;  %v7695_v29 = vld [vmem:[%s8023_s8 + $0x88] sm:$0xff] }
 0x2fd   : > { %v1032_v4 = vpop.f32.mrf.mxu0  ;;  %v7455_v17 = vpop.eup %7454  ;;  %v1316_v53 = vadd.f32 %v7694_v36, %v1222_v21  ;;  %v1232_v0 = vadd.f32 %v8164_v31, %v8287_v40 }
 0x2fe   : > { %9839 = vst [vmem:[#allocation33_spill] sm:$0xff] %v8356_v2  ;;  %v8359_v34 = vpop.f32.mrf.mxu1  ;;  %7468 = vpow2.f32 %v1376_v15  ;;  %v1382_v52 = vmul.f32 1.442695, %v8356_v2  ;;  %v8365_v57 = vadd.f32 %v8133_v16, %v1032_v4  ;;  %6440 = vmatprep.mubr.f32.mxu0 %v8361_v45  ;;  %v1317_v15 = vadd.f32 %v7695_v29, %v1227_v33 }
 0x2ff   : > { %v7457_v37 = vpop.eup %7456  ;;  %v6300_v7 = vpop.f32.mrf.mxu0  ;;  %v1237_v4 = vadd.f32 %v8277_v27, %v8164_v31  ;;  %6441 = vmatmul.mubr.f32.gmra.mxu0 %v8367_v32 }
 0x300   : > { %9840 = vst [vmem:[#allocation34_spill] sm:$0xff] %v8365_v57  ;;  %v8373_v43 = vpop.f32.mrf.mxu1  ;;  %v1380_v62 = vmul.f32 1.442695, %v8365_v57  ;;  %v8380_v48 = vadd.f32 %v6300_v7, %v8133_v16  ;;  %7470 = vpow2.f32 %v1382_v52  ;;  %v8383_v36 = vmul.f32 %v7457_v37, %v1316_v53  ;;  %v7696_v57 = vld [vmem:[%s8023_s8 + $0x90] sm:$0xff]  ;;  %v7697_v52 = vld [vmem:[%s8023_s8 + $0x98] sm:$0xff] }
 0x301   : > { %v1042_v40 = vpop.f32.mrf.mxu0  ;;  %v7459_v21 = vpop.eup %7458  ;;  %v8389_v27 = vmul.f32 %v7455_v17, %v1317_v15  ;;  %v1318_v7 = vadd.f32 %v7696_v57, %v1232_v0  ;;  %v1319_v37 = vadd.f32 %v7697_v52, %v1237_v4 }
 0x302   : > { %9841 = vst [vmem:[#allocation35_spill] sm:$0xff] %v8380_v48  ;;  %7472 = vpow2.f32 %v1380_v62  ;;  %v1386_v2 = vmul.f32 1.442695, %v8380_v48  ;;  %v8387_v33 = vadd.f32 %v8133_v16, %v1042_v40  ;;  %v1271_v51 = vpop.f32.mrf.mxu1  ;;  %6443 = vmatprep.mubr.f32.mxu0 %v8383_v36  ;;  %v1247_v62 = vadd.f32 %v8301_v60, %v8164_v31 }
 0x303   : > { %v7461_v29 = vpop.eup %7460  ;;  %v6303_v53 = vpop.f32.mrf.mxu0  ;;  %6444 = vmatmul.mubr.f32.gmra.mxu0 %v8389_v27 }
 0x304   : > { %9842 = vst [vmem:[#allocation36_spill] sm:$0xff] %v8387_v33  ;;  %v1384_v40 = vmul.f32 1.442695, %v8387_v33  ;;  %v8400_v17 = vadd.f32 %v6303_v53, %v8133_v16  ;;  %7474 = vpow2.f32 %v1386_v2  ;;  %v8405_v0 = vmul.f32 %v7461_v29, %v1318_v7  ;;  %v7698_v33 = vld [vmem:[%s8023_s8 + $0xa0] sm:$0xff]  ;;  %v6383_v39 = vpop.f32.mrf.mxu1  ;;  %v7699_v2 = vld [vmem:[%s8023_s8 + $0xa8] sm:$0xff] }
 0x305   : > { %v1052_v57 = vpop.f32.mrf.mxu0  ;;  %v7463_v15 = vpop.eup %7462  ;;  %v8411_v53 = vmul.f32 %v7459_v21, %v1319_v37  ;;  %v1320_v48 = vadd.f32 %v7698_v33, %v1242_v8  ;;  %v1321_v29 = vadd.f32 %v7699_v2, %v1247_v62  ;;  %v1257_v7 = vadd.f32 %v8325_v58, %v8164_v31  ;;  %v7700_v21 = vld [vmem:[%s8023_s8 + $0xb0] sm:$0xff] }
 0x306   : > { %9843 = vst [vmem:[#allocation37_spill] sm:$0xff] %v8400_v17  ;;  %7476 = vpow2.f32 %v1384_v40  ;;  %v1390_v60 = vmul.f32 1.442695, %v8400_v17  ;;  %v8409_v4 = vadd.f32 %v8133_v16, %v1052_v57  ;;  %6446 = vmatprep.mubr.f32.mxu0 %v8405_v0  ;;  %v1322_v37 = vadd.f32 %v7700_v21, %v1252_v10  ;;  %v1281_v38 = vpop.f32.mrf.mxu1  ;;  %v7701_v10 = vld [vmem:[%s8023_s8 + $0xb8] sm:$0xff] }
 0x307   : > { %v7465_v52 = vpop.eup %7464  ;;  %v6306_v54 = vpop.f32.mrf.mxu0  ;;  %6447 = vmatmul.mubr.f32.gmra.mxu0 %v8411_v53  ;;  %v1262_v8 = vadd.f32 %v8164_v31, %v8359_v34  ;;  %v8432_v2 = vmul.f32 %v7463_v15, %v1321_v29  ;;  %v1323_v34 = vadd.f32 %v7701_v10, %v1257_v7  ;;  %v7702_v15 = vld [vmem:[%s8023_s8 + $0xc0] sm:$0xff] }
 0x308   : > { %9844 = vst [vmem:[#allocation38_spill] sm:$0xff] %v8409_v4  ;;  %v1388_v40 = vmul.f32 1.442695, %v8409_v4  ;;  %v8420_v17 = vadd.f32 %v6306_v54, %v8133_v16  ;;  %7478 = vpow2.f32 %v1390_v60  ;;  %v8426_v57 = vmul.f32 %v7465_v52, %v1320_v48  ;;  %v6386_v21 = vpop.f32.mrf.mxu1 }
 0x309   : > { %v1062_v33 = vpop.f32.mrf.mxu0  ;;  %v7467_v62 = vpop.eup %7466  ;;  %v1267_v48 = vadd.f32 %v8349_v25, %v8164_v31  ;;  %v1324_v29 = vadd.f32 %v7702_v15, %v1262_v8  ;;  %v7705_v15 = vld [vmem:[%s8023_s8 + $0xd8] sm:$0xff] }
 0x30a   : > { %9845 = vst [vmem:[#allocation39_spill] sm:$0xff] %v8420_v17  ;;  %7480 = vpow2.f32 %v1388_v40  ;;  %v1394_v58 = vmul.f32 1.442695, %v8420_v17  ;;  %v8430_v54 = vadd.f32 %v8133_v16, %v1062_v33  ;;  %6449 = vmatprep.mubr.f32.mxu0 %v8426_v57  ;;  %v1272_v40 = vadd.f32 %v8164_v31, %v1271_v51  ;;  %v7703_v33 = vld [vmem:[%s8023_s8 + $0xc8] sm:$0xff]  ;;  %v7704_v51 = vld [vmem:[%s8023_s8 + $0xd0] sm:$0xff] }
 0x30b   : > { %v7469_v4 = vpop.eup %7468  ;;  %6450 = vmatmul.mubr.f32.gmra.mxu0 %v8432_v2  ;;  %v8445_v7 = vmul.f32 %v7467_v62, %v1323_v34  ;;  %v1325_v10 = vadd.f32 %v7703_v33, %v1267_v48  ;;  %v1291_v48 = vpop.f32.mrf.mxu1 }
 0x30c   : > { %9846 = vst [vmem:[#allocation40_spill] sm:$0xff] %v8430_v54  ;;  %v1392_v60 = vmul.f32 1.442695, %v8430_v54  ;;  %v8440_v52 = vmul.f32 %v7469_v4, %v1322_v37  ;;  %7482 = vpow2.f32 %v1394_v58  ;;  %v1277_v4 = vadd.f32 %v8373_v43, %v8164_v31  ;;  %v7707_v54 = vld [vmem:[%s8023_s8 + $0xe8] sm:$0xff] }
 0x30d   : > { %v7471_v16 = vpop.eup %7470  ;;  %v1326_v58 = vadd.f32 %v7704_v51, %v1272_v40  ;;  %v1287_v43 = vadd.f32 %v6383_v39, %v8164_v31  ;;  %v7706_v40 = vld [vmem:[%s8023_s8 + $0xe0] sm:$0xff]  ;;  %v1297_v39 = vadd.f32 %v6386_v21, %v8164_v31  ;;  %v1508_v21 = vld [vmem:[#allocation5 + $0x3f0] sm:$0xff] }
 0x30e   : > { %7484 = vpow2.f32 %v1392_v60  ;;  %6452 = vmatprep.mubr.f32.mxu0 %v8440_v52  ;;  %v1282_v60 = vadd.f32 %v8164_v31, %v1281_v38  ;;  %v8456_v62 = vmul.f32 %v7471_v16, %v1325_v10  ;;  %v1327_v33 = vadd.f32 %v7705_v15, %v1277_v4  ;;  %6547 = vmatprep.subr.mxu0 %v1508_v21 }
 0x30f   : > { %v7473_v25 = vpop.eup %7472  ;;  %6453 = vmatmul.mubr.f32.gmra.mxu0 %v8445_v7  ;;  %v1292_v38 = vadd.f32 %v8164_v31, %v1291_v48  ;;  %v1329_v4 = vadd.f32 %v7707_v54, %v1287_v43  ;;  %v1477_v54 = vld [vmem:[#allocation5 + $0x208] sm:$0xff]  ;;  %v1507_v43 = vld [vmem:[#allocation5 + $0x3d0] sm:$0xff] }
 0x310   : > { %v8451_v37 = vmul.f32 %v7473_v25, %v1324_v29  ;;  %v1328_v51 = vadd.f32 %v7706_v40, %v1282_v60  ;;  %v7709_v40 = vld [vmem:[%s8023_s8 + $0xf8] sm:$0xff]  ;;  %6497 = vmatprep.subr.mxu1 %v1477_v54  ;;  %6548 = vmatpush3.msra.mxu0 %v1508_v21  ;;  %v1494_v21 = vld [vmem:[#allocation5 + $0x230] sm:$0xff] }
 0x311   : > { %v7475_v8 = vpop.eup %7474  ;;  %6498 = vmatpush3.msra.mxu1 %v1477_v54  ;;  %6549 = vmatprep.subr.mxu0 %v1507_v43  ;;  %v1495_v54 = vld [vmem:[#allocation5 + $0x250] sm:$0xff] }
 0x312   : > { %6455 = vmatprep.mubr.f32.mxu0 %v8451_v37  ;;  %v8466_v16 = vmul.f32 %v7475_v8, %v1327_v33  ;;  %v1331_v8 = vadd.f32 %v7709_v40, %v1297_v39  ;;  %6550 = vmatpush3.msra.mxu0 %v1507_v43  ;;  %v1501_v39 = vld [vmem:[#allocation5 + $0x310] sm:$0xff]  ;;  %v8485_v43 = vld [vmem:[#allocation7 + $0x4] ss:$0 sm:$0xff] }
 0x313   : > { %v7477_v34 = vpop.eup %7476  ;;  %6456 = vmatmul.mubr.f32.gmra.mxu0 %v8456_v62  ;;  %v1497_v40 = vld [vmem:[#allocation5 + $0x290] sm:$0xff] }
 0x314   : > { %v8461_v29 = vmul.f32 %v7477_v34, %v1326_v58  ;;  %v7708_v34 = vld [vmem:[%s8023_s8 + $0xf0] sm:$0xff] }
 0x315   : > { %v7479_v25 = vpop.eup %7478  ;;  %v1330_v17 = vadd.f32 %v7708_v34, %v1292_v38  ;;  %v1504_v38 = vld [vmem:[#allocation5 + $0x370] sm:$0xff] }
 0x316   : > { %6458 = vmatprep.mubr.f32.mxu0 %v8461_v29  ;;  %v8475_v60 = vmul.f32 %v7479_v25, %v1329_v4  ;;  %v1524_v25 = vld [vmem:[#allocation5 + $0x3f8] sm:$0xff]  ;;  %v1502_v4 = vld [vmem:[#allocation5 + $0x330] sm:$0xff] }
 0x317   : > { %v7481_v10 = vpop.eup %7480  ;;  %6459 = vmatmul.mubr.f32.gmra.mxu0 %v8466_v16  ;;  %6627 = vmatprep.subr.mxu1 %v1524_v25  ;;  %v1499_v34 = vld [vmem:[#allocation5 + $0x2d0] sm:$0xff] }
 0x318   : > { %v8471_v15 = vmul.f32 %v7481_v10, %v1328_v51  ;;  %v1506_v51 = vld [vmem:[#allocation5 + $0x3b0] sm:$0xff] }
 0x319   : > { %v7483_v58 = vpop.eup %7482  ;;  %6551 = vmatprep.subr.mxu0 %v1506_v51  ;;  %v1503_v10 = vld [vmem:[#allocation5 + $0x350] sm:$0xff] }
 0x31a   : > { %6461 = vmatprep.mubr.f32.mxu0 %v8471_v15  ;;  %v8482_v31 = vmul.f32 %v7483_v58, %v1331_v8  ;;  %6552 = vmatpush3.msra.mxu0 %v1506_v51  ;;  %v1500_v58 = vld [vmem:[#allocation5 + $0x2f0] sm:$0xff] }
 0x31b   : > { %v7485_v48 = vpop.eup %7484  ;;  %6462 = vmatmul.mubr.f32.gmra.mxu0 %v8475_v60  ;;  %v1496_v8 = vld [vmem:[#allocation5 + $0x270] sm:$0xff] }
 0x31c   : > { %v8479_v33 = vmul.f32 %v7485_v48, %v1330_v17  ;;  %v1505_v17 = vld [vmem:[#allocation5 + $0x390] sm:$0xff] }
 0x31d   : > { %6553 = vmatprep.subr.mxu0 %v1505_v17  ;;  %v1498_v48 = vld [vmem:[#allocation5 + $0x2b0] sm:$0xff] }
 0x31e   : > { %6464 = vmatprep.mubr.f32.mxu0 %v8479_v33  ;;  %6554 = vmatpush3.msra.mxu0 %v1505_v17 }
 0x31f   : > { %6465 = vmatmul.mubr.f32.gmra.mxu0 %v8482_v31  ;;  %6555 = vmatprep.subr.mxu0 %v1504_v38 }
 0x320   : > { %6556 = vmatpush3.msra.mxu0 %v1504_v38 }
 0x321   : > { %6557 = vmatprep.subr.mxu0 %v1503_v10 }
 0x322   : > { %6558 = vmatpush3.msra.mxu0 %v1503_v10 }
 0x323   : > { %6559 = vmatprep.subr.mxu0 %v1502_v4 }
 0x324   : > { %6560 = vmatpush3.msra.mxu0 %v1502_v4 }
 0x325   : > { %6561 = vmatprep.subr.mxu0 %v1501_v39 }
 0x326   : > { %6562 = vmatpush3.msra.mxu0 %v1501_v39 }
 0x327   : > { %6563 = vmatprep.subr.mxu0 %v1500_v58 }
 0x328   : > { %6564 = vmatpush3.msra.mxu0 %v1500_v58 }
 0x329   : > { %6565 = vmatprep.subr.mxu0 %v1499_v34 }
 0x32a   : > { %6566 = vmatpush3.msra.mxu0 %v1499_v34 }
 0x32b   : > { %6567 = vmatprep.subr.mxu0 %v1498_v48 }
 0x32c   : > { %6568 = vmatpush3.msra.mxu0 %v1498_v48 }
 0x32d   : > { %6569 = vmatprep.subr.mxu0 %v1497_v40 }
 0x32e   : > { %6570 = vmatpush3.msra.mxu0 %v1497_v40 }
 0x32f   : > { %6571 = vmatprep.subr.mxu0 %v1496_v8 }
 0x330   : > { %6572 = vmatpush3.msra.mxu0 %v1496_v8  ;;  %v1523_v8 = vld [vmem:[#allocation5 + $0x3d8] sm:$0xff] }
 0x331   : > { %6573 = vmatprep.subr.mxu0 %v1495_v54 }
 0x332   : > { %6574 = vmatpush3.msra.mxu0 %v1495_v54 }
 0x333   : > { %6575 = vmatprep.subr.mxu0 %v1494_v21 }
 0x334   : > { %6576 = vmatpush3.msra.mxu0 %v1494_v21 }
 0x3a3   : > { %v6421_v51 = vpop.f32.mrf.mxu0 }
 0x3a4   : > { %v1606_v17 = vadd.f32 %v6421_v51, %v8485_v43 }
 0x3a5   : > { %v1600_v38 = vpop.f32.mrf.mxu0 }
 0x3a6   : > { %v1601_v10 = vadd.f32 %v8485_v43, %v1600_v38  ;;  %v1760_v58 = vmax.f32 %v1606_v17, 0.0  ;;  %v1521_v17 = vld [vmem:[#allocation5 + $0x398] sm:$0xff] }
 0x3a7   : > { %v6424_v4 = vpop.f32.mrf.mxu0 }
 0x3a8   : > { %v1759_v39 = vmax.f32 %v1601_v10, 0.0  ;;  %v1616_v34 = vadd.f32 %v6424_v4, %v8485_v43 }
 0x3a9   : > { %v1610_v48 = vpop.f32.mrf.mxu0 }
 0x3aa   : > { %v1611_v40 = vadd.f32 %v8485_v43, %v1610_v48  ;;  %6499 = vmatprep.mubr.f32.mxu1 %v1759_v39  ;;  %v1762_v28 = vmax.f32 %v1616_v34, 0.0  ;;  %v1520_v39 = vld [vmem:[#allocation5 + $0x378] sm:$0xff] }
 0x3ab   : > { %v6427_v54 = vpop.f32.mrf.mxu0  ;;  %6500 = vmatmul.mubr.f32.vlgmr.msra.gmra.mxu1 %v1760_v58 }
 0x3ac   : > { %v1761_v21 = vmax.f32 %v1611_v40, 0.0  ;;  %6628 = vmatpush3.msra.mxu1 %v1524_v25  ;;  %v1626_v51 = vadd.f32 %v6427_v54, %v8485_v43  ;;  %v1519_v40 = vld [vmem:[#allocation5 + $0x358] sm:$0xff] }
 0x3ad   : > { %v1620_v44 = vpop.f32.mrf.mxu0  ;;  %6629 = vmatprep.subr.mxu1 %v1523_v8 }
 0x3ae   : > { %v1621_v38 = vadd.f32 %v8485_v43, %v1620_v44  ;;  %6502 = vmatprep.mubr.f32.mxu1 %v1761_v21  ;;  %6630 = vmatpush3.msra.mxu1 %v1523_v8  ;;  %v1764_v58 = vmax.f32 %v1626_v51, 0.0 }
 0x3af   : > { %v6430_v10 = vpop.f32.mrf.mxu0  ;;  %6503 = vmatmul.mubr.f32.gmra.mxu1 %v1762_v28  ;;  %6631 = vmatprep.subr.mxu1 %v1522_v3  ;;  %v1518_v28 = vld [vmem:[#allocation5 + $0x338] sm:$0xff] }
 0x3b0   : > { %v1763_v4 = vmax.f32 %v1621_v38, 0.0  ;;  %6632 = vmatpush3.msra.mxu1 %v1522_v3  ;;  %v1636_v25 = vadd.f32 %v6430_v10, %v8485_v43  ;;  %v1517_v38 = vld [vmem:[#allocation5 + $0x318] sm:$0xff] }
 0x3b1   : > { %v1630_v48 = vpop.f32.mrf.mxu0  ;;  %6633 = vmatprep.subr.mxu1 %v1521_v17 }
 0x3b2   : > { %v1631_v34 = vadd.f32 %v8485_v43, %v1630_v48  ;;  %6505 = vmatprep.mubr.f32.mxu1 %v1763_v4  ;;  %6634 = vmatpush3.msra.mxu1 %v1521_v17  ;;  %v1766_v54 = vmax.f32 %v1636_v25, 0.0  ;;  %v1516_v4 = vld [vmem:[#allocation5 + $0x2f8] sm:$0xff] }
 0x3b3   : > { %v6433_v44 = vpop.f32.mrf.mxu0  ;;  %6506 = vmatmul.mubr.f32.gmra.mxu1 %v1764_v58  ;;  %6635 = vmatprep.subr.mxu1 %v1520_v39 }
 0x3b4   : > { %v1765_v8 = vmax.f32 %v1631_v34, 0.0  ;;  %6636 = vmatpush3.msra.mxu1 %v1520_v39  ;;  %v1646_v3 = vadd.f32 %v6433_v44, %v8485_v43  ;;  %v1515_v34 = vld [vmem:[#allocation5 + $0x2d8] sm:$0xff] }
 0x3b5   : > { %v1640_v21 = vpop.f32.mrf.mxu0  ;;  %6637 = vmatprep.subr.mxu1 %v1519_v40 }
 0x3b6   : > { %v1641_v51 = vadd.f32 %v8485_v43, %v1640_v21  ;;  %6508 = vmatprep.mubr.f32.mxu1 %v1765_v8  ;;  %6638 = vmatpush3.msra.mxu1 %v1519_v40  ;;  %v1768_v58 = vmax.f32 %v1646_v3, 0.0  ;;  %v1514_v8 = vld [vmem:[#allocation5 + $0x2b8] sm:$0xff] }
 0x3b7   : > { %v6436_v10 = vpop.f32.mrf.mxu0  ;;  %6509 = vmatmul.mubr.f32.gmra.mxu1 %v1766_v54  ;;  %6639 = vmatprep.subr.mxu1 %v1518_v28 }
 0x3b8   : > { %v1767_v17 = vmax.f32 %v1641_v51, 0.0  ;;  %6640 = vmatpush3.msra.mxu1 %v1518_v28  ;;  %v1656_v39 = vadd.f32 %v6436_v10, %v8485_v43  ;;  %v1513_v51 = vld [vmem:[#allocation5 + $0x298] sm:$0xff] }
 0x3b9   : > { %v1650_v48 = vpop.f32.mrf.mxu0  ;;  %6641 = vmatprep.subr.mxu1 %v1517_v38 }
 0x3ba   : > { %v1651_v25 = vadd.f32 %v8485_v43, %v1650_v48  ;;  %6511 = vmatprep.mubr.f32.mxu1 %v1767_v17  ;;  %6642 = vmatpush3.msra.mxu1 %v1517_v38  ;;  %v1770_v54 = vmax.f32 %v1656_v39, 0.0 }
 0x3bb   : > { %v6439_v44 = vpop.f32.mrf.mxu0  ;;  %6512 = vmatmul.mubr.f32.gmra.mxu1 %v1768_v58  ;;  %6643 = vmatprep.subr.mxu1 %v1516_v4 }
 0x3bc   : > { %v1769_v40 = vmax.f32 %v1651_v25, 0.0  ;;  %6644 = vmatpush3.msra.mxu1 %v1516_v4  ;;  %v1666_v28 = vadd.f32 %v6439_v44, %v8485_v43 }
 0x3bd   : > { %v1660_v21 = vpop.f32.mrf.mxu0  ;;  %6645 = vmatprep.subr.mxu1 %v1515_v34 }
 0x3be   : > { %v1661_v3 = vadd.f32 %v8485_v43, %v1660_v21  ;;  %6514 = vmatprep.mubr.f32.mxu1 %v1769_v40  ;;  %6646 = vmatpush3.msra.mxu1 %v1515_v34  ;;  %v1772_v17 = vmax.f32 %v1666_v28, 0.0 }
 0x3bf   : > { %v6442_v10 = vpop.f32.mrf.mxu0  ;;  %6515 = vmatmul.mubr.f32.gmra.mxu1 %v1770_v54  ;;  %6647 = vmatprep.subr.mxu1 %v1514_v8 }
 0x3c0   : > { %v1771_v38 = vmax.f32 %v1661_v3, 0.0  ;;  %6648 = vmatpush3.msra.mxu1 %v1514_v8  ;;  %v1676_v58 = vadd.f32 %v6442_v10, %v8485_v43 }
 0x3c1   : > { %v1670_v4 = vpop.f32.mrf.mxu0  ;;  %6649 = vmatprep.subr.mxu1 %v1513_v51 }
 0x3c2   : > { %v1671_v39 = vadd.f32 %v8485_v43, %v1670_v4  ;;  %6517 = vmatprep.mubr.f32.mxu1 %v1771_v38  ;;  %6650 = vmatpush3.msra.mxu1 %v1513_v51  ;;  %v1774_v44 = vmax.f32 %v1676_v58, 0.0 }
 0x3c3   : > { %v6445_v48 = vpop.f32.mrf.mxu0  ;;  %6518 = vmatmul.mubr.f32.gmra.mxu1 %v1772_v17 }
 0x3c4   : > { %v1773_v25 = vmax.f32 %v1671_v39, 0.0  ;;  %v1686_v34 = vadd.f32 %v6445_v48, %v8485_v43 }
 0x3c5   : > { %v1680_v40 = vpop.f32.mrf.mxu0 }
 0x3c6   : > { %v1681_v54 = vadd.f32 %v8485_v43, %v1680_v40  ;;  %6520 = vmatprep.mubr.f32.mxu1 %v1773_v25  ;;  %v1776_v21 = vmax.f32 %v1686_v34, 0.0 }
 0x3c7   : > { %v6448_v8 = vpop.f32.mrf.mxu0  ;;  %6521 = vmatmul.mubr.f32.gmra.mxu1 %v1774_v44 }
 0x3c8   : > { %v1775_v28 = vmax.f32 %v1681_v54, 0.0  ;;  %v1696_v3 = vadd.f32 %v6448_v8, %v8485_v43 }
 0x3c9   : > { %v1690_v10 = vpop.f32.mrf.mxu0 }
 0x3ca   : > { %v1691_v38 = vadd.f32 %v8485_v43, %v1690_v10  ;;  %6523 = vmatprep.mubr.f32.mxu1 %v1775_v28  ;;  %v1778_v58 = vmax.f32 %v1696_v3, 0.0 }
 0x3cb   : > { %v6451_v51 = vpop.f32.mrf.mxu0  ;;  %6524 = vmatmul.mubr.f32.gmra.mxu1 %v1776_v21 }
 0x3cc   : > { %v1777_v17 = vmax.f32 %v1691_v38, 0.0  ;;  %v1706_v4 = vadd.f32 %v6451_v51, %v8485_v43 }
 0x3cd   : > { %v1700_v39 = vpop.f32.mrf.mxu0 }
 0x3ce   : > { %v1701_v48 = vadd.f32 %v8485_v43, %v1700_v39  ;;  %6526 = vmatprep.mubr.f32.mxu1 %v1777_v17  ;;  %v1780_v34 = vmax.f32 %v1706_v4, 0.0 }
 0x3cf   : > { %v6454_v25 = vpop.f32.mrf.mxu0  ;;  %6527 = vmatmul.mubr.f32.gmra.mxu1 %v1778_v58 }
 0x3d0   : > { %v1779_v44 = vmax.f32 %v1701_v48, 0.0  ;;  %v1716_v40 = vadd.f32 %v6454_v25, %v8485_v43 }
 0x3d1   : > { %v1710_v54 = vpop.f32.mrf.mxu0 }
 0x3d2   : > { %v1711_v8 = vadd.f32 %v8485_v43, %v1710_v54  ;;  %6529 = vmatprep.mubr.f32.mxu1 %v1779_v44  ;;  %v1782_v3 = vmax.f32 %v1716_v40, 0.0 }
 0x3d3   : > { %v6457_v28 = vpop.f32.mrf.mxu0  ;;  %6530 = vmatmul.mubr.f32.gmra.mxu1 %v1780_v34 }
 0x3d4   : > { %v1781_v21 = vmax.f32 %v1711_v8, 0.0  ;;  %v1726_v10 = vadd.f32 %v6457_v28, %v8485_v43 }
 0x3d5   : > { %v1720_v38 = vpop.f32.mrf.mxu0 }
 0x3d6   : > { %v1721_v51 = vadd.f32 %v8485_v43, %v1720_v38  ;;  %6532 = vmatprep.mubr.f32.mxu1 %v1781_v21  ;;  %v1784_v4 = vmax.f32 %v1726_v10, 0.0 }
 0x3d7   : > { %v6460_v17 = vpop.f32.mrf.mxu0  ;;  %6533 = vmatmul.mubr.f32.gmra.mxu1 %v1782_v3 }
 0x3d8   : > { %v1783_v58 = vmax.f32 %v1721_v51, 0.0  ;;  %v1736_v39 = vadd.f32 %v6460_v17, %v8485_v43 }
 0x3d9   : > { %v1730_v48 = vpop.f32.mrf.mxu0 }
 0x3da   : > { %v1731_v25 = vadd.f32 %v8485_v43, %v1730_v48  ;;  %6535 = vmatprep.mubr.f32.mxu1 %v1783_v58  ;;  %v1786_v40 = vmax.f32 %v1736_v39, 0.0  ;;  %v1512_v39 = vld [vmem:[#allocation5 + $0x278] sm:$0xff] }
 0x3db   : > { %v6463_v44 = vpop.f32.mrf.mxu0  ;;  %6536 = vmatmul.mubr.f32.gmra.mxu1 %v1784_v4  ;;  %6651 = vmatprep.subr.mxu1 %v1512_v39  ;;  %v1511_v48 = vld [vmem:[#allocation5 + $0x258] sm:$0xff] }
 0x3dc   : > { %v1785_v34 = vmax.f32 %v1731_v25, 0.0  ;;  %v1746_v54 = vadd.f32 %v6463_v44, %v8485_v43  ;;  %6652 = vmatpush3.msra.mxu1 %v1512_v39  ;;  %v1510_v25 = vld [vmem:[#allocation5 + $0x238] sm:$0xff]  ;;  %v1493_v44 = vld [vmem:[#allocation5 + $0x210] sm:$0xff] }
 0x3dd   : > { %v1740_v8 = vpop.f32.mrf.mxu0  ;;  %6653 = vmatprep.subr.mxu1 %v1511_v48  ;;  %6577 = vmatprep.subr.mxu0 %v1493_v44 }
 0x3de   : > { %v1741_v28 = vadd.f32 %v8485_v43, %v1740_v8  ;;  %6538 = vmatprep.mubr.f32.mxu1 %v1785_v34  ;;  %v1788_v10 = vmax.f32 %v1746_v54, 0.0  ;;  %6654 = vmatpush3.msra.mxu1 %v1511_v48  ;;  %v1509_v34 = vld [vmem:[#allocation5 + $0x218] sm:$0xff] }
 0x3df   : > { %v6466_v21 = vpop.f32.mrf.mxu0  ;;  %6539 = vmatmul.mubr.f32.gmra.mxu1 %v1786_v40  ;;  %6655 = vmatprep.subr.mxu1 %v1510_v25  ;;  %v8519_v40 = vld [vmem:[#allocation7 + $0x5] ss:$0 sm:$0xff] }
 0x3e0   : > { %v1787_v3 = vmax.f32 %v1741_v28, 0.0  ;;  %v1756_v38 = vadd.f32 %v6466_v21, %v8485_v43  ;;  %6656 = vmatpush3.msra.mxu1 %v1510_v25  ;;  %6578 = vmatpush3.msra.mxu0 %v1493_v44 }
 0x3e1   : > { %v1750_v51 = vpop.f32.mrf.mxu0  ;;  %6657 = vmatprep.subr.mxu1 %v1509_v34 }
 0x3e2   : > { %v1751_v17 = vadd.f32 %v8485_v43, %v1750_v51  ;;  %6541 = vmatprep.mubr.f32.mxu1 %v1787_v3  ;;  %v1790_v4 = vmax.f32 %v1756_v38, 0.0  ;;  %6658 = vmatpush3.msra.mxu1 %v1509_v34  ;;  %v2686_v43 = vld [vmem:[#allocation5 + $0x5e0] sm:$0xff] }
 0x3e3   : > { %6542 = vmatmul.mubr.f32.gmra.mxu1 %v1788_v10  ;;  %6707 = vmatprep.subr.mxu0 %v2686_v43 }
 0x3e4   : > { %v1789_v58 = vmax.f32 %v1751_v17, 0.0 }
 0x3e6   : > { %6544 = vmatprep.mubr.f32.mxu1 %v1789_v58 }
 0x3e7   : > { %6545 = vmatmul.mubr.f32.gmra.mxu1 %v1790_v4  ;;  %v2685_v4 = vld [vmem:[#allocation5 + $0x5c0] sm:$0xff] }
 0x46b   : > { %v6501_v54 = vpop.f32.mrf.mxu1 }
 0x46c   : > { %v1867_v8 = vadd.f32 %v6501_v54, %v8519_v40 }
 0x46d   : > { %v1861_v28 = vpop.f32.mrf.mxu1 }
 0x46e   : > { %v1862_v21 = vadd.f32 %v8519_v40, %v1861_v28  ;;  %v2021_v38 = vmax.f32 %v1867_v8, 0.0  ;;  %v2684_v8 = vld [vmem:[#allocation5 + $0x5a0] sm:$0xff] }
 0x46f   : > { %v6504_v3 = vpop.f32.mrf.mxu1 }
 0x470   : > { %v2020_v10 = vmax.f32 %v1862_v21, 0.0  ;;  %v1877_v51 = vadd.f32 %v6504_v3, %v8519_v40 }
 0x471   : > { %v1871_v17 = vpop.f32.mrf.mxu1 }
 0x472   : > { %v1872_v58 = vadd.f32 %v8519_v40, %v1871_v17  ;;  %6579 = vmatprep.mubr.f32.mxu0 %v2020_v10  ;;  %6659 = vmatprep.mubr.f32.mxu1 %v2020_v10  ;;  %v2023_v25 = vmax.f32 %v1877_v51, 0.0  ;;  %v2683_v51 = vld [vmem:[#allocation5 + $0x580] sm:$0xff] }
 0x473   : > { %v6507_v39 = vpop.f32.mrf.mxu1  ;;  %6580 = vmatmul.mubr.f32.vlgmr.msra.gmra.mxu0 %v2021_v38  ;;  %6660 = vmatmul.mubr.f32.vlgmr.msra.gmra.mxu1 %v2021_v38 }
 0x474   : > { %v2022_v48 = vmax.f32 %v1872_v58, 0.0  ;;  %6708 = vmatpush3.msra.mxu0 %v2686_v43  ;;  %v1887_v44 = vadd.f32 %v6507_v39, %v8519_v40 }
 0x475   : > { %v1881_v34 = vpop.f32.mrf.mxu1  ;;  %6709 = vmatprep.subr.mxu0 %v2685_v4 }
 0x476   : > { %v1882_v54 = vadd.f32 %v8519_v40, %v1881_v34  ;;  %6582 = vmatprep.mubr.f32.mxu0 %v2022_v48  ;;  %6662 = vmatprep.mubr.f32.mxu1 %v2022_v48  ;;  %v2025_v3 = vmax.f32 %v1887_v44, 0.0  ;;  %v2682_v44 = vld [vmem:[#allocation5 + $0x560] sm:$0xff] }
 0x477   : > { %v6510_v28 = vpop.f32.mrf.mxu1  ;;  %6583 = vmatmul.mubr.f32.gmra.mxu0 %v2023_v25  ;;  %6663 = vmatmul.mubr.f32.gmra.mxu1 %v2023_v25 }
 0x478   : > { %v2024_v21 = vmax.f32 %v1882_v54, 0.0  ;;  %6710 = vmatpush3.msra.mxu0 %v2685_v4  ;;  %v1897_v10 = vadd.f32 %v6510_v28, %v8519_v40 }
 0x479   : > { %v1891_v38 = vpop.f32.mrf.mxu1  ;;  %6711 = vmatprep.subr.mxu0 %v2684_v8 }
 0x47a   : > { %v1892_v43 = vadd.f32 %v8519_v40, %v1891_v38  ;;  %6585 = vmatprep.mubr.f32.mxu0 %v2024_v21  ;;  %6665 = vmatprep.mubr.f32.mxu1 %v2024_v21  ;;  %v2027_v39 = vmax.f32 %v1897_v10, 0.0  ;;  %v2681_v10 = vld [vmem:[#allocation5 + $0x540] sm:$0xff] }
 0x47b   : > { %v6513_v17 = vpop.f32.mrf.mxu1  ;;  %6586 = vmatmul.mubr.f32.gmra.mxu0 %v2025_v3  ;;  %6666 = vmatmul.mubr.f32.gmra.mxu1 %v2025_v3 }
 0x47c   : > { %v2026_v58 = vmax.f32 %v1892_v43, 0.0  ;;  %6712 = vmatpush3.msra.mxu0 %v2684_v8  ;;  %v1907_v48 = vadd.f32 %v6513_v17, %v8519_v40 }
 0x47d   : > { %v1901_v25 = vpop.f32.mrf.mxu1  ;;  %6713 = vmatprep.subr.mxu0 %v2683_v51 }
 0x47e   : > { %v1902_v4 = vadd.f32 %v8519_v40, %v1901_v25  ;;  %6588 = vmatprep.mubr.f32.mxu0 %v2026_v58  ;;  %6668 = vmatprep.mubr.f32.mxu1 %v2026_v58  ;;  %v2029_v28 = vmax.f32 %v1907_v48, 0.0  ;;  %v2680_v48 = vld [vmem:[#allocation5 + $0x520] sm:$0xff] }
 0x47f   : > { %v6516_v34 = vpop.f32.mrf.mxu1  ;;  %6589 = vmatmul.mubr.f32.gmra.mxu0 %v2027_v39  ;;  %6669 = vmatmul.mubr.f32.gmra.mxu1 %v2027_v39 }
 0x480   : > { %v2028_v54 = vmax.f32 %v1902_v4, 0.0  ;;  %6714 = vmatpush3.msra.mxu0 %v2683_v51  ;;  %v1917_v21 = vadd.f32 %v6516_v34, %v8519_v40 }
 0x481   : > { %v1911_v3 = vpop.f32.mrf.mxu1  ;;  %6715 = vmatprep.subr.mxu0 %v2682_v44 }
 0x482   : > { %v1912_v8 = vadd.f32 %v8519_v40, %v1911_v3  ;;  %6591 = vmatprep.mubr.f32.mxu0 %v2028_v54  ;;  %6671 = vmatprep.mubr.f32.mxu1 %v2028_v54  ;;  %v2031_v17 = vmax.f32 %v1917_v21, 0.0  ;;  %v2679_v21 = vld [vmem:[#allocation5 + $0x500] sm:$0xff] }
 0x483   : > { %v6519_v38 = vpop.f32.mrf.mxu1  ;;  %6592 = vmatmul.mubr.f32.gmra.mxu0 %v2029_v28  ;;  %6672 = vmatmul.mubr.f32.gmra.mxu1 %v2029_v28 }
 0x484   : > { %v2030_v43 = vmax.f32 %v1912_v8, 0.0  ;;  %6716 = vmatpush3.msra.mxu0 %v2682_v44  ;;  %v1927_v58 = vadd.f32 %v6519_v38, %v8519_v40 }
 0x485   : > { %v1921_v39 = vpop.f32.mrf.mxu1  ;;  %6717 = vmatprep.subr.mxu0 %v2681_v10 }
 0x486   : > { %v1922_v51 = vadd.f32 %v8519_v40, %v1921_v39  ;;  %6594 = vmatprep.mubr.f32.mxu0 %v2030_v43  ;;  %6674 = vmatprep.mubr.f32.mxu1 %v2030_v43  ;;  %v2033_v34 = vmax.f32 %v1927_v58, 0.0  ;;  %v2678_v58 = vld [vmem:[#allocation5 + $0x4e0] sm:$0xff] }
 0x487   : > { %v6522_v25 = vpop.f32.mrf.mxu1  ;;  %6595 = vmatmul.mubr.f32.gmra.mxu0 %v2031_v17  ;;  %6675 = vmatmul.mubr.f32.gmra.mxu1 %v2031_v17 }
 0x488   : > { %v2032_v4 = vmax.f32 %v1922_v51, 0.0  ;;  %6718 = vmatpush3.msra.mxu0 %v2681_v10  ;;  %v1937_v54 = vadd.f32 %v6522_v25, %v8519_v40 }
 0x489   : > { %v1931_v28 = vpop.f32.mrf.mxu1  ;;  %6719 = vmatprep.subr.mxu0 %v2680_v48 }
 0x48a   : > { %v1932_v44 = vadd.f32 %v8519_v40, %v1931_v28  ;;  %6597 = vmatprep.mubr.f32.mxu0 %v2032_v4  ;;  %6677 = vmatprep.mubr.f32.mxu1 %v2032_v4  ;;  %v2035_v38 = vmax.f32 %v1937_v54, 0.0  ;;  %v2677_v54 = vld [vmem:[#allocation5 + $0x4c0] sm:$0xff] }
 0x48b   : > { %v6525_v3 = vpop.f32.mrf.mxu1  ;;  %6598 = vmatmul.mubr.f32.gmra.mxu0 %v2033_v34  ;;  %6678 = vmatmul.mubr.f32.gmra.mxu1 %v2033_v34 }
 0x48c   : > { %v2034_v8 = vmax.f32 %v1932_v44, 0.0  ;;  %6720 = vmatpush3.msra.mxu0 %v2680_v48  ;;  %v1947_v43 = vadd.f32 %v6525_v3, %v8519_v40 }
 0x48d   : > { %v1941_v17 = vpop.f32.mrf.mxu1  ;;  %6721 = vmatprep.subr.mxu0 %v2679_v21 }
 0x48e   : > { %v1942_v10 = vadd.f32 %v8519_v40, %v1941_v17  ;;  %6600 = vmatprep.mubr.f32.mxu0 %v2034_v8  ;;  %6680 = vmatprep.mubr.f32.mxu1 %v2034_v8  ;;  %v2037_v25 = vmax.f32 %v1947_v43, 0.0  ;;  %v2676_v43 = vld [vmem:[#allocation5 + $0x4a0] sm:$0xff] }
 0x48f   : > { %v6528_v39 = vpop.f32.mrf.mxu1  ;;  %6601 = vmatmul.mubr.f32.gmra.mxu0 %v2035_v38  ;;  %6681 = vmatmul.mubr.f32.gmra.mxu1 %v2035_v38 }
 0x490   : > { %v2036_v51 = vmax.f32 %v1942_v10, 0.0  ;;  %6722 = vmatpush3.msra.mxu0 %v2679_v21  ;;  %v1957_v4 = vadd.f32 %v6528_v39, %v8519_v40 }
 0x491   : > { %v1951_v34 = vpop.f32.mrf.mxu1  ;;  %6723 = vmatprep.subr.mxu0 %v2678_v58 }
 0x492   : > { %v1952_v48 = vadd.f32 %v8519_v40, %v1951_v34  ;;  %6603 = vmatprep.mubr.f32.mxu0 %v2036_v51  ;;  %6683 = vmatprep.mubr.f32.mxu1 %v2036_v51  ;;  %v2039_v3 = vmax.f32 %v1957_v4, 0.0 }
 0x493   : > { %v6531_v28 = vpop.f32.mrf.mxu1  ;;  %6604 = vmatmul.mubr.f32.gmra.mxu0 %v2037_v25  ;;  %6684 = vmatmul.mubr.f32.gmra.mxu1 %v2037_v25 }
 0x494   : > { %v2038_v44 = vmax.f32 %v1952_v48, 0.0  ;;  %6724 = vmatpush3.msra.mxu0 %v2678_v58  ;;  %v1967_v8 = vadd.f32 %v6531_v28, %v8519_v40 }
 0x495   : > { %v1961_v38 = vpop.f32.mrf.mxu1  ;;  %6725 = vmatprep.subr.mxu0 %v2677_v54 }
 0x496   : > { %v1962_v21 = vadd.f32 %v8519_v40, %v1961_v38  ;;  %6606 = vmatprep.mubr.f32.mxu0 %v2038_v44  ;;  %6686 = vmatprep.mubr.f32.mxu1 %v2038_v44  ;;  %v2041_v39 = vmax.f32 %v1967_v8, 0.0 }
 0x497   : > { %v6534_v17 = vpop.f32.mrf.mxu1  ;;  %6607 = vmatmul.mubr.f32.gmra.mxu0 %v2039_v3  ;;  %6687 = vmatmul.mubr.f32.gmra.mxu1 %v2039_v3 }
 0x498   : > { %v2040_v10 = vmax.f32 %v1962_v21, 0.0  ;;  %6726 = vmatpush3.msra.mxu0 %v2677_v54  ;;  %v1977_v51 = vadd.f32 %v6534_v17, %v8519_v40 }
 0x499   : > { %v1971_v25 = vpop.f32.mrf.mxu1  ;;  %6727 = vmatprep.subr.mxu0 %v2676_v43 }
 0x49a   : > { %v1972_v58 = vadd.f32 %v8519_v40, %v1971_v25  ;;  %6609 = vmatprep.mubr.f32.mxu0 %v2040_v10  ;;  %6689 = vmatprep.mubr.f32.mxu1 %v2040_v10  ;;  %v2043_v48 = vmax.f32 %v1977_v51, 0.0 }
 0x49b   : > { %v6537_v4 = vpop.f32.mrf.mxu1  ;;  %6610 = vmatmul.mubr.f32.gmra.mxu0 %v2041_v39  ;;  %6690 = vmatmul.mubr.f32.gmra.mxu1 %v2041_v39 }
 0x49c   : > { %v2042_v34 = vmax.f32 %v1972_v58, 0.0  ;;  %6728 = vmatpush3.msra.mxu0 %v2676_v43  ;;  %v1987_v28 = vadd.f32 %v6537_v4, %v8519_v40 }
 0x49d   : > { %v1981_v44 = vpop.f32.mrf.mxu1 }
 0x49e   : > { %v1982_v54 = vadd.f32 %v8519_v40, %v1981_v44  ;;  %6612 = vmatprep.mubr.f32.mxu0 %v2042_v34  ;;  %6692 = vmatprep.mubr.f32.mxu1 %v2042_v34  ;;  %v2045_v38 = vmax.f32 %v1987_v28, 0.0 }
 0x49f   : > { %v6540_v3 = vpop.f32.mrf.mxu1  ;;  %6613 = vmatmul.mubr.f32.gmra.mxu0 %v2043_v48  ;;  %6693 = vmatmul.mubr.f32.gmra.mxu1 %v2043_v48 }
 0x4a0   : > { %v2044_v8 = vmax.f32 %v1982_v54, 0.0  ;;  %v1997_v21 = vadd.f32 %v6540_v3, %v8519_v40 }
 0x4a1   : > { %v1991_v17 = vpop.f32.mrf.mxu1 }
 0x4a2   : > { %v1992_v10 = vadd.f32 %v8519_v40, %v1991_v17  ;;  %6615 = vmatprep.mubr.f32.mxu0 %v2044_v8  ;;  %6695 = vmatprep.mubr.f32.mxu1 %v2044_v8  ;;  %v2047_v51 = vmax.f32 %v1997_v21, 0.0  ;;  %v2675_v21 = vld [vmem:[#allocation5 + $0x480] sm:$0xff] }
 0x4a3   : > { %v6543_v43 = vpop.f32.mrf.mxu1  ;;  %6616 = vmatmul.mubr.f32.gmra.mxu0 %v2045_v38  ;;  %6696 = vmatmul.mubr.f32.gmra.mxu1 %v2045_v38  ;;  %v2674_v17 = vld [vmem:[#allocation5 + $0x460] sm:$0xff] }
 0x4a4   : > { %v2046_v39 = vmax.f32 %v1992_v10, 0.0  ;;  %v2007_v25 = vadd.f32 %v6543_v43, %v8519_v40  ;;  %6729 = vmatprep.subr.mxu0 %v2675_v21  ;;  %v2673_v10 = vld [vmem:[#allocation5 + $0x440] sm:$0xff] }
 0x4a5   : > { %v2001_v58 = vpop.f32.mrf.mxu1  ;;  %6730 = vmatpush3.msra.mxu0 %v2675_v21  ;;  %v2671_v43 = vld [vmem:[#allocation5 + $0x400] sm:$0xff]  ;;  %v2689_v21 = vld [vmem:[#allocation5 + $0x448] sm:$0xff] }
 0x4a6   : > { %v2002_v4 = vadd.f32 %v8519_v40, %v2001_v58  ;;  %6618 = vmatprep.mubr.f32.mxu0 %v2046_v39  ;;  %6698 = vmatprep.mubr.f32.mxu1 %v2046_v39  ;;  %v2049_v28 = vmax.f32 %v2007_v25, 0.0  ;;  %v2702_v39 = vld [vmem:[#allocation5 + $0x5e8] sm:$0xff] }
 0x4a7   : > { %v6546_v34 = vpop.f32.mrf.mxu1  ;;  %6619 = vmatmul.mubr.f32.gmra.mxu0 %v2047_v51  ;;  %6699 = vmatmul.mubr.f32.gmra.mxu1 %v2047_v51  ;;  %v2701_v51 = vld [vmem:[#allocation5 + $0x5c8] sm:$0xff] }
 0x4a8   : > { %v2048_v48 = vmax.f32 %v2002_v4, 0.0  ;;  %v2017_v44 = vadd.f32 %v6546_v34, %v8519_v40  ;;  %6731 = vmatprep.subr.mxu0 %v2674_v17  ;;  %6787 = vmatprep.subr.mxu1 %v2702_v39  ;;  %v2700_v25 = vld [vmem:[#allocation5 + $0x5a8] sm:$0xff] }
 0x4a9   : > { %v2011_v54 = vpop.f32.mrf.mxu1  ;;  %6732 = vmatpush3.msra.mxu0 %v2674_v17  ;;  %6788 = vmatpush3.msra.mxu1 %v2702_v39  ;;  %v2699_v58 = vld [vmem:[#allocation5 + $0x588] sm:$0xff] }
 0x4aa   : > { %v2012_v3 = vadd.f32 %v8519_v40, %v2011_v54  ;;  %6621 = vmatprep.mubr.f32.mxu0 %v2048_v48  ;;  %6701 = vmatprep.mubr.f32.mxu1 %v2048_v48  ;;  %v2051_v38 = vmax.f32 %v2017_v44, 0.0  ;;  %v2672_v40 = vld [vmem:[#allocation5 + $0x420] sm:$0xff]  ;;  %v2698_v4 = vld [vmem:[#allocation5 + $0x568] sm:$0xff] }
 0x4ab   : > { %6622 = vmatmul.mubr.f32.gmra.mxu0 %v2049_v28  ;;  %6702 = vmatmul.mubr.f32.gmra.mxu1 %v2049_v28  ;;  %v2697_v34 = vld [vmem:[#allocation5 + $0x548] sm:$0xff] }
 0x4ac   : > { %v2050_v8 = vmax.f32 %v2012_v3, 0.0  ;;  %6733 = vmatprep.subr.mxu0 %v2673_v10  ;;  %6789 = vmatprep.subr.mxu1 %v2701_v51  ;;  %v2696_v48 = vld [vmem:[#allocation5 + $0x528] sm:$0xff] }
 0x4ad   : > { %6734 = vmatpush3.msra.mxu0 %v2673_v10  ;;  %6790 = vmatpush3.msra.mxu1 %v2701_v51  ;;  %v2695_v28 = vld [vmem:[#allocation5 + $0x508] sm:$0xff]  ;;  %v8553_v10 = vld [vmem:[#allocation7 + $0x6] ss:$0 sm:$0xff] }
 0x4ae   : > { %6624 = vmatprep.mubr.f32.mxu0 %v2050_v8  ;;  %6704 = vmatprep.mubr.f32.mxu1 %v2050_v8  ;;  %v2694_v44 = vld [vmem:[#allocation5 + $0x4e8] sm:$0xff] }
 0x4af   : > { %6625 = vmatmul.mubr.f32.gmra.mxu0 %v2051_v38  ;;  %6705 = vmatmul.mubr.f32.gmra.mxu1 %v2051_v38  ;;  %v2693_v54 = vld [vmem:[#allocation5 + $0x4c8] sm:$0xff] }
 0x4b0   : > { %6735 = vmatprep.subr.mxu0 %v2672_v40  ;;  %6791 = vmatprep.subr.mxu1 %v2700_v25  ;;  %v2692_v3 = vld [vmem:[#allocation5 + $0x4a8] sm:$0xff] }
 0x4b1   : > { %6736 = vmatpush3.msra.mxu0 %v2672_v40  ;;  %6792 = vmatpush3.msra.mxu1 %v2700_v25  ;;  %v2691_v8 = vld [vmem:[#allocation5 + $0x488] sm:$0xff] }
 0x4b2   : > { %6737 = vmatprep.subr.mxu0 %v2671_v43  ;;  %6793 = vmatprep.subr.mxu1 %v2699_v58  ;;  %v2690_v38 = vld [vmem:[#allocation5 + $0x468] sm:$0xff] }
 0x4b3   : > { %6738 = vmatpush3.msra.mxu0 %v2671_v43  ;;  %6794 = vmatpush3.msra.mxu1 %v2699_v58  ;;  %v2688_v17 = vld [vmem:[#allocation5 + $0x428] sm:$0xff] }
 0x4b4   : > { %6795 = vmatprep.subr.mxu1 %v2698_v4 }
 0x4b5   : > { %6796 = vmatpush3.msra.mxu1 %v2698_v4 }
 0x4b6   : > { %6797 = vmatprep.subr.mxu1 %v2697_v34 }
 0x4b7   : > { %6798 = vmatpush3.msra.mxu1 %v2697_v34 }
 0x4b8   : > { %6799 = vmatprep.subr.mxu1 %v2696_v48 }
 0x4b9   : > { %6800 = vmatpush3.msra.mxu1 %v2696_v48 }
 0x4ba   : > { %6801 = vmatprep.subr.mxu1 %v2695_v28 }
 0x4bb   : > { %6802 = vmatpush3.msra.mxu1 %v2695_v28 }
 0x4bc   : > { %6803 = vmatprep.subr.mxu1 %v2694_v44 }
 0x4bd   : > { %6804 = vmatpush3.msra.mxu1 %v2694_v44 }
 0x4be   : > { %6805 = vmatprep.subr.mxu1 %v2693_v54 }
 0x4bf   : > { %6806 = vmatpush3.msra.mxu1 %v2693_v54 }
 0x4c0   : > { %6807 = vmatprep.subr.mxu1 %v2692_v3 }
 0x4c1   : > { %6808 = vmatpush3.msra.mxu1 %v2692_v3 }
 0x4c2   : > { %6809 = vmatprep.subr.mxu1 %v2691_v8 }
 0x4c3   : > { %6810 = vmatpush3.msra.mxu1 %v2691_v8 }
 0x4c4   : > { %6811 = vmatprep.subr.mxu1 %v2690_v38 }
 0x4c5   : > { %6812 = vmatpush3.msra.mxu1 %v2690_v38 }
 0x4c6   : > { %6813 = vmatprep.subr.mxu1 %v2689_v21 }
 0x4c7   : > { %6814 = vmatpush3.msra.mxu1 %v2689_v21 }
 0x4c8   : > { %6815 = vmatprep.subr.mxu1 %v2688_v17 }
 0x4c9   : > { %6816 = vmatpush3.msra.mxu1 %v2688_v17 }
 0x533   : > { %v6581_v40 = vpop.f32.mrf.mxu0  ;;  %v6661_v43 = vpop.f32.mrf.mxu1 }
 0x534   : > { %v8556_v39 = vadd.f32 %v6581_v40, %v8553_v10 }
 0x535   : > { %v2122_v51 = vpop.f32.mrf.mxu0  ;;  %v2351_v25 = vpop.f32.mrf.mxu1 }
 0x536   : > { %v2544_v58 = vmul.f32 1.442695, %v8556_v39  ;;  %v8560_v4 = vadd.f32 %v8553_v10, %v2122_v51 }
 0x537   : > { %v6584_v34 = vpop.f32.mrf.mxu0  ;;  %v6664_v48 = vpop.f32.mrf.mxu1 }
 0x538   : > { %v2542_v28 = vmul.f32 1.442695, %v8560_v4  ;;  %v8564_v44 = vadd.f32 %v6584_v34, %v8553_v10  ;;  %7486 = vpow2.f32 %v2544_v58 }
 0x539   : > { %v2132_v54 = vpop.f32.mrf.mxu0  ;;  %v2361_v3 = vpop.f32.mrf.mxu1 }
 0x53a   : > { %7488 = vpow2.f32 %v2542_v28  ;;  %v2548_v8 = vmul.f32 1.442695, %v8564_v44  ;;  %v8568_v38 = vadd.f32 %v8553_v10, %v2132_v54  ;;  %v8580_v54 = vld [vmem:[#allocation7 + $0x7] ss:$0 sm:$0xff] }
 0x53b   : > { %v6587_v21 = vpop.f32.mrf.mxu0  ;;  %v6667_v17 = vpop.f32.mrf.mxu1  ;;  %v2357_v35 = vadd.f32 %v6661_v43, %v8580_v54 }
 0x53c   : > { %9847 = vst [vmem:[#allocation41_spill] sm:$0xff] %v8568_v38  ;;  %v2546_v40 = vmul.f32 1.442695, %v8568_v38  ;;  %v8572_v51 = vadd.f32 %v6587_v21, %v8553_v10  ;;  %7490 = vpow2.f32 %v2548_v8 }
 0x53d   : > { %v2142_v20 = vpop.f32.mrf.mxu0  ;;  %v2371_v34 = vpop.f32.mrf.mxu1  ;;  %v2511_v22 = vadd.f32 %v2357_v35, %v8198_v61 }
 0x53e   : > { %9848 = vst [vmem:[#allocation42_spill] sm:$0xff] %v8572_v51  ;;  %7492 = vpow2.f32 %v2546_v40  ;;  %v2552_v58 = vmul.f32 1.442695, %v8572_v51  ;;  %v8576_v28 = vadd.f32 %v8553_v10, %v2142_v20  ;;  %v2352_v40 = vadd.f32 %v8580_v54, %v2351_v25 }
 0x53f   : > { %v6590_v14 = vpop.f32.mrf.mxu0  ;;  %v8578_v63 = vpop.f32.mrf.mxu1 }
 0x540   : > { %9849 = vst [vmem:[#allocation43_spill] sm:$0xff] %v8576_v28  ;;  %v2550_v56 = vmul.f32 1.442695, %v8576_v28  ;;  %v8584_v46 = vadd.f32 %v6590_v14, %v8553_v10  ;;  %7494 = vpow2.f32 %v2552_v58  ;;  %v2510_v25 = vadd.f32 %v2352_v40, %v8196_v59 }
 0x541   : > { %v2152_v8 = vpop.f32.mrf.mxu0  ;;  %v2381_v21 = vpop.f32.mrf.mxu1 }
 0x542   : > { %9850 = vst [vmem:[#allocation44_spill] sm:$0xff] %v8584_v46  ;;  %7496 = vpow2.f32 %v2550_v56  ;;  %v2556_v41 = vmul.f32 1.442695, %v8584_v46  ;;  %v8589_v20 = vadd.f32 %v8553_v10, %v2152_v8  ;;  %v2362_v8 = vadd.f32 %v8580_v54, %v2361_v3 }
 0x543   : > { %v6593_v30 = vpop.f32.mrf.mxu0  ;;  %v8592_v26 = vpop.f32.mrf.mxu1 }
 0x544   : > { %9851 = vst [vmem:[#allocation45_spill] sm:$0xff] %v8589_v20  ;;  %v2554_v28 = vmul.f32 1.442695, %v8589_v20  ;;  %v8596_v14 = vadd.f32 %v6593_v30, %v8553_v10  ;;  %7498 = vpow2.f32 %v2556_v41  ;;  %v2367_v20 = vadd.f32 %v6664_v48, %v8580_v54 }
 0x545   : > { %v2162_v58 = vpop.f32.mrf.mxu0  ;;  %v8598_v51 = vpop.f32.mrf.mxu1  ;;  %v2512_v61 = vadd.f32 %v2362_v8, %v8218_v19  ;;  %v2372_v48 = vadd.f32 %v8580_v54, %v2371_v34 }
 0x546   : > { %9852 = vst [vmem:[#allocation46_spill] sm:$0xff] %v8596_v14  ;;  %v7487_v56 = vpop.eup %7486  ;;  %7500 = vpow2.f32 %v2554_v28  ;;  %v2560_v43 = vmul.f32 1.442695, %v8596_v14  ;;  %v8606_v30 = vadd.f32 %v8553_v10, %v2162_v58 }
 0x547   : > { %v7489_v46 = vpop.eup %7488  ;;  %v6596_v41 = vpop.f32.mrf.mxu0  ;;  %v8615_v3 = vmul.f32 %v7487_v56, %v2511_v22  ;;  %v2377_v22 = vadd.f32 %v6667_v17, %v8580_v54 }
 0x548   : > { %9853 = vst [vmem:[#allocation47_spill] sm:$0xff] %v8606_v30  ;;  %v8608_v38 = vpop.f32.mrf.mxu1  ;;  %v8611_v18 = vadd.f32 %v6596_v41, %v8553_v10  ;;  %v8613_v59 = vmul.f32 %v7489_v46, %v2510_v25  ;;  %v2558_v28 = vmul.f32 1.442695, %v8606_v30  ;;  %7502 = vpow2.f32 %v2560_v43 }
 0x549   : > { %v2172_v40 = vpop.f32.mrf.mxu0  ;;  %v7491_v35 = vpop.eup %7490  ;;  %v2513_v46 = vadd.f32 %v2367_v20, %v8224_v24 }
 0x54a   : > { %9854 = vst [vmem:[#allocation48_spill] sm:$0xff] %v8611_v18  ;;  %v8618_v14 = vpop.f32.mrf.mxu1  ;;  %v2564_v58 = vmul.f32 1.442695, %v8611_v18  ;;  %6739 = vmatprep.mubr.f32.mxu0 %v8613_v59  ;;  %7504 = vpow2.f32 %v2558_v28  ;;  %v8627_v56 = vadd.f32 %v8553_v10, %v2172_v40  ;;  %v2514_v28 = vadd.f32 %v2372_v48, %v8241_v47 }
 0x54b   : > { %v7493_v41 = vpop.eup %7492  ;;  %v6599_v25 = vpop.f32.mrf.mxu0  ;;  %6740 = vmatmul.mubr.f32.vlgmr.msra.gmra.mxu0 %v8615_v3  ;;  %v8637_v8 = vmul.f32 %v7491_v35, %v2513_v46  ;;  %v2382_v40 = vadd.f32 %v8580_v54, %v2381_v21  ;;  %v2387_v35 = vadd.f32 %v8578_v63, %v8580_v54 }
 0x54c   : > { %9855 = vst [vmem:[#allocation49_spill] sm:$0xff] %v8627_v56  ;;  %v8629_v30 = vpop.f32.mrf.mxu1  ;;  %v8633_v19 = vadd.f32 %v6599_v25, %v8553_v10  ;;  %v8635_v34 = vmul.f32 %v7493_v41, %v2512_v61  ;;  %v2562_v24 = vmul.f32 1.442695, %v8627_v56  ;;  %7506 = vpow2.f32 %v2564_v58 }
 0x54d   : > { %v2182_v20 = vpop.f32.mrf.mxu0  ;;  %v7495_v43 = vpop.eup %7494  ;;  %v2515_v61 = vadd.f32 %v2377_v22, %v8247_v50 }
 0x54e   : > { %9856 = vst [vmem:[#allocation50_spill] sm:$0xff] %v8633_v19  ;;  %v8640_v17 = vpop.f32.mrf.mxu1  ;;  %v2568_v18 = vmul.f32 1.442695, %v8633_v19  ;;  %6742 = vmatprep.mubr.f32.mxu0 %v8635_v34  ;;  %7508 = vpow2.f32 %v2562_v24  ;;  %v8650_v41 = vadd.f32 %v8553_v10, %v2182_v20  ;;  %v2516_v24 = vadd.f32 %v2382_v40, %v8265_v6 }
 0x54f   : > { %v7497_v25 = vpop.eup %7496  ;;  %v6602_v46 = vpop.f32.mrf.mxu0  ;;  %6743 = vmatmul.mubr.f32.gmra.mxu0 %v8637_v8  ;;  %v8660_v48 = vmul.f32 %v7495_v43, %v2515_v61  ;;  %v2392_v43 = vadd.f32 %v8580_v54, %v8598_v51 }
 0x550   : > { %v8652_v56 = vpop.f32.mrf.mxu1  ;;  %v8656_v47 = vadd.f32 %v6602_v46, %v8553_v10  ;;  %v8658_v21 = vmul.f32 %v7497_v25, %v2514_v28  ;;  %v2566_v50 = vmul.f32 1.442695, %v8650_v41  ;;  %7510 = vpow2.f32 %v2568_v18 }
 0x551   : > { %v2192_v58 = vpop.f32.mrf.mxu0  ;;  %v7499_v22 = vpop.eup %7498  ;;  %v2517_v46 = vadd.f32 %v2387_v35, %v8271_v11  ;;  %v2397_v18 = vadd.f32 %v8592_v26, %v8580_v54  ;;  %v2518_v26 = vadd.f32 %v2392_v43, %v8289_v42 }
 0x552   : > { %9857 = vst [vmem:[#allocation51_spill] sm:$0xff] %v8656_v47  ;;  %v8663_v63 = vpop.f32.mrf.mxu1  ;;  %v2572_v20 = vmul.f32 1.442695, %v8656_v47  ;;  %6745 = vmatprep.mubr.f32.mxu0 %v8658_v21  ;;  %7512 = vpow2.f32 %v2566_v50  ;;  %v8672_v28 = vadd.f32 %v8553_v10, %v2192_v58 }
 0x553   : > { %v7501_v19 = vpop.eup %7500  ;;  %v6605_v25 = vpop.f32.mrf.mxu0  ;;  %6746 = vmatmul.mubr.f32.gmra.mxu0 %v8660_v48  ;;  %v8684_v11 = vmul.f32 %v7499_v22, %v2517_v46  ;;  %v2519_v46 = vadd.f32 %v2397_v18, %v8295_v49 }
 0x554   : > { %9858 = vst [vmem:[#allocation52_spill] sm:$0xff] %v8672_v28  ;;  %v8674_v61 = vpop.f32.mrf.mxu1  ;;  %v8680_v6 = vadd.f32 %v6605_v25, %v8553_v10  ;;  %v8682_v40 = vmul.f32 %v7501_v19, %v2516_v24  ;;  %v2570_v51 = vmul.f32 1.442695, %v8672_v28  ;;  %7514 = vpow2.f32 %v2572_v20 }
 0x555   : > { %9861 = vst [vmem:[#allocation55_spill] sm:$0xff] %v8684_v11  ;;  %v2202_v35 = vpop.f32.mrf.mxu0  ;;  %v7503_v47 = vpop.eup %7502  ;;  %v2402_v25 = vadd.f32 %v8580_v54, %v8618_v14 }
 0x556   : > { %9859 = vst [vmem:[#allocation53_spill] sm:$0xff] %v8680_v6  ;;  %9860 = vst [vmem:[#allocation54_spill] sm:$0xff] %v8682_v40  ;;  %v8687_v50 = vpop.f32.mrf.mxu1  ;;  %v2576_v58 = vmul.f32 1.442695, %v8680_v6  ;;  %6748 = vmatprep.mubr.f32.mxu0 %v8682_v40  ;;  %7516 = vpow2.f32 %v2570_v51  ;;  %v8695_v19 = vadd.f32 %v8553_v10, %v2202_v35  ;;  %v2407_v6 = vadd.f32 %v8608_v38, %v8580_v54 }
 0x557   : > { %v6608_v22 = vpop.f32.mrf.mxu0  ;;  %6749 = vmatmul.mubr.f32.gmra.mxu0 %v8684_v11  ;;  %v7505_v20 = vpop.eup %7504  ;;  %v8711_v40 = vmul.f32 %v7503_v47, %v2519_v46  ;;  %v2520_v49 = vadd.f32 %v2402_v25, %v8313_v12  ;;  %v2412_v38 = vadd.f32 %v8580_v54, %v8640_v17 }
 0x558   : > { %v8697_v24 = vpop.f32.mrf.mxu1  ;;  %v8704_v42 = vadd.f32 %v6608_v22, %v8553_v10  ;;  %v2574_v14 = vmul.f32 1.442695, %v8695_v19  ;;  %v8709_v35 = vmul.f32 %v7505_v20, %v2518_v26  ;;  %7518 = vpow2.f32 %v2576_v58 }
 0x559   : > { %v2212_v43 = vpop.f32.mrf.mxu0  ;;  %v7507_v28 = vpop.eup %7506  ;;  %v2521_v58 = vadd.f32 %v2407_v6, %v8319_v23  ;;  %v2417_v20 = vadd.f32 %v8629_v30, %v8580_v54  ;;  %v2522_v30 = vadd.f32 %v2412_v38, %v8337_v55 }
 0x55a   : > { %9862 = vst [vmem:[#allocation56_spill] sm:$0xff] %v8704_v42  ;;  %v8707_v51 = vpop.f32.mrf.mxu1  ;;  %v2580_v11 = vmul.f32 1.442695, %v8704_v42  ;;  %7520 = vpow2.f32 %v2574_v14  ;;  %v8718_v18 = vadd.f32 %v8553_v10, %v2212_v43  ;;  %6751 = vmatprep.mubr.f32.mxu0 %v8709_v35 }
 0x55b   : > { %v6611_v22 = vpop.f32.mrf.mxu0  ;;  %v7509_v47 = vpop.eup %7508  ;;  %6752 = vmatmul.mubr.f32.gmra.mxu0 %v8711_v40  ;;  %v8735_v43 = vmul.f32 %v7507_v28, %v2521_v58 }
 0x55c   : > { %9863 = vst [vmem:[#allocation57_spill] sm:$0xff] %v8718_v18  ;;  %v8721_v26 = vpop.f32.mrf.mxu1  ;;  %v8727_v12 = vadd.f32 %v6611_v22, %v8553_v10  ;;  %v2578_v17 = vmul.f32 1.442695, %v8718_v18  ;;  %v8733_v14 = vmul.f32 %v7509_v47, %v2520_v49  ;;  %7522 = vpow2.f32 %v2580_v11 }
 0x55d   : > { %v2222_v25 = vpop.f32.mrf.mxu0  ;;  %v7511_v6 = vpop.eup %7510  ;;  %v2422_v22 = vadd.f32 %v8580_v54, %v8663_v63  ;;  %v2523_v11 = vadd.f32 %v2417_v20, %v8343_v1  ;;  %v2427_v47 = vadd.f32 %v8652_v56, %v8580_v54 }
 0x55e   : > { %9864 = vst [vmem:[#allocation58_spill] sm:$0xff] %v8727_v12  ;;  %v8731_v46 = vpop.f32.mrf.mxu1  ;;  %v2584_v23 = vmul.f32 1.442695, %v8727_v12  ;;  %7524 = vpow2.f32 %v2578_v17  ;;  %v8742_v42 = vadd.f32 %v8553_v10, %v2222_v25  ;;  %6754 = vmatprep.mubr.f32.mxu0 %v8733_v14 }
 0x55f   : > { %v6614_v18 = vpop.f32.mrf.mxu0  ;;  %v7513_v28 = vpop.eup %7512  ;;  %6755 = vmatmul.mubr.f32.gmra.mxu0 %v8735_v43  ;;  %v8759_v25 = vmul.f32 %v7511_v6, %v2523_v11  ;;  %v2524_v56 = vadd.f32 %v2422_v22, %v8361_v45 }
 0x560   : > { %9865 = vst [vmem:[#allocation59_spill] sm:$0xff] %v8742_v42  ;;  %v8745_v49 = vpop.f32.mrf.mxu1  ;;  %v8751_v55 = vadd.f32 %v6614_v18, %v8553_v10  ;;  %v2582_v63 = vmul.f32 1.442695, %v8742_v42  ;;  %v8757_v17 = vmul.f32 %v7513_v28, %v2522_v30  ;;  %7526 = vpow2.f32 %v2584_v23 }
 0x561   : > { %v2232_v38 = vpop.f32.mrf.mxu0  ;;  %v7515_v20 = vpop.eup %7514  ;;  %v2432_v18 = vadd.f32 %v8580_v54, %v8687_v50  ;;  %v2525_v23 = vadd.f32 %v2427_v47, %v8367_v32  ;;  %v2437_v28 = vadd.f32 %v8674_v61, %v8580_v54 }
 0x562   : > { %9866 = vst [vmem:[#allocation60_spill] sm:$0xff] %v8751_v55  ;;  %v8755_v58 = vpop.f32.mrf.mxu1  ;;  %v2588_v1 = vmul.f32 1.442695, %v8751_v55  ;;  %7528 = vpow2.f32 %v2582_v63  ;;  %v8766_v12 = vadd.f32 %v8553_v10, %v2232_v38  ;;  %6757 = vmatprep.mubr.f32.mxu0 %v8757_v17 }
 0x563   : > { %v6617_v42 = vpop.f32.mrf.mxu0  ;;  %v7517_v6 = vpop.eup %7516  ;;  %6758 = vmatmul.mubr.f32.gmra.mxu0 %v8759_v25  ;;  %v8783_v38 = vmul.f32 %v7515_v20, %v2525_v23  ;;  %v2526_v61 = vadd.f32 %v2432_v18, %v8383_v36  ;;  %v2527_v20 = vadd.f32 %v2437_v28, %v8389_v27 }
 0x564   : > { %9867 = vst [vmem:[#allocation61_spill] sm:$0xff] %v8766_v12  ;;  %v8769_v30 = vpop.f32.mrf.mxu1  ;;  %v8775_v45 = vadd.f32 %v6617_v42, %v8553_v10  ;;  %v2586_v50 = vmul.f32 1.442695, %v8766_v12  ;;  %v8781_v63 = vmul.f32 %v7517_v6, %v2524_v56  ;;  %7530 = vpow2.f32 %v2588_v1 }
 0x565   : > { %v2242_v22 = vpop.f32.mrf.mxu0  ;;  %v7519_v47 = vpop.eup %7518  ;;  %v2442_v42 = vadd.f32 %v8580_v54, %v8707_v51  ;;  %v2447_v1 = vadd.f32 %v8697_v24, %v8580_v54 }
 0x566   : > { %v8779_v11 = vpop.f32.mrf.mxu1  ;;  %v2592_v32 = vmul.f32 1.442695, %v8775_v45  ;;  %7532 = vpow2.f32 %v2586_v50  ;;  %v8790_v55 = vadd.f32 %v8553_v10, %v2242_v22  ;;  %6760 = vmatprep.mubr.f32.mxu0 %v8781_v63  ;;  %v8805_v50 = vmul.f32 %v7519_v47, %v2527_v20 }
 0x567   : > { %v6620_v12 = vpop.f32.mrf.mxu0  ;;  %v7521_v56 = vpop.eup %7520  ;;  %6761 = vmatmul.mubr.f32.gmra.mxu0 %v8783_v38  ;;  %v2528_v24 = vadd.f32 %v2442_v42, %v8405_v0  ;;  %v2529_v47 = vadd.f32 %v2447_v1, %v8411_v53 }
 0x568   : > { %9868 = vst [vmem:[#allocation62_spill] sm:$0xff] %v8790_v55  ;;  %v8797_v6 = vadd.f32 %v6620_v12, %v8553_v10  ;;  %v8799_v36 = vpop.f32.mrf.mxu1  ;;  %v2590_v51 = vmul.f32 1.442695, %v8790_v55  ;;  %v8803_v23 = vmul.f32 %v7521_v56, %v2526_v61  ;;  %7534 = vpow2.f32 %v2592_v32 }
 0x569   : > { %v2252_v18 = vpop.f32.mrf.mxu0  ;;  %v7523_v28 = vpop.eup %7522  ;;  %v2452_v12 = vadd.f32 %v8580_v54, %v8731_v46  ;;  %v2457_v32 = vadd.f32 %v8721_v26, %v8580_v54  ;;  %v2462_v26 = vadd.f32 %v8580_v54, %v8755_v58 }
 0x56a   : > { %v2596_v27 = vmul.f32 1.442695, %v8797_v6  ;;  %7536 = vpow2.f32 %v2590_v51  ;;  %v8812_v22 = vadd.f32 %v8553_v10, %v2252_v18  ;;  %6763 = vmatprep.mubr.f32.mxu0 %v8803_v23  ;;  %v2481_v56 = vpop.f32.mrf.mxu1  ;;  %v8825_v51 = vmul.f32 %v7523_v28, %v2529_v47 }
 0x56b   : > { %v6623_v55 = vpop.f32.mrf.mxu0  ;;  %v7525_v61 = vpop.eup %7524  ;;  %6764 = vmatmul.mubr.f32.gmra.mxu0 %v8805_v50  ;;  %v2530_v1 = vadd.f32 %v2452_v12, %v8426_v57  ;;  %v2531_v28 = vadd.f32 %v2457_v32, %v8432_v2  ;;  %v2532_v32 = vadd.f32 %v2462_v26, %v8440_v52 }
 0x56c   : > { %9869 = vst [vmem:[#allocation63_spill] sm:$0xff] %v8812_v22  ;;  %v8819_v20 = vadd.f32 %v6623_v55, %v8553_v10  ;;  %v2594_v0 = vmul.f32 1.442695, %v8812_v22  ;;  %v8823_v42 = vmul.f32 %v7525_v61, %v2528_v24  ;;  %7538 = vpow2.f32 %v2596_v27  ;;  %v6703_v61 = vpop.f32.mrf.mxu1 }
 0x56d   : > { %v2262_v46 = vpop.f32.mrf.mxu0  ;;  %v7527_v53 = vpop.eup %7526  ;;  %v2467_v27 = vadd.f32 %v8745_v49, %v8580_v54  ;;  %v2472_v49 = vadd.f32 %v8580_v54, %v8779_v11 }
 0x56e   : > { %v2600_v18 = vmul.f32 1.442695, %v8819_v20  ;;  %7540 = vpow2.f32 %v2594_v0  ;;  %v8832_v55 = vadd.f32 %v8553_v10, %v2262_v46  ;;  %6766 = vmatprep.mubr.f32.mxu0 %v8823_v42  ;;  %v8845_v0 = vmul.f32 %v7527_v53, %v2531_v28  ;;  %v2491_v53 = vpop.f32.mrf.mxu1 }
 0x56f   : > { %v6626_v22 = vpop.f32.mrf.mxu0  ;;  %v7529_v24 = vpop.eup %7528  ;;  %6767 = vmatmul.mubr.f32.gmra.mxu0 %v8825_v51  ;;  %v2482_v28 = vadd.f32 %v8580_v54, %v2481_v56  ;;  %v2492_v56 = vadd.f32 %v8580_v54, %v2491_v53 }
 0x570   : > { %9870 = vst [vmem:[#allocation64_spill] sm:$0xff] %v8832_v55  ;;  %v8839_v47 = vadd.f32 %v6626_v22, %v8553_v10  ;;  %v2598_v57 = vmul.f32 1.442695, %v8832_v55  ;;  %v8843_v12 = vmul.f32 %v7529_v24, %v2530_v1  ;;  %7542 = vpow2.f32 %v2600_v18 }
 0x571   : > { %v2272_v58 = vpop.f32.mrf.mxu0  ;;  %v7531_v2 = vpop.eup %7530  ;;  %v2533_v1 = vadd.f32 %v2467_v27, %v8445_v7  ;;  %v2477_v18 = vadd.f32 %v8769_v30, %v8580_v54  ;;  %v2534_v24 = vadd.f32 %v2472_v49, %v8451_v37  ;;  %v2487_v27 = vadd.f32 %v8799_v36, %v8580_v54 }
 0x572   : > { %v2604_v46 = vmul.f32 1.442695, %v8839_v47  ;;  %7544 = vpow2.f32 %v2598_v57  ;;  %v8852_v22 = vadd.f32 %v8553_v10, %v2272_v58  ;;  %6769 = vmatprep.mubr.f32.mxu0 %v8843_v12  ;;  %v6706_v57 = vpop.f32.mrf.mxu1  ;;  %v2536_v37 = vadd.f32 %v2482_v28, %v8461_v29 }
 0x573   : > { %v7533_v55 = vpop.eup %7532  ;;  %6770 = vmatmul.mubr.f32.gmra.mxu0 %v8845_v0  ;;  %v8862_v11 = vmul.f32 %v7531_v2, %v2533_v1  ;;  %v2535_v30 = vadd.f32 %v2477_v18, %v8456_v62  ;;  %v2537_v62 = vadd.f32 %v2487_v27, %v8466_v16  ;;  %v2507_v16 = vadd.f32 %v6706_v57, %v8580_v54  ;;  %v2718_v57 = vld [vmem:[#allocation5 + $0x5f0] sm:$0xff] }
 0x574   : > { %v2602_v52 = vmul.f32 1.442695, %v8852_v22  ;;  %v8860_v26 = vmul.f32 %v7533_v55, %v2532_v32  ;;  %7546 = vpow2.f32 %v2604_v46  ;;  %v2497_v32 = vadd.f32 %v6703_v61, %v8580_v54  ;;  %v2501_v36 = vpop.f32.mrf.mxu1  ;;  %6867 = vmatprep.subr.mxu0 %v2718_v57 }
 0x575   : > { %v7535_v10 = vpop.eup %7534  ;;  %v2502_v29 = vadd.f32 %v8580_v54, %v2501_v36  ;;  %v2687_v54 = vld [vmem:[#allocation5 + $0x408] sm:$0xff]  ;;  %6868 = vmatpush3.msra.mxu0 %v2718_v57  ;;  %v2710_v36 = vld [vmem:[#allocation5 + $0x4f0] sm:$0xff] }
 0x576   : > { %7548 = vpow2.f32 %v2602_v52  ;;  %6772 = vmatprep.mubr.f32.mxu0 %v8860_v26  ;;  %v8873_v58 = vmul.f32 %v7535_v10, %v2535_v30  ;;  %v2538_v52 = vadd.f32 %v2492_v56, %v8471_v15  ;;  %v2539_v10 = vadd.f32 %v2497_v32, %v8475_v60  ;;  %6817 = vmatprep.subr.mxu1 %v2687_v54  ;;  %v2714_v56 = vld [vmem:[#allocation5 + $0x570] sm:$0xff] }
 0x577   : > { %v7537_v7 = vpop.eup %7536  ;;  %6773 = vmatmul.mubr.f32.gmra.mxu0 %v8862_v11  ;;  %v2541_v30 = vadd.f32 %v2507_v16, %v8482_v31  ;;  %6818 = vmatpush3.msra.mxu1 %v2687_v54  ;;  %v2715_v31 = vld [vmem:[#allocation5 + $0x590] sm:$0xff] }
 0x578   : > { %v8871_v55 = vmul.f32 %v7537_v7, %v2534_v24  ;;  %v2540_v7 = vadd.f32 %v2502_v29, %v8479_v33  ;;  %v2717_v33 = vld [vmem:[#allocation5 + $0x5d0] sm:$0xff] }
 0x579   : > { %v7539_v46 = vpop.eup %7538  ;;  %6869 = vmatprep.subr.mxu0 %v2717_v33  ;;  %v2711_v32 = vld [vmem:[#allocation5 + $0x510] sm:$0xff] }
 0x57a   : > { %6775 = vmatprep.mubr.f32.mxu0 %v8871_v55  ;;  %v8883_v1 = vmul.f32 %v7539_v46, %v2537_v62  ;;  %v2734_v46 = vld [vmem:[#allocation5 + $0x5f8] sm:$0xff]  ;;  %6870 = vmatpush3.msra.mxu0 %v2717_v33  ;;  %v2712_v62 = vld [vmem:[#allocation5 + $0x530] sm:$0xff] }
 0x57b   : > { %v7541_v2 = vpop.eup %7540  ;;  %6776 = vmatmul.mubr.f32.gmra.mxu0 %v8873_v58  ;;  %6947 = vmatprep.subr.mxu1 %v2734_v46  ;;  %v2707_v29 = vld [vmem:[#allocation5 + $0x490] sm:$0xff] }
 0x57c   : > { %v8881_v49 = vmul.f32 %v7541_v2, %v2536_v37  ;;  %9871 = vst [vmem:[#allocation65_spill] sm:$0xff] %v8883_v1  ;;  %v2716_v37 = vld [vmem:[#allocation5 + $0x5b0] sm:$0xff] }
 0x57d   : > { %v7543_v18 = vpop.eup %7542  ;;  %6871 = vmatprep.subr.mxu0 %v2716_v37  ;;  %v2713_v2 = vld [vmem:[#allocation5 + $0x550] sm:$0xff] }
 0x57e   : > { %6778 = vmatprep.mubr.f32.mxu0 %v8881_v49  ;;  %v8893_v24 = vmul.f32 %v7543_v18, %v2539_v10  ;;  %6872 = vmatpush3.msra.mxu0 %v2716_v37  ;;  %v2709_v18 = vld [vmem:[#allocation5 + $0x4d0] sm:$0xff] }
 0x57f   : > { %v7545_v53 = vpop.eup %7544  ;;  %6779 = vmatmul.mubr.f32.gmra.mxu0 %v8883_v1  ;;  %6873 = vmatprep.subr.mxu0 %v2715_v31  ;;  %v2705_v10 = vld [vmem:[#allocation5 + $0x450] sm:$0xff] }
 0x580   : > { %v8891_v61 = vmul.f32 %v7545_v53, %v2538_v52  ;;  %9873 = vst [vmem:[#allocation67_spill] sm:$0xff] %v8893_v24  ;;  %6874 = vmatpush3.msra.mxu0 %v2715_v31  ;;  %v2708_v52 = vld [vmem:[#allocation5 + $0x4b0] sm:$0xff] }
 0x581   : > { %v7547_v28 = vpop.eup %7546  ;;  %6875 = vmatprep.subr.mxu0 %v2714_v56  ;;  %v2706_v53 = vld [vmem:[#allocation5 + $0x470] sm:$0xff] }
 0x582   : > { %9872 = vst [vmem:[#allocation66_spill] sm:$0xff] %v8891_v61  ;;  %6781 = vmatprep.mubr.f32.mxu0 %v8891_v61  ;;  %v8901_v60 = vmul.f32 %v7547_v28, %v2541_v30  ;;  %6876 = vmatpush3.msra.mxu0 %v2714_v56  ;;  %v2704_v16 = vld [vmem:[#allocation5 + $0x430] sm:$0xff]  ;;  %v8905_v28 = vld [vmem:[#allocation7 + $0x8] ss:$0 sm:$0xff] }
 0x583   : > { %v7549_v15 = vpop.eup %7548  ;;  %6782 = vmatmul.mubr.f32.gmra.mxu0 %v8893_v24  ;;  %6877 = vmatprep.subr.mxu0 %v2713_v2 }
 0x584   : > { %v8899_v27 = vmul.f32 %v7549_v15, %v2540_v7  ;;  %9875 = vst [vmem:[#allocation69_spill] sm:$0xff] %v8901_v60  ;;  %6878 = vmatpush3.msra.mxu0 %v2713_v2 }
 0x585   : > { %6879 = vmatprep.subr.mxu0 %v2712_v62 }
 0x586   : > { %9874 = vst [vmem:[#allocation68_spill] sm:$0xff] %v8899_v27  ;;  %6784 = vmatprep.mubr.f32.mxu0 %v8899_v27  ;;  %6880 = vmatpush3.msra.mxu0 %v2712_v62  ;;  %v2733_v62 = vld [vmem:[#allocation5 + $0x5d8] sm:$0xff] }
 0x587   : > { %6785 = vmatmul.mubr.f32.gmra.mxu0 %v8901_v60  ;;  %6881 = vmatprep.subr.mxu0 %v2711_v32  ;;  %v9897_v60 = vld [vmem:[#allocation47_spill] sm:$0xff] }
 0x588   : > { %6882 = vmatpush3.msra.mxu0 %v2711_v32 }
 0x589   : > { %6883 = vmatprep.subr.mxu0 %v2710_v36 }
 0x58a   : > { %6884 = vmatpush3.msra.mxu0 %v2710_v36 }
 0x58b   : > { %6885 = vmatprep.subr.mxu0 %v2709_v18 }
 0x58c   : > { %6886 = vmatpush3.msra.mxu0 %v2709_v18  ;;  %v2732_v18 = vld [vmem:[#allocation5 + $0x5b8] sm:$0xff] }
 0x58d   : > { %6887 = vmatprep.subr.mxu0 %v2708_v52 }
 0x58e   : > { %6888 = vmatpush3.msra.mxu0 %v2708_v52 }
 0x58f   : > { %6889 = vmatprep.subr.mxu0 %v2707_v29 }
 0x590   : > { %6890 = vmatpush3.msra.mxu0 %v2707_v29 }
 0x591   : > { %6891 = vmatprep.subr.mxu0 %v2706_v53 }
 0x592   : > { %6892 = vmatpush3.msra.mxu0 %v2706_v53 }
 0x593   : > { %6893 = vmatprep.subr.mxu0 %v2705_v10 }
 0x594   : > { %6894 = vmatpush3.msra.mxu0 %v2705_v10 }
 0x595   : > { %6895 = vmatprep.subr.mxu0 %v2704_v16 }
 0x596   : > { %6896 = vmatpush3.msra.mxu0 %v2704_v16  ;;  %v2731_v16 = vld [vmem:[#allocation5 + $0x598] sm:$0xff] }
 0x60b   : > { %v6741_v7 = vpop.f32.mrf.mxu0 }
 0x60c   : > { %v2816_v15 = vadd.f32 %v6741_v7, %v8905_v28 }
 0x60d   : > { %v2810_v30 = vpop.f32.mrf.mxu0 }
 0x60e   : > { %v2811_v54 = vadd.f32 %v8905_v28, %v2810_v30  ;;  %v2970_v37 = vmax.f32 %v2816_v15, 0.0  ;;  %v2730_v30 = vld [vmem:[#allocation5 + $0x578] sm:$0xff] }
 0x60f   : > { %v6744_v57 = vpop.f32.mrf.mxu0 }
 0x610   : > { %v2969_v33 = vmax.f32 %v2811_v54, 0.0  ;;  %v2826_v31 = vadd.f32 %v6744_v57, %v8905_v28 }
 0x611   : > { %v2820_v56 = vpop.f32.mrf.mxu0 }
 0x612   : > { %v2821_v2 = vadd.f32 %v8905_v28, %v2820_v56  ;;  %6819 = vmatprep.mubr.f32.mxu1 %v2969_v33  ;;  %v2972_v52 = vmax.f32 %v2826_v31, 0.0 }
 0x613   : > { %v6747_v32 = vpop.f32.mrf.mxu0  ;;  %6820 = vmatmul.mubr.f32.vlgmr.msra.gmra.mxu1 %v2970_v37  ;;  %v2729_v37 = vld [vmem:[#allocation5 + $0x558] sm:$0xff] }
 0x614   : > { %v2971_v36 = vmax.f32 %v2821_v2, 0.0  ;;  %6948 = vmatpush3.msra.mxu1 %v2734_v46  ;;  %v2836_v29 = vadd.f32 %v6747_v32, %v8905_v28  ;;  %v2728_v2 = vld [vmem:[#allocation5 + $0x538] sm:$0xff] }
 0x615   : > { %v2830_v53 = vpop.f32.mrf.mxu0  ;;  %6949 = vmatprep.subr.mxu1 %v2733_v62 }
 0x616   : > { %v2831_v10 = vadd.f32 %v8905_v28, %v2830_v53  ;;  %6822 = vmatprep.mubr.f32.mxu1 %v2971_v36  ;;  %6950 = vmatpush3.msra.mxu1 %v2733_v62  ;;  %v2974_v54 = vmax.f32 %v2836_v29, 0.0  ;;  %v2726_v53 = vld [vmem:[#allocation5 + $0x4f8] sm:$0xff] }
 0x617   : > { %v6750_v7 = vpop.f32.mrf.mxu0  ;;  %6823 = vmatmul.mubr.f32.gmra.mxu1 %v2972_v52  ;;  %6951 = vmatprep.subr.mxu1 %v2732_v18 }
 0x618   : > { %v2973_v15 = vmax.f32 %v2831_v10, 0.0  ;;  %6952 = vmatpush3.msra.mxu1 %v2732_v18  ;;  %v2846_v46 = vadd.f32 %v6750_v7, %v8905_v28  ;;  %v2727_v18 = vld [vmem:[#allocation5 + $0x518] sm:$0xff] }
 0x619   : > { %v2840_v57 = vpop.f32.mrf.mxu0  ;;  %6953 = vmatprep.subr.mxu1 %v2731_v16 }
 0x61a   : > { %v2841_v33 = vadd.f32 %v8905_v28, %v2840_v57  ;;  %6825 = vmatprep.mubr.f32.mxu1 %v2973_v15  ;;  %6954 = vmatpush3.msra.mxu1 %v2731_v16  ;;  %v2976_v62 = vmax.f32 %v2846_v46, 0.0 }
 0x61b   : > { %6826 = vmatmul.mubr.f32.gmra.mxu1 %v2974_v54  ;;  %6955 = vmatprep.subr.mxu1 %v2730_v30  ;;  %v6753_v56 = vpop.f32.mrf.mxu0  ;;  %v2725_v54 = vld [vmem:[#allocation5 + $0x4d8] sm:$0xff] }
 0x61c   : > { %v2975_v31 = vmax.f32 %v2841_v33, 0.0  ;;  %6956 = vmatpush3.msra.mxu1 %v2730_v30  ;;  %v2856_v32 = vadd.f32 %v6753_v56, %v8905_v28  ;;  %v2724_v33 = vld [vmem:[#allocation5 + $0x4b8] sm:$0xff] }
 0x61d   : > { %6957 = vmatprep.subr.mxu1 %v2729_v37  ;;  %v2850_v36 = vpop.f32.mrf.mxu0 }
 0x61e   : > { %6828 = vmatprep.mubr.f32.mxu1 %v2975_v31  ;;  %6958 = vmatpush3.msra.mxu1 %v2729_v37  ;;  %v2851_v52 = vadd.f32 %v8905_v28, %v2850_v36  ;;  %v2978_v16 = vmax.f32 %v2856_v32, 0.0 }
 0x61f   : > { %6829 = vmatmul.mubr.f32.gmra.mxu1 %v2976_v62  ;;  %6959 = vmatprep.subr.mxu1 %v2728_v2  ;;  %v6756_v29 = vpop.f32.mrf.mxu0  ;;  %v2723_v62 = vld [vmem:[#allocation5 + $0x498] sm:$0xff] }
 0x620   : > { %6960 = vmatpush3.msra.mxu1 %v2728_v2  ;;  %v2977_v10 = vmax.f32 %v2851_v52, 0.0  ;;  %v2866_v7 = vadd.f32 %v6756_v29, %v8905_v28 }
 0x621   : > { %6961 = vmatprep.subr.mxu1 %v2727_v18  ;;  %v2860_v15 = vpop.f32.mrf.mxu0 }
 0x622   : > { %6962 = vmatpush3.msra.mxu1 %v2727_v18  ;;  %v2861_v30 = vadd.f32 %v8905_v28, %v2860_v15  ;;  %6831 = vmatprep.mubr.f32.mxu1 %v2977_v10  ;;  %v2980_v37 = vmax.f32 %v2866_v7, 0.0 }
 0x623   : > { %6963 = vmatprep.subr.mxu1 %v2726_v53  ;;  %v6759_v46 = vpop.f32.mrf.mxu0  ;;  %6832 = vmatmul.mubr.f32.gmra.mxu1 %v2978_v16 }
 0x624   : > { %v2979_v57 = vmax.f32 %v2861_v30, 0.0  ;;  %6964 = vmatpush3.msra.mxu1 %v2726_v53  ;;  %v2876_v31 = vadd.f32 %v6759_v46, %v8905_v28 }
 0x625   : > { %v2870_v56 = vpop.f32.mrf.mxu0  ;;  %6965 = vmatprep.subr.mxu1 %v2725_v54 }
 0x626   : > { %v2871_v2 = vadd.f32 %v8905_v28, %v2870_v56  ;;  %6834 = vmatprep.mubr.f32.mxu1 %v2979_v57  ;;  %6966 = vmatpush3.msra.mxu1 %v2725_v54  ;;  %v2982_v18 = vmax.f32 %v2876_v31, 0.0 }
 0x627   : > { %v6762_v32 = vpop.f32.mrf.mxu0  ;;  %6835 = vmatmul.mubr.f32.gmra.mxu1 %v2980_v37  ;;  %6967 = vmatprep.subr.mxu1 %v2724_v33 }
 0x628   : > { %v2981_v36 = vmax.f32 %v2871_v2, 0.0  ;;  %6968 = vmatpush3.msra.mxu1 %v2724_v33  ;;  %v2886_v52 = vadd.f32 %v6762_v32, %v8905_v28 }
 0x629   : > { %v2880_v29 = vpop.f32.mrf.mxu0  ;;  %6969 = vmatprep.subr.mxu1 %v2723_v62 }
 0x62a   : > { %v2881_v53 = vadd.f32 %v8905_v28, %v2880_v29  ;;  %6837 = vmatprep.mubr.f32.mxu1 %v2981_v36  ;;  %6970 = vmatpush3.msra.mxu1 %v2723_v62  ;;  %v2984_v7 = vmax.f32 %v2886_v52, 0.0 }
 0x62b   : > { %v6765_v10 = vpop.f32.mrf.mxu0  ;;  %6838 = vmatmul.mubr.f32.gmra.mxu1 %v2982_v18 }
 0x62c   : > { %v2983_v16 = vmax.f32 %v2881_v53, 0.0  ;;  %v2896_v15 = vadd.f32 %v6765_v10, %v8905_v28 }
 0x62d   : > { %v2890_v30 = vpop.f32.mrf.mxu0 }
 0x62e   : > { %v2891_v54 = vadd.f32 %v8905_v28, %v2890_v30  ;;  %6840 = vmatprep.mubr.f32.mxu1 %v2983_v16  ;;  %v2986_v33 = vmax.f32 %v2896_v15, 0.0 }
 0x62f   : > { %v6768_v46 = vpop.f32.mrf.mxu0  ;;  %6841 = vmatmul.mubr.f32.gmra.mxu1 %v2984_v7 }
 0x630   : > { %v2985_v57 = vmax.f32 %v2891_v54, 0.0  ;;  %v2906_v37 = vadd.f32 %v6768_v46, %v8905_v28 }
 0x631   : > { %v2900_v31 = vpop.f32.mrf.mxu0 }
 0x632   : > { %v2901_v56 = vadd.f32 %v8905_v28, %v2900_v31  ;;  %6843 = vmatprep.mubr.f32.mxu1 %v2985_v57  ;;  %v2988_v32 = vmax.f32 %v2906_v37, 0.0 }
 0x633   : > { %v6771_v2 = vpop.f32.mrf.mxu0  ;;  %6844 = vmatmul.mubr.f32.gmra.mxu1 %v2986_v33 }
 0x634   : > { %v2987_v62 = vmax.f32 %v2901_v56, 0.0  ;;  %v2916_v36 = vadd.f32 %v6771_v2, %v8905_v28 }
 0x635   : > { %v2910_v18 = vpop.f32.mrf.mxu0 }
 0x636   : > { %v2911_v52 = vadd.f32 %v8905_v28, %v2910_v18  ;;  %6846 = vmatprep.mubr.f32.mxu1 %v2987_v62  ;;  %v2990_v10 = vmax.f32 %v2916_v36, 0.0 }
 0x637   : > { %v6774_v29 = vpop.f32.mrf.mxu0  ;;  %6847 = vmatmul.mubr.f32.gmra.mxu1 %v2988_v32 }
 0x638   : > { %v2989_v53 = vmax.f32 %v2911_v52, 0.0  ;;  %v2926_v16 = vadd.f32 %v6774_v29, %v8905_v28 }
 0x639   : > { %v2920_v7 = vpop.f32.mrf.mxu0 }
 0x63a   : > { %v2921_v15 = vadd.f32 %v8905_v28, %v2920_v7  ;;  %6849 = vmatprep.mubr.f32.mxu1 %v2989_v53  ;;  %v2992_v46 = vmax.f32 %v2926_v16, 0.0 }
 0x63b   : > { %v6777_v30 = vpop.f32.mrf.mxu0  ;;  %6850 = vmatmul.mubr.f32.gmra.mxu1 %v2990_v10 }
 0x63c   : > { %v2991_v54 = vmax.f32 %v2921_v15, 0.0  ;;  %v2936_v57 = vadd.f32 %v6777_v30, %v8905_v28 }
 0x63d   : > { %v2930_v33 = vpop.f32.mrf.mxu0 }
 0x63e   : > { %v2931_v37 = vadd.f32 %v8905_v28, %v2930_v33  ;;  %6852 = vmatprep.mubr.f32.mxu1 %v2991_v54  ;;  %v2994_v2 = vmax.f32 %v2936_v57, 0.0 }
 0x63f   : > { %v6780_v31 = vpop.f32.mrf.mxu0  ;;  %6853 = vmatmul.mubr.f32.gmra.mxu1 %v2992_v46 }
 0x640   : > { %v2993_v56 = vmax.f32 %v2931_v37, 0.0  ;;  %v2946_v62 = vadd.f32 %v6780_v31, %v8905_v28  ;;  %v2722_v31 = vld [vmem:[#allocation5 + $0x478] sm:$0xff] }
 0x641   : > { %v2940_v32 = vpop.f32.mrf.mxu0  ;;  %6971 = vmatprep.subr.mxu1 %v2722_v31 }
 0x642   : > { %v2941_v36 = vadd.f32 %v8905_v28, %v2940_v32  ;;  %6855 = vmatprep.mubr.f32.mxu1 %v2993_v56  ;;  %v2996_v29 = vmax.f32 %v2946_v62, 0.0  ;;  %6972 = vmatpush3.msra.mxu1 %v2722_v31  ;;  %v2721_v56 = vld [vmem:[#allocation5 + $0x458] sm:$0xff]  ;;  %v2703_v62 = vld [vmem:[#allocation5 + $0x410] sm:$0xff] }
 0x643   : > { %v6783_v18 = vpop.f32.mrf.mxu0  ;;  %6856 = vmatmul.mubr.f32.gmra.mxu1 %v2994_v2  ;;  %6973 = vmatprep.subr.mxu1 %v2721_v56  ;;  %v2720_v2 = vld [vmem:[#allocation5 + $0x438] sm:$0xff] }
 0x644   : > { %v2995_v52 = vmax.f32 %v2941_v36, 0.0  ;;  %v2956_v53 = vadd.f32 %v6783_v18, %v8905_v28  ;;  %6974 = vmatpush3.msra.mxu1 %v2721_v56  ;;  %6897 = vmatprep.subr.mxu0 %v2703_v62  ;;  %v2719_v32 = vld [vmem:[#allocation5 + $0x418] sm:$0xff]  ;;  %v8939_v36 = vld [vmem:[#allocation7 + $0x9] ss:$0 sm:$0xff] }
 0x645   : > { %v2950_v10 = vpop.f32.mrf.mxu0  ;;  %6975 = vmatprep.subr.mxu1 %v2720_v2  ;;  %6898 = vmatpush3.msra.mxu0 %v2703_v62  ;;  %v3894_v62 = vld [vmem:[#allocation5 + $0x7a0] sm:$0xff] }
 0x646   : > { %v2951_v16 = vadd.f32 %v8905_v28, %v2950_v10  ;;  %6858 = vmatprep.mubr.f32.mxu1 %v2995_v52  ;;  %v2998_v30 = vmax.f32 %v2956_v53, 0.0  ;;  %6976 = vmatpush3.msra.mxu1 %v2720_v2 }
 0x647   : > { %v6786_v7 = vpop.f32.mrf.mxu0  ;;  %6859 = vmatmul.mubr.f32.gmra.mxu1 %v2996_v29  ;;  %6977 = vmatprep.subr.mxu1 %v2719_v32 }
 0x648   : > { %v2997_v15 = vmax.f32 %v2951_v16, 0.0  ;;  %v2966_v54 = vadd.f32 %v6786_v7, %v8905_v28  ;;  %6978 = vmatpush3.msra.mxu1 %v2719_v32 }
 0x649   : > { %v2960_v46 = vpop.f32.mrf.mxu0 }
 0x64a   : > { %v2961_v57 = vadd.f32 %v8905_v28, %v2960_v46  ;;  %6861 = vmatprep.mubr.f32.mxu1 %v2997_v15  ;;  %v3000_v37 = vmax.f32 %v2966_v54, 0.0  ;;  %v3896_v28 = vld [vmem:[#allocation5 + $0x7e0] sm:$0xff] }
 0x64b   : > { %6862 = vmatmul.mubr.f32.gmra.mxu1 %v2998_v30  ;;  %7027 = vmatprep.subr.mxu0 %v3896_v28  ;;  %v3895_v46 = vld [vmem:[#allocation5 + $0x7c0] sm:$0xff] }
 0x64c   : > { %v2999_v33 = vmax.f32 %v2961_v57, 0.0 }
 0x64e   : > { %6864 = vmatprep.mubr.f32.mxu1 %v2999_v33 }
 0x64f   : > { %6865 = vmatmul.mubr.f32.gmra.mxu1 %v3000_v37 }
 0x6d3   : > { %v6821_v18 = vpop.f32.mrf.mxu1 }
 0x6d4   : > { %v3077_v52 = vadd.f32 %v6821_v18, %v8939_v36 }
 0x6d5   : > { %v3071_v29 = vpop.f32.mrf.mxu1 }
 0x6d6   : > { %v3072_v53 = vadd.f32 %v8939_v36, %v3071_v29  ;;  %v3231_v7 = vmax.f32 %v3077_v52, 0.0 }
 0x6d7   : > { %v6824_v10 = vpop.f32.mrf.mxu1 }
 0x6d8   : > { %v3230_v16 = vmax.f32 %v3072_v53, 0.0  ;;  %v3087_v15 = vadd.f32 %v6824_v10, %v8939_v36  ;;  %v3893_v10 = vld [vmem:[#allocation5 + $0x780] sm:$0xff] }
 0x6d9   : > { %v3081_v30 = vpop.f32.mrf.mxu1 }
 0x6da   : > { %v3082_v54 = vadd.f32 %v8939_v36, %v3081_v30  ;;  %6899 = vmatprep.mubr.f32.mxu0 %v3230_v16  ;;  %6979 = vmatprep.mubr.f32.mxu1 %v3230_v16  ;;  %v3233_v37 = vmax.f32 %v3087_v15, 0.0 }
 0x6db   : > { %v6827_v57 = vpop.f32.mrf.mxu1  ;;  %6900 = vmatmul.mubr.f32.vlgmr.msra.gmra.mxu0 %v3231_v7  ;;  %6980 = vmatmul.mubr.f32.vlgmr.msra.gmra.mxu1 %v3231_v7 }
 0x6dc   : > { %v3232_v33 = vmax.f32 %v3082_v54, 0.0  ;;  %7028 = vmatpush3.msra.mxu0 %v3896_v28  ;;  %v3097_v31 = vadd.f32 %v6827_v57, %v8939_v36 }
 0x6dd   : > { %v3091_v56 = vpop.f32.mrf.mxu1  ;;  %7029 = vmatprep.subr.mxu0 %v3895_v46 }
 0x6de   : > { %v3092_v2 = vadd.f32 %v8939_v36, %v3091_v56  ;;  %6902 = vmatprep.mubr.f32.mxu0 %v3232_v33  ;;  %6982 = vmatprep.mubr.f32.mxu1 %v3232_v33  ;;  %v3235_v52 = vmax.f32 %v3097_v31, 0.0 }
 0x6df   : > { %v6830_v32 = vpop.f32.mrf.mxu1  ;;  %6903 = vmatmul.mubr.f32.gmra.mxu0 %v3233_v37  ;;  %6983 = vmatmul.mubr.f32.gmra.mxu1 %v3233_v37 }
 0x6e0   : > { %v3234_v18 = vmax.f32 %v3092_v2, 0.0  ;;  %7030 = vmatpush3.msra.mxu0 %v3895_v46  ;;  %v3107_v29 = vadd.f32 %v6830_v32, %v8939_v36  ;;  %v3892_v46 = vld [vmem:[#allocation5 + $0x760] sm:$0xff] }
 0x6e1   : > { %v3101_v53 = vpop.f32.mrf.mxu1  ;;  %7031 = vmatprep.subr.mxu0 %v3894_v62 }
 0x6e2   : > { %v3102_v28 = vadd.f32 %v8939_v36, %v3101_v53  ;;  %6905 = vmatprep.mubr.f32.mxu0 %v3234_v18  ;;  %6985 = vmatprep.mubr.f32.mxu1 %v3234_v18  ;;  %v3237_v15 = vmax.f32 %v3107_v29, 0.0 }
 0x6e3   : > { %6906 = vmatmul.mubr.f32.gmra.mxu0 %v3235_v52  ;;  %6986 = vmatmul.mubr.f32.gmra.mxu1 %v3235_v52  ;;  %v6833_v7 = vpop.f32.mrf.mxu1 }
 0x6e4   : > { %v3236_v16 = vmax.f32 %v3102_v28, 0.0  ;;  %7032 = vmatpush3.msra.mxu0 %v3894_v62  ;;  %v3117_v30 = vadd.f32 %v6833_v7, %v8939_v36  ;;  %v3891_v62 = vld [vmem:[#allocation5 + $0x740] sm:$0xff] }
 0x6e5   : > { %7033 = vmatprep.subr.mxu0 %v3893_v10  ;;  %v3111_v54 = vpop.f32.mrf.mxu1 }
 0x6e6   : > { %6908 = vmatprep.mubr.f32.mxu0 %v3236_v16  ;;  %6988 = vmatprep.mubr.f32.mxu1 %v3236_v16  ;;  %v3112_v57 = vadd.f32 %v8939_v36, %v3111_v54  ;;  %v3239_v31 = vmax.f32 %v3117_v30, 0.0 }
 0x6e7   : > { %6909 = vmatmul.mubr.f32.gmra.mxu0 %v3237_v15  ;;  %6989 = vmatmul.mubr.f32.gmra.mxu1 %v3237_v15  ;;  %v6836_v33 = vpop.f32.mrf.mxu1 }
 0x6e8   : > { %7034 = vmatpush3.msra.mxu0 %v3893_v10  ;;  %v3238_v37 = vmax.f32 %v3112_v57, 0.0  ;;  %v3127_v56 = vadd.f32 %v6836_v33, %v8939_v36  ;;  %v3890_v10 = vld [vmem:[#allocation5 + $0x720] sm:$0xff] }
 0x6e9   : > { %7035 = vmatprep.subr.mxu0 %v3892_v46  ;;  %v3121_v2 = vpop.f32.mrf.mxu1  ;;  %v3889_v57 = vld [vmem:[#allocation5 + $0x700] sm:$0xff] }
 0x6ea   : > { %7036 = vmatpush3.msra.mxu0 %v3892_v46  ;;  %v3122_v32 = vadd.f32 %v8939_v36, %v3121_v2  ;;  %6911 = vmatprep.mubr.f32.mxu0 %v3238_v37  ;;  %v3241_v29 = vmax.f32 %v3127_v56, 0.0 }
 0x6eb   : > { %6991 = vmatprep.mubr.f32.mxu1 %v3238_v37  ;;  %v6839_v18 = vpop.f32.mrf.mxu1  ;;  %6912 = vmatmul.mubr.f32.gmra.mxu0 %v3239_v31 }
 0x6ec   : > { %6992 = vmatmul.mubr.f32.gmra.mxu1 %v3239_v31  ;;  %v3240_v52 = vmax.f32 %v3122_v32, 0.0  ;;  %7037 = vmatprep.subr.mxu0 %v3891_v62  ;;  %v3137_v53 = vadd.f32 %v6839_v18, %v8939_v36  ;;  %v3888_v32 = vld [vmem:[#allocation5 + $0x6e0] sm:$0xff] }
 0x6ed   : > { %v3131_v28 = vpop.f32.mrf.mxu1  ;;  %7038 = vmatpush3.msra.mxu0 %v3891_v62 }
 0x6ee   : > { %v3132_v16 = vadd.f32 %v8939_v36, %v3131_v28  ;;  %6914 = vmatprep.mubr.f32.mxu0 %v3240_v52  ;;  %6994 = vmatprep.mubr.f32.mxu1 %v3240_v52  ;;  %v3243_v30 = vmax.f32 %v3137_v53, 0.0 }
 0x6ef   : > { %v6842_v7 = vpop.f32.mrf.mxu1  ;;  %6915 = vmatmul.mubr.f32.gmra.mxu0 %v3241_v29  ;;  %7039 = vmatprep.subr.mxu0 %v3890_v10 }
 0x6f0   : > { %6995 = vmatmul.mubr.f32.gmra.mxu1 %v3241_v29  ;;  %v3242_v15 = vmax.f32 %v3132_v16, 0.0  ;;  %v3147_v54 = vadd.f32 %v6842_v7, %v8939_v36  ;;  %7040 = vmatpush3.msra.mxu0 %v3890_v10  ;;  %v3887_v16 = vld [vmem:[#allocation5 + $0x6c0] sm:$0xff] }
 0x6f1   : > { %v3141_v46 = vpop.f32.mrf.mxu1  ;;  %7041 = vmatprep.subr.mxu0 %v3889_v57 }
 0x6f2   : > { %v3142_v33 = vadd.f32 %v8939_v36, %v3141_v46  ;;  %6917 = vmatprep.mubr.f32.mxu0 %v3242_v15  ;;  %6997 = vmatprep.mubr.f32.mxu1 %v3242_v15  ;;  %v3245_v56 = vmax.f32 %v3147_v54, 0.0 }
 0x6f3   : > { %v6845_v37 = vpop.f32.mrf.mxu1  ;;  %6918 = vmatmul.mubr.f32.gmra.mxu0 %v3243_v30 }
 0x6f4   : > { %6998 = vmatmul.mubr.f32.gmra.mxu1 %v3243_v30  ;;  %v3244_v31 = vmax.f32 %v3142_v33, 0.0  ;;  %v3157_v2 = vadd.f32 %v6845_v37, %v8939_v36  ;;  %7042 = vmatpush3.msra.mxu0 %v3889_v57  ;;  %v3886_v33 = vld [vmem:[#allocation5 + $0x6a0] sm:$0xff] }
 0x6f5   : > { %v3151_v62 = vpop.f32.mrf.mxu1  ;;  %7043 = vmatprep.subr.mxu0 %v3888_v32 }
 0x6f6   : > { %v3152_v18 = vadd.f32 %v8939_v36, %v3151_v62  ;;  %6920 = vmatprep.mubr.f32.mxu0 %v3244_v31  ;;  %7000 = vmatprep.mubr.f32.mxu1 %v3244_v31  ;;  %v3247_v53 = vmax.f32 %v3157_v2, 0.0 }
 0x6f7   : > { %v6848_v52 = vpop.f32.mrf.mxu1  ;;  %6921 = vmatmul.mubr.f32.gmra.mxu0 %v3245_v56 }
 0x6f8   : > { %7001 = vmatmul.mubr.f32.gmra.mxu1 %v3245_v56  ;;  %v3246_v29 = vmax.f32 %v3152_v18, 0.0  ;;  %v3167_v28 = vadd.f32 %v6848_v52, %v8939_v36  ;;  %7044 = vmatpush3.msra.mxu0 %v3888_v32 }
 0x6f9   : > { %v3161_v10 = vpop.f32.mrf.mxu1  ;;  %7045 = vmatprep.subr.mxu0 %v3887_v16 }
 0x6fa   : > { %v3162_v7 = vadd.f32 %v8939_v36, %v3161_v10  ;;  %6923 = vmatprep.mubr.f32.mxu0 %v3246_v29  ;;  %7003 = vmatprep.mubr.f32.mxu1 %v3246_v29  ;;  %v3249_v54 = vmax.f32 %v3167_v28, 0.0 }
 0x6fb   : > { %v6851_v15 = vpop.f32.mrf.mxu1  ;;  %6924 = vmatmul.mubr.f32.gmra.mxu0 %v3247_v53 }
 0x6fc   : > { %7004 = vmatmul.mubr.f32.gmra.mxu1 %v3247_v53  ;;  %v3248_v30 = vmax.f32 %v3162_v7, 0.0  ;;  %v3177_v46 = vadd.f32 %v6851_v15, %v8939_v36  ;;  %7046 = vmatpush3.msra.mxu0 %v3887_v16 }
 0x6fd   : > { %v3171_v57 = vpop.f32.mrf.mxu1  ;;  %7047 = vmatprep.subr.mxu0 %v3886_v33 }
 0x6fe   : > { %v3172_v37 = vadd.f32 %v8939_v36, %v3171_v57  ;;  %6926 = vmatprep.mubr.f32.mxu0 %v3248_v30  ;;  %7006 = vmatprep.mubr.f32.mxu1 %v3248_v30  ;;  %v3251_v2 = vmax.f32 %v3177_v46, 0.0 }
 0x6ff   : > { %v6854_v31 = vpop.f32.mrf.mxu1  ;;  %6927 = vmatmul.mubr.f32.gmra.mxu0 %v3249_v54 }
 0x700   : > { %7007 = vmatmul.mubr.f32.gmra.mxu1 %v3249_v54  ;;  %v3250_v56 = vmax.f32 %v3172_v37, 0.0  ;;  %v3187_v62 = vadd.f32 %v6854_v31, %v8939_v36  ;;  %7048 = vmatpush3.msra.mxu0 %v3886_v33 }
 0x701   : > { %v3181_v32 = vpop.f32.mrf.mxu1 }
 0x702   : > { %v3182_v18 = vadd.f32 %v8939_v36, %v3181_v32  ;;  %6929 = vmatprep.mubr.f32.mxu0 %v3250_v56  ;;  %7009 = vmatprep.mubr.f32.mxu1 %v3250_v56  ;;  %v3253_v53 = vmax.f32 %v3187_v62, 0.0 }
 0x703   : > { %v6857_v52 = vpop.f32.mrf.mxu1  ;;  %6930 = vmatmul.mubr.f32.gmra.mxu0 %v3251_v2 }
 0x704   : > { %7010 = vmatmul.mubr.f32.gmra.mxu1 %v3251_v2  ;;  %v3252_v29 = vmax.f32 %v3182_v18, 0.0  ;;  %v3197_v28 = vadd.f32 %v6857_v52, %v8939_v36 }
 0x705   : > { %v3191_v10 = vpop.f32.mrf.mxu1 }
 0x706   : > { %v3192_v16 = vadd.f32 %v8939_v36, %v3191_v10  ;;  %6932 = vmatprep.mubr.f32.mxu0 %v3252_v29  ;;  %7012 = vmatprep.mubr.f32.mxu1 %v3252_v29  ;;  %v3255_v30 = vmax.f32 %v3197_v28, 0.0 }
 0x707   : > { %v6860_v7 = vpop.f32.mrf.mxu1  ;;  %6933 = vmatmul.mubr.f32.gmra.mxu0 %v3253_v53 }
 0x708   : > { %7013 = vmatmul.mubr.f32.gmra.mxu1 %v3253_v53  ;;  %v3254_v15 = vmax.f32 %v3192_v16, 0.0  ;;  %v3207_v54 = vadd.f32 %v6860_v7, %v8939_v36  ;;  %v3885_v7 = vld [vmem:[#allocation5 + $0x680] sm:$0xff] }
 0x709   : > { %v3201_v46 = vpop.f32.mrf.mxu1  ;;  %7049 = vmatprep.subr.mxu0 %v3885_v7 }
 0x70a   : > { %v3202_v57 = vadd.f32 %v8939_v36, %v3201_v46  ;;  %6935 = vmatprep.mubr.f32.mxu0 %v3254_v15  ;;  %7015 = vmatprep.mubr.f32.mxu1 %v3254_v15  ;;  %v3257_v31 = vmax.f32 %v3207_v54, 0.0  ;;  %v3884_v15 = vld [vmem:[#allocation5 + $0x660] sm:$0xff]  ;;  %v3912_v46 = vld [vmem:[#allocation5 + $0x7e8] sm:$0xff] }
 0x70b   : > { %v6863_v33 = vpop.f32.mrf.mxu1  ;;  %6936 = vmatmul.mubr.f32.gmra.mxu0 %v3255_v30  ;;  %v3881_v54 = vld [vmem:[#allocation5 + $0x600] sm:$0xff]  ;;  %7107 = vmatprep.subr.mxu1 %v3912_v46 }
 0x70c   : > { %7016 = vmatmul.mubr.f32.gmra.mxu1 %v3255_v30  ;;  %v3256_v37 = vmax.f32 %v3202_v57, 0.0  ;;  %v3217_v56 = vadd.f32 %v6863_v33, %v8939_v36  ;;  %7050 = vmatpush3.msra.mxu0 %v3885_v7  ;;  %v3883_v30 = vld [vmem:[#allocation5 + $0x640] sm:$0xff]  ;;  %v3911_v57 = vld [vmem:[#allocation5 + $0x7c8] sm:$0xff] }
 0x70d   : > { %v3211_v2 = vpop.f32.mrf.mxu1  ;;  %7051 = vmatprep.subr.mxu0 %v3884_v15  ;;  %7108 = vmatpush3.msra.mxu1 %v3912_v46  ;;  %v3910_v33 = vld [vmem:[#allocation5 + $0x7a8] sm:$0xff] }
 0x70e   : > { %v3212_v62 = vadd.f32 %v8939_v36, %v3211_v2  ;;  %6938 = vmatprep.mubr.f32.mxu0 %v3256_v37  ;;  %7018 = vmatprep.mubr.f32.mxu1 %v3256_v37  ;;  %v3259_v52 = vmax.f32 %v3217_v56, 0.0  ;;  %v3909_v37 = vld [vmem:[#allocation5 + $0x788] sm:$0xff] }
 0x70f   : > { %v6866_v32 = vpop.f32.mrf.mxu1  ;;  %6939 = vmatmul.mubr.f32.gmra.mxu0 %v3257_v31  ;;  %7109 = vmatprep.subr.mxu1 %v3911_v57  ;;  %v3907_v56 = vld [vmem:[#allocation5 + $0x748] sm:$0xff] }
 0x710   : > { %7019 = vmatmul.mubr.f32.gmra.mxu1 %v3257_v31  ;;  %v3258_v18 = vmax.f32 %v3212_v62, 0.0  ;;  %v3227_v29 = vadd.f32 %v6866_v32, %v8939_v36  ;;  %7052 = vmatpush3.msra.mxu0 %v3884_v15  ;;  %v3908_v31 = vld [vmem:[#allocation5 + $0x768] sm:$0xff] }
 0x711   : > { %v3221_v53 = vpop.f32.mrf.mxu1  ;;  %7053 = vmatprep.subr.mxu0 %v3883_v30  ;;  %7110 = vmatpush3.msra.mxu1 %v3911_v57  ;;  %v3906_v2 = vld [vmem:[#allocation5 + $0x728] sm:$0xff]  ;;  %v2638_v57 = vadd.f32 %v8560_v4, %v8140_v9 }
 0x712   : > { %v3222_v28 = vadd.f32 %v8939_v36, %v3221_v53  ;;  %6941 = vmatprep.mubr.f32.mxu0 %v3258_v18  ;;  %7021 = vmatprep.mubr.f32.mxu1 %v3258_v18  ;;  %v3261_v16 = vmax.f32 %v3227_v29, 0.0  ;;  %v3882_v36 = vld [vmem:[#allocation5 + $0x620] sm:$0xff]  ;;  %v3905_v62 = vld [vmem:[#allocation5 + $0x708] sm:$0xff] }
 0x713   : > { %6942 = vmatmul.mubr.f32.gmra.mxu0 %v3259_v52  ;;  %7111 = vmatprep.subr.mxu1 %v3910_v33  ;;  %v3904_v32 = vld [vmem:[#allocation5 + $0x6e8] sm:$0xff] }
 0x714   : > { %7022 = vmatmul.mubr.f32.gmra.mxu1 %v3259_v52  ;;  %v3260_v10 = vmax.f32 %v3222_v28, 0.0  ;;  %7054 = vmatpush3.msra.mxu0 %v3883_v30  ;;  %v3903_v18 = vld [vmem:[#allocation5 + $0x6c8] sm:$0xff]  ;;  %v2639_v30 = vadd.f32 %v8556_v39, %v8136_v5  ;;  %v9878_v39 = vld [vmem:[#allocation12_spill] sm:$0xff] }
 0x715   : > { %7055 = vmatprep.subr.mxu0 %v3882_v36  ;;  %7112 = vmatpush3.msra.mxu1 %v3910_v33  ;;  %v3902_v52 = vld [vmem:[#allocation5 + $0x6a8] sm:$0xff] }
 0x716   : > { %6944 = vmatprep.mubr.f32.mxu0 %v3260_v10  ;;  %7024 = vmatprep.mubr.f32.mxu1 %v3260_v10  ;;  %v3901_v29 = vld [vmem:[#allocation5 + $0x688] sm:$0xff] }
 0x717   : > { %6945 = vmatmul.mubr.f32.gmra.mxu0 %v3261_v16  ;;  %7113 = vmatprep.subr.mxu1 %v3909_v37  ;;  %v3900_v53 = vld [vmem:[#allocation5 + $0x668] sm:$0xff] }
 0x718   : > { %7025 = vmatmul.mubr.f32.gmra.mxu1 %v3261_v16  ;;  %7056 = vmatpush3.msra.mxu0 %v3882_v36  ;;  %v3899_v28 = vld [vmem:[#allocation5 + $0x648] sm:$0xff] }
 0x719   : > { %7057 = vmatprep.subr.mxu0 %v3881_v54  ;;  %7114 = vmatpush3.msra.mxu1 %v3909_v37  ;;  %v3898_v10 = vld [vmem:[#allocation5 + $0x628] sm:$0xff] }
 0x71a   : > { %7058 = vmatpush3.msra.mxu0 %v3881_v54  ;;  %7115 = vmatprep.subr.mxu1 %v3908_v31  ;;  %v8973_v16 = vld [vmem:[#allocation7 + $0xa] ss:$0 sm:$0xff] }
 0x71b   : > { %7116 = vmatpush3.msra.mxu1 %v3908_v31 }
 0x71c   : > { %7117 = vmatprep.subr.mxu1 %v3907_v56 }
 0x71d   : > { %7118 = vmatpush3.msra.mxu1 %v3907_v56 }
 0x71e   : > { %7119 = vmatprep.subr.mxu1 %v3906_v2 }
 0x71f   : > { %7120 = vmatpush3.msra.mxu1 %v3906_v2 }
 0x720   : > { %7121 = vmatprep.subr.mxu1 %v3905_v62 }
 0x721   : > { %7122 = vmatpush3.msra.mxu1 %v3905_v62  ;;  %v2641_v62 = vadd.f32 %v8564_v44, %v8144_v13  ;;  %v9881_v13 = vld [vmem:[#allocation13_spill] sm:$0xff]  ;;  %v9882_v44 = vld [vmem:[#allocation42_spill] sm:$0xff] }
 0x722   : > { %7123 = vmatprep.subr.mxu1 %v3904_v32 }
 0x723   : > { %7124 = vmatpush3.msra.mxu1 %v3904_v32 }
 0x724   : > { %7125 = vmatprep.subr.mxu1 %v3903_v18 }
 0x725   : > { %7126 = vmatpush3.msra.mxu1 %v3903_v18 }
 0x726   : > { %7127 = vmatprep.subr.mxu1 %v3902_v52 }
 0x727   : > { %7128 = vmatpush3.msra.mxu1 %v3902_v52  ;;  %v9879_v52 = vld [vmem:[#allocation41_spill] sm:$0xff] }
 0x728   : > { %7129 = vmatprep.subr.mxu1 %v3901_v29 }
 0x729   : > { %7130 = vmatpush3.msra.mxu1 %v3901_v29  ;;  %v2640_v29 = vadd.f32 %v9879_v52, %v9878_v39 }
 0x72a   : > { %7131 = vmatprep.subr.mxu1 %v3900_v53 }
 0x72b   : > { %7132 = vmatpush3.msra.mxu1 %v3900_v53 }
 0x72c   : > { %7133 = vmatprep.subr.mxu1 %v3899_v28 }
 0x72d   : > { %7134 = vmatpush3.msra.mxu1 %v3899_v28 }
 0x72e   : > { %7135 = vmatprep.subr.mxu1 %v3898_v10 }
 0x72f   : > { %7136 = vmatpush3.msra.mxu1 %v3898_v10 }
 0x79b   : > { %v6901_v7 = vpop.f32.mrf.mxu0  ;;  %v6981_v15 = vpop.f32.mrf.mxu1 }
 0x79c   : > { %v3338_v36 = vadd.f32 %v6901_v7, %v8973_v16 }
 0x79d   : > { %v3332_v54 = vpop.f32.mrf.mxu0  ;;  %v3561_v46 = vpop.f32.mrf.mxu1 }
 0x79e   : > { %v3754_v33 = vmul.f32 1.442695, %v3338_v36  ;;  %v8980_v37 = vadd.f32 %v3338_v36, %v2639_v30  ;;  %v3333_v31 = vadd.f32 %v8973_v16, %v3332_v54  ;;  %v2643_v36 = vadd.f32 %v9882_v44, %v9881_v13  ;;  %v9887_v13 = vld [vmem:[#allocation15_spill] sm:$0xff] }
 0x79f   : > { %v6904_v56 = vpop.f32.mrf.mxu0  ;;  %v6984_v2 = vpop.f32.mrf.mxu1  ;;  %v9007_v44 = vld [vmem:[#allocation7 + $0xb] ss:$0 sm:$0xff] }
 0x7a0   : > { %9876 = vst [vmem:[#allocation70_spill] sm:$0xff] %v8980_v37  ;;  %v3752_v32 = vmul.f32 1.442695, %v3333_v31  ;;  %v8985_v18 = vadd.f32 %v3333_v31, %v2638_v57  ;;  %v3348_v5 = vadd.f32 %v6904_v56, %v8973_v16  ;;  %7550 = vpow2.f32 %v3754_v33  ;;  %v9884_v56 = vld [vmem:[#allocation14_spill] sm:$0xff]  ;;  %v9885_v33 = vld [vmem:[#allocation43_spill] sm:$0xff] }
 0x7a1   : > { %v3342_v9 = vpop.f32.mrf.mxu0  ;;  %v3571_v4 = vpop.f32.mrf.mxu1  ;;  %v2642_v39 = vadd.f32 %v9885_v33, %v9884_v56  ;;  %v9890_v56 = vld [vmem:[#allocation16_spill] sm:$0xff] }
 0x7a2   : > { %9877 = vst [vmem:[#allocation71_spill] sm:$0xff] %v8985_v18  ;;  %7552 = vpow2.f32 %v3752_v32  ;;  %v3758_v53 = vmul.f32 1.442695, %v3348_v5  ;;  %v8990_v28 = vadd.f32 %v3348_v5, %v2641_v62  ;;  %v3343_v10 = vadd.f32 %v8973_v16, %v3342_v9 }
 0x7a3   : > { %v6907_v7 = vpop.f32.mrf.mxu0  ;;  %v6987_v30 = vpop.f32.mrf.mxu1 }
 0x7a4   : > { %9880 = vst [vmem:[#allocation12_spill] sm:$0xff] %v8990_v28  ;;  %v3756_v54 = vmul.f32 1.442695, %v3343_v10  ;;  %v8995_v57 = vadd.f32 %v3343_v10, %v2640_v29  ;;  %v3358_v31 = vadd.f32 %v6907_v7, %v8973_v16  ;;  %7554 = vpow2.f32 %v3758_v53  ;;  %v9888_v29 = vld [vmem:[#allocation44_spill] sm:$0xff] }
 0x7a5   : > { %v3352_v32 = vpop.f32.mrf.mxu0  ;;  %v3581_v52 = vpop.f32.mrf.mxu1  ;;  %v2645_v10 = vadd.f32 %v9888_v29, %v9887_v13 }
 0x7a6   : > { %9883 = vst [vmem:[#allocation41_spill] sm:$0xff] %v8995_v57  ;;  %7556 = vpow2.f32 %v3756_v54  ;;  %v3762_v62 = vmul.f32 1.442695, %v3358_v31  ;;  %v9000_v5 = vadd.f32 %v3358_v31, %v2643_v36  ;;  %v3353_v9 = vadd.f32 %v8973_v16, %v3352_v32  ;;  %v9891_v54 = vld [vmem:[#allocation45_spill] sm:$0xff] }
 0x7a7   : > { %v6910_v28 = vpop.f32.mrf.mxu0  ;;  %v9003_v18 = vpop.f32.mrf.mxu1  ;;  %v2644_v33 = vadd.f32 %v9891_v54, %v9890_v56  ;;  %v3562_v36 = vadd.f32 %v9007_v44, %v3561_v46  ;;  %v9894_v56 = vld [vmem:[#allocation17_spill] sm:$0xff]  ;;  %v9895_v46 = vld [vmem:[#allocation46_spill] sm:$0xff] }
 0x7a8   : > { %9886 = vst [vmem:[#allocation13_spill] sm:$0xff] %v9000_v5  ;;  %v3760_v7 = vmul.f32 1.442695, %v3353_v9  ;;  %v9009_v57 = vadd.f32 %v3353_v9, %v2642_v39  ;;  %v3368_v53 = vadd.f32 %v6910_v28, %v8973_v16  ;;  %7558 = vpow2.f32 %v3762_v62  ;;  %v9896_v54 = vld [vmem:[#allocation18_spill] sm:$0xff] }
 0x7a9   : > { %v3362_v31 = vpop.f32.mrf.mxu0  ;;  %v9015_v32 = vpop.f32.mrf.mxu1  ;;  %v3567_v39 = vadd.f32 %v6981_v15, %v9007_v44  ;;  %v2647_v62 = vadd.f32 %v9895_v46, %v9894_v56  ;;  %v2646_v27 = vadd.f32 %v9897_v60, %v9896_v54  ;;  %v3577_v15 = vadd.f32 %v6984_v2, %v9007_v44 }
 0x7aa   : > { %9889 = vst [vmem:[#allocation42_spill] sm:$0xff] %v9009_v57  ;;  %7560 = vpow2.f32 %v3760_v7  ;;  %v3766_v5 = vmul.f32 1.442695, %v3368_v53  ;;  %v9017_v37 = vadd.f32 %v3368_v53, %v2645_v10  ;;  %v3363_v13 = vadd.f32 %v8973_v16, %v3362_v31 }
 0x7ab   : > { %v6913_v28 = vpop.f32.mrf.mxu0  ;;  %v3720_v53 = vadd.f32 %v3562_v36, %v8613_v59  ;;  %v3721_v56 = vadd.f32 %v3567_v39, %v8615_v3  ;;  %v9900_v59 = vld [vmem:[#allocation20_spill] sm:$0xff]  ;;  %v9901_v36 = vld [vmem:[#allocation49_spill] sm:$0xff] }
 0x7ac   : > { %9892 = vst [vmem:[#allocation14_spill] sm:$0xff] %v9017_v37  ;;  %v3764_v9 = vmul.f32 1.442695, %v3363_v13  ;;  %v9021_v29 = vadd.f32 %v3363_v13, %v2644_v33  ;;  %v9023_v57 = vpop.f32.mrf.mxu1  ;;  %7562 = vpow2.f32 %v3766_v5  ;;  %v3378_v10 = vadd.f32 %v6913_v28, %v8973_v16  ;;  %v9898_v5 = vld [vmem:[#allocation19_spill] sm:$0xff]  ;;  %v9899_v28 = vld [vmem:[#allocation48_spill] sm:$0xff] }
 0x7ad   : > { %v7551_v7 = vpop.eup %7550  ;;  %v3572_v33 = vadd.f32 %v9007_v44, %v3571_v4  ;;  %v3372_v31 = vpop.f32.mrf.mxu0  ;;  %v2649_v54 = vadd.f32 %v9899_v28, %v9898_v5  ;;  %v2648_v2 = vadd.f32 %v9901_v36, %v9900_v59  ;;  %v3587_v4 = vadd.f32 %v6987_v30, %v9007_v44 }
 0x7ae   : > { %9893 = vst [vmem:[#allocation43_spill] sm:$0xff] %v9021_v29  ;;  %7564 = vpow2.f32 %v3764_v9  ;;  %v9033_v13 = vpop.f32.mrf.mxu1  ;;  %v3770_v46 = vmul.f32 1.442695, %v3378_v10  ;;  %v9036_v37 = vadd.f32 %v3378_v10, %v2647_v62  ;;  %v3373_v60 = vadd.f32 %v8973_v16, %v3372_v31 }
 0x7af   : > { %v7553_v29 = vpop.eup %7552  ;;  %v6916_v9 = vpop.f32.mrf.mxu0  ;;  %v9048_v1 = vmul.f32 %v7551_v7, %v3721_v56  ;;  %v3723_v31 = vadd.f32 %v3577_v15, %v8637_v8  ;;  %v3722_v5 = vadd.f32 %v3572_v33, %v8635_v34  ;;  %v3582_v28 = vadd.f32 %v9007_v44, %v3581_v52  ;;  %v9903_v8 = vld [vmem:[#allocation21_spill] sm:$0xff]  ;;  %v9904_v15 = vld [vmem:[#allocation50_spill] sm:$0xff] }
 0x7b0   : > { %v9044_v24 = vpop.f32.mrf.mxu1  ;;  %v9046_v61 = vmul.f32 %v7553_v29, %v3720_v53  ;;  %v3768_v3 = vmul.f32 1.442695, %v3373_v60  ;;  %v9050_v39 = vadd.f32 %v3373_v60, %v2646_v27  ;;  %v3388_v62 = vadd.f32 %v6916_v9, %v8973_v16  ;;  %v9905_v33 = vld [vmem:[#allocation22_spill] sm:$0xff] }
 0x7b1   : > { %v7555_v10 = vpop.eup %7554  ;;  %7566 = vpow2.f32 %v3770_v46  ;;  %v3382_v30 = vpop.f32.mrf.mxu0  ;;  %v2651_v34 = vadd.f32 %v9904_v15, %v9903_v8  ;;  %v2650_v52 = vadd.f32 %v8650_v41, %v9905_v33  ;;  %v3725_v56 = vadd.f32 %v3587_v4, %v8660_v48 }
 0x7b2   : > { %v9056_v59 = vpop.f32.mrf.mxu1  ;;  %7059 = vmatprep.mubr.f32.mxu0 %v9046_v61  ;;  %7568 = vpow2.f32 %v3768_v3  ;;  %v3774_v7 = vmul.f32 1.442695, %v3388_v62  ;;  %v9059_v27 = vadd.f32 %v3388_v62, %v2649_v54  ;;  %v3383_v53 = vadd.f32 %v8973_v16, %v3382_v30 }
 0x7b3   : > { %v7557_v29 = vpop.eup %7556  ;;  %7060 = vmatmul.mubr.f32.vlgmr.msra.gmra.mxu0 %v9048_v1  ;;  %v6919_v46 = vpop.f32.mrf.mxu0  ;;  %v9072_v9 = vmul.f32 %v7555_v10, %v3723_v31  ;;  %v3724_v8 = vadd.f32 %v3582_v28, %v8658_v21  ;;  %v3597_v41 = vadd.f32 %v9003_v18, %v9007_v44  ;;  %v3592_v48 = vadd.f32 %v9007_v44, %v9015_v32  ;;  %v9909_v21 = vld [vmem:[#allocation23_spill] sm:$0xff]  ;;  %v9912_v32 = vld [vmem:[#allocation52_spill] sm:$0xff] }
 0x7b4   : > { %9902 = vst [vmem:[#allocation15_spill] sm:$0xff] %v9059_v27  ;;  %v9068_v60 = vpop.f32.mrf.mxu1  ;;  %v9070_v36 = vmul.f32 %v7557_v29, %v3722_v5  ;;  %v3772_v54 = vmul.f32 1.442695, %v3383_v53  ;;  %v9074_v3 = vadd.f32 %v3383_v53, %v2648_v2  ;;  %v3398_v62 = vadd.f32 %v6919_v46, %v8973_v16  ;;  %v9910_v18 = vld [vmem:[#allocation51_spill] sm:$0xff]  ;;  %v9911_v53 = vld [vmem:[#allocation24_spill] sm:$0xff] }
 0x7b5   : > { %v7559_v30 = vpop.eup %7558  ;;  %7570 = vpow2.f32 %v3774_v7  ;;  %v3392_v4 = vpop.f32.mrf.mxu0  ;;  %v2653_v28 = vadd.f32 %v9910_v18, %v9909_v21  ;;  %v2652_v7 = vadd.f32 %v9912_v32, %v9911_v53  ;;  %v3602_v18 = vadd.f32 %v9007_v44, %v9033_v13 }
 0x7b6   : > { %9906 = vst [vmem:[#allocation44_spill] sm:$0xff] %v9070_v36  ;;  %9907 = vst [vmem:[#allocation16_spill] sm:$0xff] %v9074_v3  ;;  %v9082_v5 = vpop.f32.mrf.mxu1  ;;  %7062 = vmatprep.mubr.f32.mxu0 %v9070_v36  ;;  %7572 = vpow2.f32 %v3772_v54  ;;  %v3778_v2 = vmul.f32 1.442695, %v3398_v62  ;;  %v9085_v31 = vadd.f32 %v3398_v62, %v2651_v34  ;;  %v3393_v29 = vadd.f32 %v8973_v16, %v3392_v4  ;;  %v9915_v36 = vld [vmem:[#allocation54_spill] sm:$0xff] }
 0x7b7   : > { %v7561_v10 = vpop.eup %7560  ;;  %7063 = vmatmul.mubr.f32.gmra.mxu0 %v9072_v9  ;;  %v6922_v15 = vpop.f32.mrf.mxu0  ;;  %v9097_v3 = vmul.f32 %v7559_v30, %v3725_v56  ;;  %v3726_v21 = vadd.f32 %v3592_v48, %v9915_v36  ;;  %v9918_v36 = vld [vmem:[#allocation53_spill] sm:$0xff]  ;;  %v3607_v13 = vadd.f32 %v9023_v57, %v9007_v44 }
 0x7b8   : > { %9908 = vst [vmem:[#allocation45_spill] sm:$0xff] %v9085_v31  ;;  %v9093_v33 = vpop.f32.mrf.mxu1  ;;  %v9095_v46 = vmul.f32 %v7561_v10, %v3724_v8  ;;  %v3776_v54 = vmul.f32 1.442695, %v3393_v29  ;;  %v9099_v34 = vadd.f32 %v3393_v29, %v2650_v52  ;;  %v3408_v62 = vadd.f32 %v6922_v15, %v8973_v16  ;;  %v9914_v31 = vld [vmem:[#allocation55_spill] sm:$0xff] }
 0x7b9   : > { %v7563_v4 = vpop.eup %7562  ;;  %v3727_v27 = vadd.f32 %v3597_v41, %v9914_v31  ;;  %7574 = vpow2.f32 %v3778_v2  ;;  %v3402_v53 = vpop.f32.mrf.mxu0  ;;  %v9917_v41 = vld [vmem:[#allocation25_spill] sm:$0xff] }
 0x7ba   : > { %9913 = vst [vmem:[#allocation17_spill] sm:$0xff] %v9099_v34  ;;  %v9106_v32 = vpop.f32.mrf.mxu1  ;;  %7065 = vmatprep.mubr.f32.mxu0 %v9095_v46  ;;  %7576 = vpow2.f32 %v3776_v54  ;;  %v3782_v52 = vmul.f32 1.442695, %v3408_v62  ;;  %v9109_v30 = vadd.f32 %v3408_v62, %v2653_v28  ;;  %v3403_v8 = vadd.f32 %v8973_v16, %v3402_v53 }
 0x7bb   : > { %v7565_v56 = vpop.eup %7564  ;;  %7066 = vmatmul.mubr.f32.gmra.mxu0 %v9097_v3  ;;  %v2655_v48 = vadd.f32 %v9918_v36, %v9917_v41  ;;  %v6925_v10 = vpop.f32.mrf.mxu0  ;;  %v9121_v29 = vmul.f32 %v7563_v4, %v3727_v27  ;;  %v3728_v62 = vadd.f32 %v3602_v18, %v8709_v35  ;;  %v3729_v18 = vadd.f32 %v3607_v13, %v8711_v40 }
 0x7bc   : > { %9916 = vst [vmem:[#allocation46_spill] sm:$0xff] %v9109_v30  ;;  %v9117_v2 = vpop.f32.mrf.mxu1  ;;  %v9119_v31 = vmul.f32 %v7565_v56, %v3726_v21  ;;  %v3780_v15 = vmul.f32 1.442695, %v3403_v8  ;;  %v9123_v28 = vadd.f32 %v3403_v8, %v2652_v7  ;;  %v3418_v54 = vadd.f32 %v6925_v10, %v8973_v16  ;;  %v9922_v56 = vld [vmem:[#allocation26_spill] sm:$0xff] }
 0x7bd   : > { %7578 = vpow2.f32 %v3782_v52  ;;  %v3412_v53 = vpop.f32.mrf.mxu0  ;;  %v3612_v21 = vadd.f32 %v9007_v44, %v9056_v59  ;;  %v2654_v35 = vadd.f32 %v8695_v19, %v9922_v56  ;;  %v3617_v52 = vadd.f32 %v9044_v24, %v9007_v44  ;;  %v9923_v59 = vld [vmem:[#allocation27_spill] sm:$0xff] }
 0x7be   : > { %9919 = vst [vmem:[#allocation18_spill] sm:$0xff] %v9119_v31  ;;  %9920 = vst [vmem:[#allocation47_spill] sm:$0xff] %v9123_v28  ;;  %v9127_v41 = vpop.f32.mrf.mxu1  ;;  %7068 = vmatprep.mubr.f32.mxu0 %v9119_v31  ;;  %v7567_v57 = vpop.eup %7566  ;;  %7580 = vpow2.f32 %v3780_v15  ;;  %v3786_v27 = vmul.f32 1.442695, %v3418_v54  ;;  %v9132_v4 = vadd.f32 %v3418_v54, %v2655_v48  ;;  %v3413_v8 = vadd.f32 %v8973_v16, %v3412_v53  ;;  %v9924_v15 = vld [vmem:[#allocation56_spill] sm:$0xff] }
 0x7bf   : > { %7069 = vmatmul.mubr.f32.gmra.mxu0 %v9121_v29  ;;  %v7569_v7 = vpop.eup %7568  ;;  %v6928_v36 = vpop.f32.mrf.mxu0  ;;  %v2657_v48 = vadd.f32 %v9924_v15, %v9923_v59  ;;  %v9925_v54 = vld [vmem:[#allocation28_spill] sm:$0xff]  ;;  %v9150_v19 = vmul.f32 %v7567_v57, %v3729_v18  ;;  %v3622_v40 = vadd.f32 %v9007_v44, %v9082_v5  ;;  %v3730_v59 = vadd.f32 %v3612_v21, %v8733_v14  ;;  %v9929_v14 = vld [vmem:[#allocation29_spill] sm:$0xff]  ;;  %v9930_v21 = vld [vmem:[#allocation58_spill] sm:$0xff] }
 0x7c0   : > { %9921 = vst [vmem:[#allocation19_spill] sm:$0xff] %v9132_v4  ;;  %v9141_v10 = vpop.f32.mrf.mxu1  ;;  %v9926_v4 = vld [vmem:[#allocation57_spill] sm:$0xff]  ;;  %v3428_v30 = vadd.f32 %v6928_v36, %v8973_v16  ;;  %v9148_v31 = vmul.f32 %v7569_v7, %v3728_v62  ;;  %v3784_v24 = vmul.f32 1.442695, %v3413_v8  ;;  %v9154_v13 = vadd.f32 %v3413_v8, %v2654_v35  ;;  %v9932_v8 = vld [vmem:[#allocation59_spill] sm:$0xff] }
 0x7c1   : > { %v2656_v28 = vadd.f32 %v9926_v4, %v9925_v54  ;;  %v3422_v53 = vpop.f32.mrf.mxu0  ;;  %7582 = vpow2.f32 %v3786_v27  ;;  %v3731_v57 = vadd.f32 %v3617_v52, %v8735_v43  ;;  %v3627_v5 = vadd.f32 %v9068_v60, %v9007_v44  ;;  %v9931_v27 = vld [vmem:[#allocation30_spill] sm:$0xff] }
 0x7c2   : > { %9927 = vst [vmem:[#allocation48_spill] sm:$0xff] %v9154_v13  ;;  %v9156_v56 = vpop.f32.mrf.mxu1  ;;  %v7571_v34 = vpop.eup %7570  ;;  %v3790_v4 = vmul.f32 1.442695, %v3428_v30  ;;  %v9159_v15 = vadd.f32 %v3428_v30, %v2657_v48  ;;  %7071 = vmatprep.mubr.f32.mxu0 %v9148_v31  ;;  %7584 = vpow2.f32 %v3784_v24  ;;  %v3423_v7 = vadd.f32 %v8973_v16, %v3422_v53 }
 0x7c3   : > { %v7573_v62 = vpop.eup %7572  ;;  %v6931_v35 = vpop.f32.mrf.mxu0  ;;  %7072 = vmatmul.mubr.f32.gmra.mxu0 %v9150_v19  ;;  %v2659_v30 = vadd.f32 %v9930_v21, %v9929_v14  ;;  %v2658_v36 = vadd.f32 %v9932_v8, %v9931_v27  ;;  %v9176_v52 = vmul.f32 %v7571_v34, %v3731_v57  ;;  %v3732_v60 = vadd.f32 %v3622_v40, %v8757_v17 }
 0x7c4   : > { %9928 = vst [vmem:[#allocation20_spill] sm:$0xff] %v9159_v15  ;;  %v9166_v18 = vpop.f32.mrf.mxu1  ;;  %v3438_v48 = vadd.f32 %v6931_v35, %v8973_v16  ;;  %v9174_v43 = vmul.f32 %v7573_v62, %v3730_v59  ;;  %v3788_v54 = vmul.f32 1.442695, %v3423_v7  ;;  %v9179_v24 = vadd.f32 %v3423_v7, %v2656_v28 }
 0x7c5   : > { %v3432_v53 = vpop.f32.mrf.mxu0  ;;  %v3632_v14 = vadd.f32 %v9007_v44, %v9106_v32  ;;  %7586 = vpow2.f32 %v3790_v4  ;;  %v3733_v59 = vadd.f32 %v3627_v5, %v8759_v25  ;;  %v3637_v17 = vadd.f32 %v9093_v33, %v9007_v44  ;;  %v9935_v32 = vld [vmem:[#allocation31_spill] sm:$0xff]  ;;  %v9936_v4 = vld [vmem:[#allocation60_spill] sm:$0xff]  ;;  %v9938_v25 = vld [vmem:[#allocation61_spill] sm:$0xff] }
 0x7c6   : > { %9933 = vst [vmem:[#allocation49_spill] sm:$0xff] %v9179_v24  ;;  %v9181_v15 = vpop.f32.mrf.mxu1  ;;  %v7575_v13 = vpop.eup %7574  ;;  %v3794_v21 = vmul.f32 1.442695, %v3438_v48  ;;  %v9185_v27 = vadd.f32 %v3438_v48, %v2659_v30  ;;  %7074 = vmatprep.mubr.f32.mxu0 %v9174_v43  ;;  %7588 = vpow2.f32 %v3788_v54  ;;  %v3433_v28 = vadd.f32 %v8973_v16, %v3432_v53  ;;  %v9937_v30 = vld [vmem:[#allocation32_spill] sm:$0xff] }
 0x7c7   : > { %v7577_v34 = vpop.eup %7576  ;;  %v6934_v40 = vpop.f32.mrf.mxu0  ;;  %7075 = vmatmul.mubr.f32.gmra.mxu0 %v9176_v52  ;;  %v2661_v57 = vadd.f32 %v9936_v4, %v9935_v32  ;;  %v2660_v5 = vadd.f32 %v9938_v25, %v9937_v30  ;;  %v9202_v8 = vmul.f32 %v7575_v13, %v3733_v59  ;;  %v3734_v24 = vadd.f32 %v3632_v14, %v8781_v63  ;;  %v9939_v63 = vld [vmem:[#allocation33_spill] sm:$0xff]  ;;  %v9941_v25 = vld [vmem:[#allocation34_spill] sm:$0xff] }
 0x7c8   : > { %9934 = vst [vmem:[#allocation21_spill] sm:$0xff] %v9185_v27  ;;  %v9192_v62 = vpop.f32.mrf.mxu1  ;;  %v3448_v7 = vadd.f32 %v6934_v40, %v8973_v16  ;;  %v9198_v35 = vmul.f32 %v7577_v34, %v3732_v60  ;;  %v3792_v33 = vmul.f32 1.442695, %v3433_v28  ;;  %v9204_v48 = vadd.f32 %v3433_v28, %v2658_v36 }
 0x7c9   : > { %v3442_v54 = vpop.f32.mrf.mxu0  ;;  %7590 = vpow2.f32 %v3794_v21  ;;  %v3735_v34 = vadd.f32 %v3637_v17, %v8783_v38  ;;  %v3642_v13 = vadd.f32 %v9007_v44, %v9127_v41  ;;  %v2663_v14 = vadd.f32 %v8775_v45, %v9939_v63 }
 0x7ca   : > { %v9206_v53 = vpop.f32.mrf.mxu1  ;;  %v7579_v27 = vpop.eup %7578  ;;  %v3798_v32 = vmul.f32 1.442695, %v3448_v7  ;;  %v9209_v4 = vadd.f32 %v3448_v7, %v2661_v57  ;;  %7077 = vmatprep.mubr.f32.mxu0 %v9198_v35  ;;  %7592 = vpow2.f32 %v3792_v33  ;;  %v3443_v36 = vadd.f32 %v8973_v16, %v3442_v54  ;;  %v9942_v33 = vld [vmem:[#allocation62_spill] sm:$0xff] }
 0x7cb   : > { %v7581_v60 = vpop.eup %7580  ;;  %v6937_v59 = vpop.f32.mrf.mxu0  ;;  %7078 = vmatmul.mubr.f32.gmra.mxu0 %v9202_v8  ;;  %v3647_v21 = vadd.f32 %v9117_v2, %v9007_v44  ;;  %v9226_v17 = vmul.f32 %v7579_v27, %v3735_v34  ;;  %v2662_v54 = vadd.f32 %v9942_v33, %v9941_v25  ;;  %v3652_v27 = vadd.f32 %v9007_v44, %v9156_v56  ;;  %v9945_v56 = vld [vmem:[#allocation36_spill] sm:$0xff] }
 0x7cc   : > { %v9216_v28 = vpop.f32.mrf.mxu1  ;;  %v3458_v40 = vadd.f32 %v6937_v59, %v8973_v16  ;;  %v9224_v38 = vmul.f32 %v7581_v60, %v3734_v24  ;;  %v3796_v41 = vmul.f32 1.442695, %v3443_v36  ;;  %v9228_v57 = vadd.f32 %v3443_v36, %v2660_v5  ;;  %v9944_v36 = vld [vmem:[#allocation35_spill] sm:$0xff] }
 0x7cd   : > { %v3452_v7 = vpop.f32.mrf.mxu0  ;;  %7594 = vpow2.f32 %v3798_v32  ;;  %v3736_v24 = vadd.f32 %v3642_v13, %v8803_v23  ;;  %v2665_v32 = vadd.f32 %v8797_v6, %v9944_v36  ;;  %v3737_v59 = vadd.f32 %v3647_v21, %v8805_v50 }
 0x7ce   : > { %9940 = vst [vmem:[#allocation50_spill] sm:$0xff] %v9228_v57  ;;  %v9230_v30 = vpop.f32.mrf.mxu1  ;;  %v3802_v45 = vmul.f32 1.442695, %v3458_v40  ;;  %v9234_v63 = vadd.f32 %v3458_v40, %v2663_v14  ;;  %7080 = vmatprep.mubr.f32.mxu0 %v9224_v38  ;;  %v7583_v2 = vpop.eup %7582  ;;  %7596 = vpow2.f32 %v3796_v41  ;;  %v3453_v5 = vadd.f32 %v8973_v16, %v3452_v7  ;;  %v9946_v40 = vld [vmem:[#allocation63_spill] sm:$0xff] }
 0x7cf   : > { %v6940_v60 = vpop.f32.mrf.mxu0  ;;  %7081 = vmatmul.mubr.f32.gmra.mxu0 %v9226_v17  ;;  %v7585_v34 = vpop.eup %7584  ;;  %v3657_v14 = vadd.f32 %v9141_v10, %v9007_v44  ;;  %v2664_v41 = vadd.f32 %v9946_v40, %v9945_v56  ;;  %v9256_v57 = vmul.f32 %v7583_v2, %v3737_v59  ;;  %v3738_v21 = vadd.f32 %v3652_v27, %v8823_v42  ;;  %v9949_v27 = vld [vmem:[#allocation64_spill] sm:$0xff] }
 0x7d0   : > { %9943 = vst [vmem:[#allocation22_spill] sm:$0xff] %v9234_v63  ;;  %v3468_v23 = vadd.f32 %v6940_v60, %v8973_v16  ;;  %v9248_v13 = vpop.f32.mrf.mxu1  ;;  %v3800_v7 = vmul.f32 1.442695, %v3453_v5  ;;  %v9252_v25 = vadd.f32 %v3453_v5, %v2662_v54  ;;  %v9254_v63 = vmul.f32 %v7585_v34, %v3736_v24  ;;  %v9947_v5 = vld [vmem:[#allocation37_spill] sm:$0xff] }
 0x7d1   : > { %v3462_v33 = vpop.f32.mrf.mxu0  ;;  %7598 = vpow2.f32 %v3802_v45  ;;  %v3662_v60 = vadd.f32 %v9007_v44, %v9181_v15  ;;  %v2667_v2 = vadd.f32 %v8819_v20, %v9947_v5  ;;  %v3739_v45 = vadd.f32 %v3657_v14, %v8825_v51  ;;  %v9948_v15 = vld [vmem:[#allocation38_spill] sm:$0xff] }
 0x7d2   : > { %v3806_v6 = vmul.f32 1.442695, %v3468_v23  ;;  %v9258_v50 = vadd.f32 %v3468_v23, %v2665_v32  ;;  %v7587_v10 = vpop.eup %7586  ;;  %7600 = vpow2.f32 %v3800_v7  ;;  %v3463_v36 = vadd.f32 %v8973_v16, %v3462_v33  ;;  %7083 = vmatprep.mubr.f32.mxu0 %v9254_v63  ;;  %v3691_v32 = vpop.f32.mrf.mxu1 }
 0x7d3   : > { %v6943_v54 = vpop.f32.mrf.mxu0  ;;  %v7589_v24 = vpop.eup %7588  ;;  %v3667_v34 = vadd.f32 %v9166_v18, %v9007_v44  ;;  %7084 = vmatmul.mubr.f32.gmra.mxu0 %v9256_v57  ;;  %v2666_v59 = vadd.f32 %v9949_v27, %v9948_v15  ;;  %v9278_v20 = vmul.f32 %v7587_v10, %v3739_v45  ;;  %v3740_v33 = vadd.f32 %v3662_v60, %v8843_v12 }
 0x7d4   : > { %v3478_v42 = vadd.f32 %v6943_v54, %v8973_v16  ;;  %v3804_v23 = vmul.f32 1.442695, %v3463_v36  ;;  %v9274_v56 = vadd.f32 %v3463_v36, %v2664_v41  ;;  %v9276_v7 = vmul.f32 %v7589_v24, %v3738_v21  ;;  %v9950_v36 = vld [vmem:[#allocation39_spill] sm:$0xff] }
 0x7d5   : > { %v3472_v40 = vpop.f32.mrf.mxu0  ;;  %7602 = vpow2.f32 %v3806_v6  ;;  %v3672_v54 = vadd.f32 %v9007_v44, %v9206_v53  ;;  %v2669_v10 = vadd.f32 %v8839_v47, %v9950_v36  ;;  %v3741_v6 = vadd.f32 %v3667_v34, %v8845_v0  ;;  %v9951_v53 = vld [vmem:[#allocation40_spill] sm:$0xff] }
 0x7d6   : > { %v3810_v51 = vmul.f32 1.442695, %v3478_v42  ;;  %v9280_v14 = vadd.f32 %v3478_v42, %v2667_v2  ;;  %v7591_v18 = vpop.eup %7590  ;;  %7604 = vpow2.f32 %v3804_v23  ;;  %v3473_v5 = vadd.f32 %v8973_v16, %v3472_v40  ;;  %7086 = vmatprep.mubr.f32.mxu0 %v9276_v7  ;;  %v7023_v2 = vpop.f32.mrf.mxu1 }
 0x7d7   : > { %v6946_v41 = vpop.f32.mrf.mxu0  ;;  %v7593_v21 = vpop.eup %7592  ;;  %v3677_v24 = vadd.f32 %v9192_v62, %v9007_v44  ;;  %7087 = vmatmul.mubr.f32.gmra.mxu0 %v9278_v20  ;;  %v2668_v60 = vadd.f32 %v8852_v22, %v9951_v53  ;;  %v9300_v47 = vmul.f32 %v7591_v18, %v3741_v6  ;;  %v3742_v23 = vadd.f32 %v3672_v54, %v8860_v26 }
 0x7d8   : > { %v3488_v12 = vadd.f32 %v6946_v41, %v8973_v16  ;;  %v3808_v45 = vmul.f32 1.442695, %v3473_v5  ;;  %v9296_v42 = vadd.f32 %v3473_v5, %v2666_v59  ;;  %v9298_v27 = vmul.f32 %v7593_v21, %v3740_v33  ;;  %v3701_v18 = vpop.f32.mrf.mxu1 }
 0x7d9   : > { %v3482_v15 = vpop.f32.mrf.mxu0  ;;  %7606 = vpow2.f32 %v3810_v51  ;;  %v3682_v40 = vadd.f32 %v9007_v44, %v9230_v30  ;;  %v3743_v33 = vadd.f32 %v3677_v24, %v8862_v11  ;;  %v3687_v51 = vadd.f32 %v9216_v28, %v9007_v44 }
 0x7da   : > { %v3814_v0 = vmul.f32 1.442695, %v3488_v12  ;;  %v9302_v34 = vadd.f32 %v3488_v12, %v2669_v10  ;;  %v7595_v62 = vpop.eup %7594  ;;  %7608 = vpow2.f32 %v3808_v45  ;;  %v3483_v22 = vadd.f32 %v8973_v16, %v3482_v15  ;;  %7089 = vmatprep.mubr.f32.mxu0 %v9298_v27  ;;  %v7026_v10 = vpop.f32.mrf.mxu1 }
 0x7db   : > { %v7597_v59 = vpop.eup %7596  ;;  %7090 = vmatmul.mubr.f32.gmra.mxu0 %v9300_v47  ;;  %v9317_v30 = vmul.f32 %v7595_v62, %v3743_v33  ;;  %v3744_v54 = vadd.f32 %v3682_v40, %v8871_v55  ;;  %v3692_v21 = vadd.f32 %v9007_v44, %v3691_v32  ;;  %v3745_v28 = vadd.f32 %v3687_v51, %v8873_v58 }
 0x7dc   : > { %v3812_v5 = vmul.f32 1.442695, %v3483_v22  ;;  %v9313_v41 = vadd.f32 %v3483_v22, %v2668_v60  ;;  %v9315_v26 = vmul.f32 %v7597_v59, %v3742_v23  ;;  %7610 = vpow2.f32 %v3814_v0  ;;  %v9952_v60 = vld [vmem:[#allocation65_spill] sm:$0xff]  ;;  %v9953_v23 = vld [vmem:[#allocation66_spill] sm:$0xff]  ;;  %v9954_v59 = vld [vmem:[#allocation67_spill] sm:$0xff] }
 0x7dd   : > { %v3697_v36 = vadd.f32 %v9248_v13, %v9007_v44  ;;  %v3746_v55 = vadd.f32 %v3692_v21, %v8881_v49  ;;  %v3702_v32 = vadd.f32 %v9007_v44, %v3701_v18  ;;  %v3707_v45 = vadd.f32 %v7023_v2, %v9007_v44  ;;  %v3711_v13 = vpop.f32.mrf.mxu1 }
 0x7de   : > { %v7599_v16 = vpop.eup %7598  ;;  %7612 = vpow2.f32 %v3812_v5  ;;  %7092 = vmatprep.mubr.f32.mxu0 %v9315_v26  ;;  %v3712_v49 = vadd.f32 %v9007_v44, %v3711_v13  ;;  %v3717_v51 = vadd.f32 %v7026_v10, %v9007_v44  ;;  %v3897_v44 = vld [vmem:[#allocation5 + $0x608] sm:$0xff]  ;;  %v3928_v10 = vld [vmem:[#allocation5 + $0x7f0] sm:$0xff] }
 0x7df   : > { %v7601_v11 = vpop.eup %7600  ;;  %7093 = vmatmul.mubr.f32.gmra.mxu0 %v9317_v30  ;;  %v9328_v24 = vmul.f32 %v7599_v16, %v3745_v28  ;;  %v3747_v58 = vadd.f32 %v3697_v36, %v9952_v60  ;;  %v3748_v40 = vadd.f32 %v3702_v32, %v9953_v23  ;;  %v3749_v33 = vadd.f32 %v3707_v45, %v9954_v59  ;;  %v9955_v16 = vld [vmem:[#allocation68_spill] sm:$0xff]  ;;  %v3944_v32 = vld [vmem:[#allocation5 + $0x7f8] sm:$0xff] }
 0x7e0   : > { %v9326_v6 = vmul.f32 %v7601_v11, %v3744_v54  ;;  %v3750_v54 = vadd.f32 %v3712_v49, %v9955_v16  ;;  %v9956_v11 = vld [vmem:[#allocation69_spill] sm:$0xff]  ;;  %7137 = vmatprep.subr.mxu1 %v3897_v44  ;;  %7187 = vmatprep.subr.mxu0 %v3928_v10  ;;  %v3925_v60 = vld [vmem:[#allocation5 + $0x790] sm:$0xff] }
 0x7e1   : > { %v3751_v28 = vadd.f32 %v3717_v51, %v9956_v11  ;;  %7138 = vmatpush3.msra.mxu1 %v3897_v44  ;;  %7188 = vmatpush3.msra.mxu0 %v3928_v10  ;;  %v3923_v45 = vld [vmem:[#allocation5 + $0x750] sm:$0xff] }
 0x7e2   : > { %v7603_v12 = vpop.eup %7602  ;;  %7095 = vmatprep.mubr.f32.mxu0 %v9326_v6  ;;  %7267 = vmatprep.subr.mxu1 %v3944_v32  ;;  %v3922_v13 = vld [vmem:[#allocation5 + $0x730] sm:$0xff] }
 0x7e3   : > { %v7605_v53 = vpop.eup %7604  ;;  %7096 = vmatmul.mubr.f32.gmra.mxu0 %v9328_v24  ;;  %v9338_v0 = vmul.f32 %v7603_v12, %v3747_v58  ;;  %v3924_v58 = vld [vmem:[#allocation5 + $0x770] sm:$0xff] }
 0x7e4   : > { %v9336_v15 = vmul.f32 %v7605_v53, %v3746_v55  ;;  %v3927_v55 = vld [vmem:[#allocation5 + $0x7d0] sm:$0xff] }
 0x7e5   : > { %v3926_v53 = vld [vmem:[#allocation5 + $0x7b0] sm:$0xff]  ;;  %7189 = vmatprep.subr.mxu0 %v3927_v55 }
 0x7e6   : > { %v7607_v62 = vpop.eup %7606  ;;  %7098 = vmatprep.mubr.f32.mxu0 %v9336_v15  ;;  %7190 = vmatpush3.msra.mxu0 %v3927_v55  ;;  %v3920_v23 = vld [vmem:[#allocation5 + $0x6f0] sm:$0xff] }
 0x7e7   : > { %v7609_v22 = vpop.eup %7608  ;;  %7099 = vmatmul.mubr.f32.gmra.mxu0 %v9338_v0  ;;  %v9348_v18 = vmul.f32 %v7607_v62, %v3749_v33  ;;  %7191 = vmatprep.subr.mxu0 %v3926_v53  ;;  %v3921_v62 = vld [vmem:[#allocation5 + $0x710] sm:$0xff] }
 0x7e8   : > { %v9346_v2 = vmul.f32 %v7609_v22, %v3748_v40  ;;  %7192 = vmatpush3.msra.mxu0 %v3926_v53  ;;  %v3919_v40 = vld [vmem:[#allocation5 + $0x6d0] sm:$0xff] }
 0x7e9   : > { %v7611_v5 = vpop.eup %7610  ;;  %7193 = vmatprep.subr.mxu0 %v3925_v60  ;;  %v3918_v49 = vld [vmem:[#allocation5 + $0x6b0] sm:$0xff] }
 0x7ea   : > { %7101 = vmatprep.mubr.f32.mxu0 %v9346_v2  ;;  %v9356_v12 = vmul.f32 %v7611_v5, %v3751_v28  ;;  %7194 = vmatpush3.msra.mxu0 %v3925_v60  ;;  %v3917_v22 = vld [vmem:[#allocation5 + $0x690] sm:$0xff]  ;;  %v9360_v5 = vld [vmem:[#allocation7 + $0xc] ss:$0 sm:$0xff] }
 0x7eb   : > { %v7613_v21 = vpop.eup %7612  ;;  %7102 = vmatmul.mubr.f32.gmra.mxu0 %v9348_v18  ;;  %7195 = vmatprep.subr.mxu0 %v3924_v58  ;;  %v3916_v59 = vld [vmem:[#allocation5 + $0x670] sm:$0xff] }
 0x7ec   : > { %v9354_v36 = vmul.f32 %v7613_v21, %v3750_v54  ;;  %9958 = vst [vmem:[#allocation51_spill] sm:$0xff] %v9356_v12  ;;  %7196 = vmatpush3.msra.mxu0 %v3924_v58  ;;  %v3915_v33 = vld [vmem:[#allocation5 + $0x650] sm:$0xff]  ;;  %v3943_v58 = vld [vmem:[#allocation5 + $0x7d8] sm:$0xff] }
 0x7ed   : > { %7197 = vmatprep.subr.mxu0 %v3923_v45  ;;  %v3914_v51 = vld [vmem:[#allocation5 + $0x630] sm:$0xff] }
 0x7ee   : > { %9957 = vst [vmem:[#allocation23_spill] sm:$0xff] %v9354_v36  ;;  %7104 = vmatprep.mubr.f32.mxu0 %v9354_v36  ;;  %7198 = vmatpush3.msra.mxu0 %v3923_v45 }
 0x7ef   : > { %7105 = vmatmul.mubr.f32.gmra.mxu0 %v9356_v12  ;;  %7199 = vmatprep.subr.mxu0 %v3922_v13 }
 0x7f0   : > { %7200 = vmatpush3.msra.mxu0 %v3922_v13 }
 0x7f1   : > { %7201 = vmatprep.subr.mxu0 %v3921_v62 }
 0x7f2   : > { %7202 = vmatpush3.msra.mxu0 %v3921_v62  ;;  %v3942_v62 = vld [vmem:[#allocation5 + $0x7b8] sm:$0xff] }
 0x7f3   : > { %7203 = vmatprep.subr.mxu0 %v3920_v23 }
 0x7f4   : > { %7204 = vmatpush3.msra.mxu0 %v3920_v23 }
 0x7f5   : > { %7205 = vmatprep.subr.mxu0 %v3919_v40 }
 0x7f6   : > { %7206 = vmatpush3.msra.mxu0 %v3919_v40 }
 0x7f7   : > { %7207 = vmatprep.subr.mxu0 %v3918_v49 }
 0x7f8   : > { %7208 = vmatpush3.msra.mxu0 %v3918_v49 }
 0x7f9   : > { %7209 = vmatprep.subr.mxu0 %v3917_v22 }
 0x7fa   : > { %7210 = vmatpush3.msra.mxu0 %v3917_v22 }
 0x7fb   : > { %7211 = vmatprep.subr.mxu0 %v3916_v59 }
 0x7fc   : > { %7212 = vmatpush3.msra.mxu0 %v3916_v59  ;;  %v3941_v59 = vld [vmem:[#allocation5 + $0x798] sm:$0xff] }
 0x7fd   : > { %7213 = vmatprep.subr.mxu0 %v3915_v33 }
 0x7fe   : > { %7214 = vmatpush3.msra.mxu0 %v3915_v33 }
 0x7ff   : > { %7215 = vmatprep.subr.mxu0 %v3914_v51 }
 0x800   : > { %7216 = vmatpush3.msra.mxu0 %v3914_v51 }
 0x873   : > { %v7061_v16 = vpop.f32.mrf.mxu0 }
 0x874   : > { %v4026_v54 = vadd.f32 %v7061_v16, %v9360_v5  ;;  %v3940_v16 = vld [vmem:[#allocation5 + $0x778] sm:$0xff] }
 0x875   : > { %v4020_v21 = vpop.f32.mrf.mxu0 }
 0x876   : > { %v4021_v11 = vadd.f32 %v9360_v5, %v4020_v21  ;;  %v4180_v10 = vmax.f32 %v4026_v54, 0.0 }
 0x877   : > { %v7064_v28 = vpop.f32.mrf.mxu0 }
 0x878   : > { %v4179_v44 = vmax.f32 %v4021_v11, 0.0  ;;  %v4036_v55 = vadd.f32 %v7064_v28, %v9360_v5  ;;  %v3939_v28 = vld [vmem:[#allocation5 + $0x758] sm:$0xff] }
 0x879   : > { %v4030_v53 = vpop.f32.mrf.mxu0 }
 0x87a   : > { %v4031_v60 = vadd.f32 %v9360_v5, %v4030_v53  ;;  %7139 = vmatprep.mubr.f32.mxu1 %v4179_v44  ;;  %v4182_v23 = vmax.f32 %v4036_v55, 0.0  ;;  %v3938_v55 = vld [vmem:[#allocation5 + $0x738] sm:$0xff] }
 0x87b   : > { %v7067_v45 = vpop.f32.mrf.mxu0  ;;  %7140 = vmatmul.mubr.f32.vlgmr.msra.gmra.mxu1 %v4180_v10 }
 0x87c   : > { %v4181_v13 = vmax.f32 %v4031_v60, 0.0  ;;  %7268 = vmatpush3.msra.mxu1 %v3944_v32  ;;  %v4046_v40 = vadd.f32 %v7067_v45, %v9360_v5  ;;  %v3937_v45 = vld [vmem:[#allocation5 + $0x718] sm:$0xff] }
 0x87d   : > { %v4040_v49 = vpop.f32.mrf.mxu0  ;;  %7269 = vmatprep.subr.mxu1 %v3943_v58 }
 0x87e   : > { %v4041_v22 = vadd.f32 %v9360_v5, %v4040_v49  ;;  %7142 = vmatprep.mubr.f32.mxu1 %v4181_v13  ;;  %7270 = vmatpush3.msra.mxu1 %v3943_v58  ;;  %v4184_v54 = vmax.f32 %v4046_v40, 0.0 }
 0x87f   : > { %v7070_v33 = vpop.f32.mrf.mxu0  ;;  %7143 = vmatmul.mubr.f32.gmra.mxu1 %v4182_v23  ;;  %7271 = vmatprep.subr.mxu1 %v3942_v62  ;;  %v3936_v23 = vld [vmem:[#allocation5 + $0x6f8] sm:$0xff] }
 0x880   : > { %v4183_v51 = vmax.f32 %v4041_v22, 0.0  ;;  %7272 = vmatpush3.msra.mxu1 %v3942_v62  ;;  %v4056_v32 = vadd.f32 %v7070_v33, %v9360_v5 }
 0x881   : > { %v4050_v21 = vpop.f32.mrf.mxu0  ;;  %7273 = vmatprep.subr.mxu1 %v3941_v59 }
 0x882   : > { %v4051_v11 = vadd.f32 %v9360_v5, %v4050_v21  ;;  %7145 = vmatprep.mubr.f32.mxu1 %v4183_v51  ;;  %7274 = vmatpush3.msra.mxu1 %v3941_v59  ;;  %v4186_v53 = vmax.f32 %v4056_v32, 0.0  ;;  %v3935_v51 = vld [vmem:[#allocation5 + $0x6d8] sm:$0xff] }
 0x883   : > { %7146 = vmatmul.mubr.f32.gmra.mxu1 %v4184_v54  ;;  %7275 = vmatprep.subr.mxu1 %v3940_v16  ;;  %v7073_v10 = vpop.f32.mrf.mxu0  ;;  %v3934_v32 = vld [vmem:[#allocation5 + $0x6b8] sm:$0xff] }
 0x884   : > { %v4185_v44 = vmax.f32 %v4051_v11, 0.0  ;;  %7276 = vmatpush3.msra.mxu1 %v3940_v16  ;;  %v4066_v60 = vadd.f32 %v7073_v10, %v9360_v5  ;;  %v3933_v10 = vld [vmem:[#allocation5 + $0x698] sm:$0xff] }
 0x885   : > { %7277 = vmatprep.subr.mxu1 %v3939_v28  ;;  %v4060_v58 = vpop.f32.mrf.mxu0 }
 0x886   : > { %7148 = vmatprep.mubr.f32.mxu1 %v4185_v44  ;;  %7278 = vmatpush3.msra.mxu1 %v3939_v28  ;;  %v4061_v13 = vadd.f32 %v9360_v5, %v4060_v58  ;;  %v4188_v49 = vmax.f32 %v4066_v60, 0.0 }
 0x887   : > { %7149 = vmatmul.mubr.f32.gmra.mxu1 %v4186_v53  ;;  %7279 = vmatprep.subr.mxu1 %v3938_v55  ;;  %v7076_v62 = vpop.f32.mrf.mxu0 }
 0x888   : > { %7280 = vmatpush3.msra.mxu1 %v3938_v55  ;;  %v4187_v40 = vmax.f32 %v4061_v13, 0.0  ;;  %v4076_v22 = vadd.f32 %v7076_v62, %v9360_v5 }
 0x889   : > { %7281 = vmatprep.subr.mxu1 %v3937_v45  ;;  %v4070_v59 = vpop.f32.mrf.mxu0 }
 0x88a   : > { %7282 = vmatpush3.msra.mxu1 %v3937_v45  ;;  %v4071_v33 = vadd.f32 %v9360_v5, %v4070_v59  ;;  %7151 = vmatprep.mubr.f32.mxu1 %v4187_v40  ;;  %v4190_v21 = vmax.f32 %v4076_v22, 0.0 }
 0x88b   : > { %7283 = vmatprep.subr.mxu1 %v3936_v23  ;;  %v7079_v16 = vpop.f32.mrf.mxu0  ;;  %7152 = vmatmul.mubr.f32.gmra.mxu1 %v4188_v49 }
 0x88c   : > { %v4189_v54 = vmax.f32 %v4071_v33, 0.0  ;;  %7284 = vmatpush3.msra.mxu1 %v3936_v23  ;;  %v4086_v11 = vadd.f32 %v7079_v16, %v9360_v5 }
 0x88d   : > { %v4080_v28 = vpop.f32.mrf.mxu0  ;;  %7285 = vmatprep.subr.mxu1 %v3935_v51 }
 0x88e   : > { %v4081_v44 = vadd.f32 %v9360_v5, %v4080_v28  ;;  %7154 = vmatprep.mubr.f32.mxu1 %v4189_v54  ;;  %7286 = vmatpush3.msra.mxu1 %v3935_v51  ;;  %v4192_v60 = vmax.f32 %v4086_v11, 0.0 }
 0x88f   : > { %v7082_v55 = vpop.f32.mrf.mxu0  ;;  %7155 = vmatmul.mubr.f32.gmra.mxu1 %v4190_v21  ;;  %7287 = vmatprep.subr.mxu1 %v3934_v32 }
 0x890   : > { %v4191_v53 = vmax.f32 %v4081_v44, 0.0  ;;  %7288 = vmatpush3.msra.mxu1 %v3934_v32  ;;  %v4096_v58 = vadd.f32 %v7082_v55, %v9360_v5 }
 0x891   : > { %v4090_v45 = vpop.f32.mrf.mxu0  ;;  %7289 = vmatprep.subr.mxu1 %v3933_v10 }
 0x892   : > { %v4091_v13 = vadd.f32 %v9360_v5, %v4090_v45  ;;  %7157 = vmatprep.mubr.f32.mxu1 %v4191_v53  ;;  %7290 = vmatpush3.msra.mxu1 %v3933_v10  ;;  %v4194_v40 = vmax.f32 %v4096_v58, 0.0 }
 0x893   : > { %7158 = vmatmul.mubr.f32.gmra.mxu1 %v4192_v60  ;;  %v7085_v23 = vpop.f32.mrf.mxu0 }
 0x894   : > { %v4193_v62 = vmax.f32 %v4091_v13, 0.0  ;;  %v4106_v49 = vadd.f32 %v7085_v23, %v9360_v5 }
 0x895   : > { %v4100_v22 = vpop.f32.mrf.mxu0 }
 0x896   : > { %7160 = vmatprep.mubr.f32.mxu1 %v4193_v62  ;;  %v4101_v59 = vadd.f32 %v9360_v5, %v4100_v22  ;;  %v4196_v16 = vmax.f32 %v4106_v49, 0.0 }
 0x897   : > { %7161 = vmatmul.mubr.f32.gmra.mxu1 %v4194_v40  ;;  %v7088_v33 = vpop.f32.mrf.mxu0 }
 0x898   : > { %v4195_v51 = vmax.f32 %v4101_v59, 0.0  ;;  %v4116_v54 = vadd.f32 %v7088_v33, %v9360_v5 }
 0x899   : > { %v4110_v32 = vpop.f32.mrf.mxu0 }
 0x89a   : > { %v4111_v21 = vadd.f32 %v9360_v5, %v4110_v32  ;;  %7163 = vmatprep.mubr.f32.mxu1 %v4195_v51  ;;  %v4198_v44 = vmax.f32 %v4116_v54, 0.0 }
 0x89b   : > { %v7091_v11 = vpop.f32.mrf.mxu0  ;;  %7164 = vmatmul.mubr.f32.gmra.mxu1 %v4196_v16 }
 0x89c   : > { %v4197_v28 = vmax.f32 %v4111_v21, 0.0  ;;  %v4126_v10 = vadd.f32 %v7091_v11, %v9360_v5 }
 0x89d   : > { %v4120_v55 = vpop.f32.mrf.mxu0 }
 0x89e   : > { %v4121_v53 = vadd.f32 %v9360_v5, %v4120_v55  ;;  %7166 = vmatprep.mubr.f32.mxu1 %v4197_v28  ;;  %v4200_v45 = vmax.f32 %v4126_v10, 0.0 }
 0x89f   : > { %v7094_v60 = vpop.f32.mrf.mxu0  ;;  %7167 = vmatmul.mubr.f32.gmra.mxu1 %v4198_v44 }
 0x8a0   : > { %v4199_v58 = vmax.f32 %v4121_v53, 0.0  ;;  %v4136_v13 = vadd.f32 %v7094_v60, %v9360_v5 }
 0x8a1   : > { %v4130_v62 = vpop.f32.mrf.mxu0 }
 0x8a2   : > { %v4131_v23 = vadd.f32 %v9360_v5, %v4130_v62  ;;  %7169 = vmatprep.mubr.f32.mxu1 %v4199_v58  ;;  %v4202_v22 = vmax.f32 %v4136_v13, 0.0 }
 0x8a3   : > { %v7097_v40 = vpop.f32.mrf.mxu0  ;;  %7170 = vmatmul.mubr.f32.gmra.mxu1 %v4200_v45 }
 0x8a4   : > { %v4201_v49 = vmax.f32 %v4131_v23, 0.0  ;;  %v4146_v59 = vadd.f32 %v7097_v40, %v9360_v5 }
 0x8a5   : > { %v4140_v33 = vpop.f32.mrf.mxu0 }
 0x8a6   : > { %v4141_v51 = vadd.f32 %v9360_v5, %v4140_v33  ;;  %7172 = vmatprep.mubr.f32.mxu1 %v4201_v49  ;;  %v4204_v32 = vmax.f32 %v4146_v59, 0.0  ;;  %v3932_v33 = vld [vmem:[#allocation5 + $0x678] sm:$0xff] }
 0x8a7   : > { %v7100_v16 = vpop.f32.mrf.mxu0  ;;  %7173 = vmatmul.mubr.f32.gmra.mxu1 %v4202_v22  ;;  %7291 = vmatprep.subr.mxu1 %v3932_v33 }
 0x8a8   : > { %v4203_v54 = vmax.f32 %v4141_v51, 0.0  ;;  %v4156_v21 = vadd.f32 %v7100_v16, %v9360_v5  ;;  %7292 = vmatpush3.msra.mxu1 %v3932_v33  ;;  %v3931_v51 = vld [vmem:[#allocation5 + $0x658] sm:$0xff]  ;;  %v3913_v16 = vld [vmem:[#allocation5 + $0x610] sm:$0xff] }
 0x8a9   : > { %v4150_v11 = vpop.f32.mrf.mxu0  ;;  %7293 = vmatprep.subr.mxu1 %v3931_v51  ;;  %7217 = vmatprep.subr.mxu0 %v3913_v16 }
 0x8aa   : > { %v4151_v28 = vadd.f32 %v9360_v5, %v4150_v11  ;;  %7175 = vmatprep.mubr.f32.mxu1 %v4203_v54  ;;  %v4206_v55 = vmax.f32 %v4156_v21, 0.0  ;;  %7294 = vmatpush3.msra.mxu1 %v3931_v51  ;;  %v3930_v54 = vld [vmem:[#allocation5 + $0x638] sm:$0xff] }
 0x8ab   : > { %v7103_v44 = vpop.f32.mrf.mxu0  ;;  %7176 = vmatmul.mubr.f32.gmra.mxu1 %v4204_v32  ;;  %7295 = vmatprep.subr.mxu1 %v3930_v54  ;;  %v3929_v32 = vld [vmem:[#allocation5 + $0x618] sm:$0xff] }
 0x8ac   : > { %v4205_v10 = vmax.f32 %v4151_v28, 0.0  ;;  %v4166_v53 = vadd.f32 %v7103_v44, %v9360_v5  ;;  %7218 = vmatpush3.msra.mxu0 %v3913_v16  ;;  %7296 = vmatpush3.msra.mxu1 %v3930_v54 }
 0x8ad   : > { %v4160_v60 = vpop.f32.mrf.mxu0  ;;  %7297 = vmatprep.subr.mxu1 %v3929_v32 }
 0x8ae   : > { %v4161_v58 = vadd.f32 %v9360_v5, %v4160_v60  ;;  %7178 = vmatprep.mubr.f32.mxu1 %v4205_v10  ;;  %v4208_v62 = vmax.f32 %v4166_v53, 0.0  ;;  %7298 = vmatpush3.msra.mxu1 %v3929_v32 }
 0x8af   : > { %v7106_v45 = vpop.f32.mrf.mxu0  ;;  %7179 = vmatmul.mubr.f32.gmra.mxu1 %v4206_v55 }
 0x8b0   : > { %v4207_v13 = vmax.f32 %v4161_v58, 0.0  ;;  %v4176_v23 = vadd.f32 %v7106_v45, %v9360_v5 }
 0x8b1   : > { %v4170_v40 = vpop.f32.mrf.mxu0 }
 0x8b2   : > { %v4171_v49 = vadd.f32 %v9360_v5, %v4170_v40  ;;  %7181 = vmatprep.mubr.f32.mxu1 %v4207_v13  ;;  %v4210_v59 = vmax.f32 %v4176_v23, 0.0  ;;  %v9394_v5 = vld [vmem:[#allocation7 + $0xd] ss:$0 sm:$0xff] }
 0x8b3   : > { %7182 = vmatmul.mubr.f32.gmra.mxu1 %v4208_v62 }
 0x8b4   : > { %v4209_v22 = vmax.f32 %v4171_v49, 0.0 }
 0x8b6   : > { %7184 = vmatprep.mubr.f32.mxu1 %v4209_v22 }
 0x8b7   : > { %7185 = vmatmul.mubr.f32.gmra.mxu1 %v4210_v59 }
 0x93b   : > { %v7141_v21 = vpop.f32.mrf.mxu1 }
 0x93c   : > { %v4287_v11 = vadd.f32 %v7141_v21, %v9394_v5 }
 0x93d   : > { %v4281_v28 = vpop.f32.mrf.mxu1 }
 0x93e   : > { %v4282_v44 = vadd.f32 %v9394_v5, %v4281_v28  ;;  %v4441_v53 = vmax.f32 %v4287_v11, 0.0 }
 0x93f   : > { %v7144_v10 = vpop.f32.mrf.mxu1 }
 0x940   : > { %v4440_v55 = vmax.f32 %v4282_v44, 0.0  ;;  %v4297_v60 = vadd.f32 %v7144_v10, %v9394_v5 }
 0x941   : > { %v4291_v58 = vpop.f32.mrf.mxu1 }
 0x942   : > { %v4292_v45 = vadd.f32 %v9394_v5, %v4291_v58  ;;  %7219 = vmatprep.mubr.f32.mxu0 %v4440_v55  ;;  %7299 = vmatprep.mubr.f32.mxu1 %v4440_v55  ;;  %v4443_v23 = vmax.f32 %v4297_v60, 0.0 }
 0x943   : > { %v7147_v13 = vpop.f32.mrf.mxu1  ;;  %7220 = vmatmul.mubr.f32.vlgmr.msra.gmra.mxu0 %v4441_v53  ;;  %7300 = vmatmul.mubr.f32.vlgmr.msra.gmra.mxu1 %v4441_v53 }
 0x944   : > { %v4442_v62 = vmax.f32 %v4292_v45, 0.0  ;;  %v4307_v40 = vadd.f32 %v7147_v13, %v9394_v5 }
 0x945   : > { %v4301_v49 = vpop.f32.mrf.mxu1 }
 0x946   : > { %v4302_v22 = vadd.f32 %v9394_v5, %v4301_v49  ;;  %7222 = vmatprep.mubr.f32.mxu0 %v4442_v62  ;;  %7302 = vmatprep.mubr.f32.mxu1 %v4442_v62  ;;  %v4445_v51 = vmax.f32 %v4307_v40, 0.0 }
 0x947   : > { %v7150_v59 = vpop.f32.mrf.mxu1  ;;  %7223 = vmatmul.mubr.f32.gmra.mxu0 %v4443_v23  ;;  %7303 = vmatmul.mubr.f32.gmra.mxu1 %v4443_v23 }
 0x948   : > { %v4444_v33 = vmax.f32 %v4302_v22, 0.0  ;;  %v4317_v16 = vadd.f32 %v7150_v59, %v9394_v5 }
 0x949   : > { %v4311_v54 = vpop.f32.mrf.mxu1 }
 0x94a   : > { %v4312_v32 = vadd.f32 %v9394_v5, %v4311_v54  ;;  %7225 = vmatprep.mubr.f32.mxu0 %v4444_v33  ;;  %7305 = vmatprep.mubr.f32.mxu1 %v4444_v33  ;;  %v4447_v28 = vmax.f32 %v4317_v16, 0.0 }
 0x94b   : > { %7226 = vmatmul.mubr.f32.gmra.mxu0 %v4445_v51  ;;  %7306 = vmatmul.mubr.f32.gmra.mxu1 %v4445_v51  ;;  %v7153_v11 = vpop.f32.mrf.mxu1 }
 0x94c   : > { %v4446_v21 = vmax.f32 %v4312_v32, 0.0  ;;  %v4327_v44 = vadd.f32 %v7153_v11, %v9394_v5 }
 0x94d   : > { %v4321_v10 = vpop.f32.mrf.mxu1 }
 0x94e   : > { %7228 = vmatprep.mubr.f32.mxu0 %v4446_v21  ;;  %7308 = vmatprep.mubr.f32.mxu1 %v4446_v21  ;;  %v4322_v55 = vadd.f32 %v9394_v5, %v4321_v10  ;;  %v4449_v58 = vmax.f32 %v4327_v44, 0.0 }
 0x94f   : > { %7229 = vmatmul.mubr.f32.gmra.mxu0 %v4447_v28  ;;  %7309 = vmatmul.mubr.f32.gmra.mxu1 %v4447_v28  ;;  %v7156_v53 = vpop.f32.mrf.mxu1 }
 0x950   : > { %v4448_v60 = vmax.f32 %v4322_v55, 0.0  ;;  %v4337_v45 = vadd.f32 %v7156_v53, %v9394_v5 }
 0x951   : > { %v4331_v13 = vpop.f32.mrf.mxu1 }
 0x952   : > { %v4332_v62 = vadd.f32 %v9394_v5, %v4331_v13  ;;  %7231 = vmatprep.mubr.f32.mxu0 %v4448_v60  ;;  %7311 = vmatprep.mubr.f32.mxu1 %v4448_v60  ;;  %v4451_v49 = vmax.f32 %v4337_v45, 0.0 }
 0x953   : > { %v7159_v23 = vpop.f32.mrf.mxu1  ;;  %7232 = vmatmul.mubr.f32.gmra.mxu0 %v4449_v58  ;;  %7312 = vmatmul.mubr.f32.gmra.mxu1 %v4449_v58 }
 0x954   : > { %v4450_v40 = vmax.f32 %v4332_v62, 0.0  ;;  %v4347_v22 = vadd.f32 %v7159_v23, %v9394_v5 }
 0x955   : > { %v4341_v59 = vpop.f32.mrf.mxu1 }
 0x956   : > { %v4342_v33 = vadd.f32 %v9394_v5, %v4341_v59  ;;  %7234 = vmatprep.mubr.f32.mxu0 %v4450_v40  ;;  %7314 = vmatprep.mubr.f32.mxu1 %v4450_v40  ;;  %v4453_v54 = vmax.f32 %v4347_v22, 0.0 }
 0x957   : > { %v7162_v51 = vpop.f32.mrf.mxu1  ;;  %7235 = vmatmul.mubr.f32.gmra.mxu0 %v4451_v49  ;;  %7315 = vmatmul.mubr.f32.gmra.mxu1 %v4451_v49 }
 0x958   : > { %v4452_v16 = vmax.f32 %v4342_v33, 0.0  ;;  %v4357_v32 = vadd.f32 %v7162_v51, %v9394_v5 }
 0x959   : > { %v4351_v21 = vpop.f32.mrf.mxu1 }
 0x95a   : > { %v4352_v11 = vadd.f32 %v9394_v5, %v4351_v21  ;;  %7237 = vmatprep.mubr.f32.mxu0 %v4452_v16  ;;  %7317 = vmatprep.mubr.f32.mxu1 %v4452_v16  ;;  %v4455_v10 = vmax.f32 %v4357_v32, 0.0 }
 0x95b   : > { %7238 = vmatmul.mubr.f32.gmra.mxu0 %v4453_v54  ;;  %7318 = vmatmul.mubr.f32.gmra.mxu1 %v4453_v54  ;;  %v7165_v44 = vpop.f32.mrf.mxu1 }
 0x95c   : > { %v4454_v28 = vmax.f32 %v4352_v11, 0.0  ;;  %v4367_v55 = vadd.f32 %v7165_v44, %v9394_v5 }
 0x95d   : > { %v4361_v53 = vpop.f32.mrf.mxu1 }
 0x95e   : > { %7240 = vmatprep.mubr.f32.mxu0 %v4454_v28  ;;  %7320 = vmatprep.mubr.f32.mxu1 %v4454_v28  ;;  %v4362_v60 = vadd.f32 %v9394_v5, %v4361_v53  ;;  %v4457_v13 = vmax.f32 %v4367_v55, 0.0 }
 0x95f   : > { %7241 = vmatmul.mubr.f32.gmra.mxu0 %v4455_v10  ;;  %7321 = vmatmul.mubr.f32.gmra.mxu1 %v4455_v10  ;;  %v7168_v58 = vpop.f32.mrf.mxu1 }
 0x960   : > { %v4456_v45 = vmax.f32 %v4362_v60, 0.0  ;;  %v4377_v62 = vadd.f32 %v7168_v58, %v9394_v5 }
 0x961   : > { %v4371_v23 = vpop.f32.mrf.mxu1 }
 0x962   : > { %v4372_v40 = vadd.f32 %v9394_v5, %v4371_v23  ;;  %7243 = vmatprep.mubr.f32.mxu0 %v4456_v45  ;;  %7323 = vmatprep.mubr.f32.mxu1 %v4456_v45  ;;  %v4459_v59 = vmax.f32 %v4377_v62, 0.0 }
 0x963   : > { %v7171_v49 = vpop.f32.mrf.mxu1  ;;  %7244 = vmatmul.mubr.f32.gmra.mxu0 %v4457_v13  ;;  %7324 = vmatmul.mubr.f32.gmra.mxu1 %v4457_v13 }
 0x964   : > { %v4458_v22 = vmax.f32 %v4372_v40, 0.0  ;;  %v4387_v33 = vadd.f32 %v7171_v49, %v9394_v5 }
 0x965   : > { %v4381_v51 = vpop.f32.mrf.mxu1 }
 0x966   : > { %v4382_v16 = vadd.f32 %v9394_v5, %v4381_v51  ;;  %7246 = vmatprep.mubr.f32.mxu0 %v4458_v22  ;;  %7326 = vmatprep.mubr.f32.mxu1 %v4458_v22  ;;  %v4461_v21 = vmax.f32 %v4387_v33, 0.0 }
 0x967   : > { %v7174_v54 = vpop.f32.mrf.mxu1  ;;  %7247 = vmatmul.mubr.f32.gmra.mxu0 %v4459_v59  ;;  %7327 = vmatmul.mubr.f32.gmra.mxu1 %v4459_v59 }
 0x968   : > { %v4460_v32 = vmax.f32 %v4382_v16, 0.0  ;;  %v4397_v11 = vadd.f32 %v7174_v54, %v9394_v5 }
 0x969   : > { %v4391_v28 = vpop.f32.mrf.mxu1 }
 0x96a   : > { %v4392_v44 = vadd.f32 %v9394_v5, %v4391_v28  ;;  %7249 = vmatprep.mubr.f32.mxu0 %v4460_v32  ;;  %7329 = vmatprep.mubr.f32.mxu1 %v4460_v32  ;;  %v4463_v53 = vmax.f32 %v4397_v11, 0.0 }
 0x96b   : > { %v7177_v10 = vpop.f32.mrf.mxu1  ;;  %7250 = vmatmul.mubr.f32.gmra.mxu0 %v4461_v21  ;;  %7330 = vmatmul.mubr.f32.gmra.mxu1 %v4461_v21 }
 0x96c   : > { %v4462_v55 = vmax.f32 %v4392_v44, 0.0  ;;  %v4407_v60 = vadd.f32 %v7177_v10, %v9394_v5 }
 0x96d   : > { %v4401_v58 = vpop.f32.mrf.mxu1 }
 0x96e   : > { %v4402_v45 = vadd.f32 %v9394_v5, %v4401_v58  ;;  %7252 = vmatprep.mubr.f32.mxu0 %v4462_v55  ;;  %7332 = vmatprep.mubr.f32.mxu1 %v4462_v55  ;;  %v4465_v23 = vmax.f32 %v4407_v60, 0.0  ;;  %v9428_v58 = vld [vmem:[#allocation7 + $0xe] ss:$0 sm:$0xff] }
 0x96f   : > { %v7180_v13 = vpop.f32.mrf.mxu1  ;;  %7253 = vmatmul.mubr.f32.gmra.mxu0 %v4463_v53  ;;  %7333 = vmatmul.mubr.f32.gmra.mxu1 %v4463_v53 }
 0x970   : > { %v4464_v62 = vmax.f32 %v4402_v45, 0.0  ;;  %v4417_v40 = vadd.f32 %v7180_v13, %v9394_v5 }
 0x971   : > { %v4411_v49 = vpop.f32.mrf.mxu1 }
 0x972   : > { %v4412_v22 = vadd.f32 %v9394_v5, %v4411_v49  ;;  %7255 = vmatprep.mubr.f32.mxu0 %v4464_v62  ;;  %7335 = vmatprep.mubr.f32.mxu1 %v4464_v62  ;;  %v4467_v51 = vmax.f32 %v4417_v40, 0.0  ;;  %v9959_v49 = vld [vmem:[#allocation70_spill] sm:$0xff] }
 0x973   : > { %v7183_v59 = vpop.f32.mrf.mxu1  ;;  %7256 = vmatmul.mubr.f32.gmra.mxu0 %v4465_v23  ;;  %7336 = vmatmul.mubr.f32.gmra.mxu1 %v4465_v23 }
 0x974   : > { %v4466_v33 = vmax.f32 %v4412_v22, 0.0  ;;  %v4427_v16 = vadd.f32 %v7183_v59, %v9394_v5 }
 0x975   : > { %v4421_v54 = vpop.f32.mrf.mxu1 }
 0x976   : > { %v4422_v32 = vadd.f32 %v9394_v5, %v4421_v54  ;;  %7258 = vmatprep.mubr.f32.mxu0 %v4466_v33  ;;  %7338 = vmatprep.mubr.f32.mxu1 %v4466_v33  ;;  %v4469_v28 = vmax.f32 %v4427_v16, 0.0  ;;  %v9960_v54 = vld [vmem:[#allocation71_spill] sm:$0xff] }
 0x977   : > { %v7186_v21 = vpop.f32.mrf.mxu1  ;;  %7259 = vmatmul.mubr.f32.gmra.mxu0 %v4467_v51  ;;  %7339 = vmatmul.mubr.f32.gmra.mxu1 %v4467_v51 }
 0x978   : > { %v4468_v11 = vmax.f32 %v4422_v32, 0.0  ;;  %v4437_v44 = vadd.f32 %v7186_v21, %v9394_v5 }
 0x979   : > { %v4431_v10 = vpop.f32.mrf.mxu1 }
 0x97a   : > { %v4432_v55 = vadd.f32 %v9394_v5, %v4431_v10  ;;  %7261 = vmatprep.mubr.f32.mxu0 %v4468_v11  ;;  %7341 = vmatprep.mubr.f32.mxu1 %v4468_v11  ;;  %v4471_v60 = vmax.f32 %v4437_v44, 0.0  ;;  %v9961_v10 = vld [vmem:[#allocation12_spill] sm:$0xff] }
 0x97b   : > { %7262 = vmatmul.mubr.f32.gmra.mxu0 %v4469_v28  ;;  %7342 = vmatmul.mubr.f32.gmra.mxu1 %v4469_v28 }
 0x97c   : > { %v4470_v53 = vmax.f32 %v4432_v55, 0.0 }
 0x97e   : > { %7264 = vmatprep.mubr.f32.mxu0 %v4470_v53  ;;  %7344 = vmatprep.mubr.f32.mxu1 %v4470_v53 }
 0x97f   : > { %7265 = vmatmul.mubr.f32.gmra.mxu0 %v4471_v60  ;;  %7345 = vmatmul.mubr.f32.gmra.mxu1 %v4471_v60 }
 0xa03   : > { %v7221_v45 = vpop.f32.mrf.mxu0  ;;  %v7301_v13 = vpop.f32.mrf.mxu1 }
 0xa04   : > { %v4548_v62 = vadd.f32 %v7221_v45, %v9428_v58 }
 0xa05   : > { %v4542_v23 = vpop.f32.mrf.mxu0  ;;  %v4771_v40 = vpop.f32.mrf.mxu1 }
 0xa06   : > { %v4964_v5 = vmul.f32 1.442695, %v4548_v62  ;;  %v5059_v22 = vadd.f32 %v4548_v62, %v9959_v49  ;;  %v4543_v59 = vadd.f32 %v9428_v58, %v4542_v23  ;;  %v9442_v62 = vld [vmem:[#allocation7 + $0xf] ss:$0 sm:$0xff] }
 0xa07   : > { %v7224_v33 = vpop.f32.mrf.mxu0  ;;  %v7304_v51 = vpop.f32.mrf.mxu1 }
 0xa08   : > { %7614 = vpow2.f32 %v4964_v5  ;;  %5123 = vst [vmem:[%s9434_s20 + $0x18] sm:$0xff] %v5059_v22  ;;  %v4962_v16 = vmul.f32 1.442695, %v4543_v59  ;;  %v5058_v32 = vadd.f32 %v4543_v59, %v9960_v54  ;;  %v4558_v21 = vadd.f32 %v7224_v33, %v9428_v58  ;;  %v9962_v5 = vld [vmem:[#allocation41_spill] sm:$0xff] }
 0xa09   : > { %v4552_v11 = vpop.f32.mrf.mxu0  ;;  %v4781_v28 = vpop.f32.mrf.mxu1  ;;  %v9963_v54 = vld [vmem:[#allocation13_spill] sm:$0xff] }
 0xa0a   : > { %7616 = vpow2.f32 %v4962_v16  ;;  %5122 = vst [vmem:[%s9434_s20 + $0x8] sm:$0xff] %v5058_v32  ;;  %v4968_v44 = vmul.f32 1.442695, %v4558_v21  ;;  %v5061_v55 = vadd.f32 %v4558_v21, %v9961_v10  ;;  %v4553_v53 = vadd.f32 %v9428_v58, %v4552_v11 }
 0xa0b   : > { %v7227_v60 = vpop.f32.mrf.mxu0  ;;  %v7307_v45 = vpop.f32.mrf.mxu1  ;;  %v4777_v11 = vadd.f32 %v7301_v13, %v9442_v62 }
 0xa0c   : > { %7618 = vpow2.f32 %v4968_v44  ;;  %5125 = vst [vmem:[%s9434_s20 + $0x38] sm:$0xff] %v5061_v55  ;;  %v4966_v23 = vmul.f32 1.442695, %v4553_v53  ;;  %v5060_v49 = vadd.f32 %v4553_v53, %v9962_v5  ;;  %v4568_v22 = vadd.f32 %v7227_v60, %v9428_v58  ;;  %v9964_v53 = vld [vmem:[#allocation42_spill] sm:$0xff] }
 0xa0d   : > { %v4562_v59 = vpop.f32.mrf.mxu0  ;;  %v4791_v33 = vpop.f32.mrf.mxu1 }
 0xa0e   : > { %7620 = vpow2.f32 %v4966_v23  ;;  %5124 = vst [vmem:[%s9434_s20 + $0x28] sm:$0xff] %v5060_v49  ;;  %v4972_v16 = vmul.f32 1.442695, %v4568_v22  ;;  %v5063_v32 = vadd.f32 %v4568_v22, %v9963_v54  ;;  %v4563_v21 = vadd.f32 %v9428_v58, %v4562_v59  ;;  %v9965_v59 = vld [vmem:[#allocation14_spill] sm:$0xff] }
 0xa0f   : > { %v7230_v44 = vpop.f32.mrf.mxu0  ;;  %v7310_v10 = vpop.f32.mrf.mxu1  ;;  %v4772_v23 = vadd.f32 %v9442_v62, %v4771_v40  ;;  %v4931_v54 = vadd.f32 %v4777_v11, %v9048_v1 }
 0xa10   : > { %7622 = vpow2.f32 %v4972_v16  ;;  %5127 = vst [vmem:[%s9434_s20 + $0x58] sm:$0xff] %v5063_v32  ;;  %v4970_v55 = vmul.f32 1.442695, %v4563_v21  ;;  %v5062_v60 = vadd.f32 %v4563_v21, %v9964_v53  ;;  %v4578_v5 = vadd.f32 %v7230_v44, %v9428_v58  ;;  %v9966_v44 = vld [vmem:[#allocation43_spill] sm:$0xff] }
 0xa11   : > { %v4572_v49 = vpop.f32.mrf.mxu0  ;;  %v9455_v36 = vpop.f32.mrf.mxu1  ;;  %v4787_v32 = vadd.f32 %v7304_v51, %v9442_v62 }
 0xa12   : > { %7624 = vpow2.f32 %v4970_v55  ;;  %5126 = vst [vmem:[%s9434_s20 + $0x48] sm:$0xff] %v5062_v60  ;;  %v4976_v22 = vmul.f32 1.442695, %v4578_v5  ;;  %v5065_v13 = vadd.f32 %v4578_v5, %v9965_v59  ;;  %v4573_v16 = vadd.f32 %v9428_v58, %v4572_v49 }
 0xa13   : > { %v7233_v53 = vpop.f32.mrf.mxu0  ;;  %v9464_v12 = vpop.f32.mrf.mxu1  ;;  %v4930_v59 = vadd.f32 %v4772_v23, %v9046_v61  ;;  %v4782_v49 = vadd.f32 %v9442_v62, %v4781_v28  ;;  %v4797_v61 = vadd.f32 %v7307_v45, %v9442_v62 }
 0xa14   : > { %7626 = vpow2.f32 %v4976_v22  ;;  %5129 = vst [vmem:[%s9434_s20 + $0x78] sm:$0xff] %v5065_v13  ;;  %v4974_v21 = vmul.f32 1.442695, %v4573_v16  ;;  %v5064_v40 = vadd.f32 %v4573_v16, %v9966_v44  ;;  %v4588_v60 = vadd.f32 %v7233_v53, %v9428_v58 }
 0xa15   : > { %v7615_v55 = vpop.eup %7614  ;;  %v4582_v1 = vpop.f32.mrf.mxu0 }
 0xa16   : > { %v5027_v5 = vmul.f32 %v7615_v55, %v4931_v54  ;;  %7628 = vpow2.f32 %v4974_v21  ;;  %5128 = vst [vmem:[%s9434_s20 + $0x68] sm:$0xff] %v5064_v40  ;;  %v9470_v51 = vpop.f32.mrf.mxu1  ;;  %v4980_v22 = vmul.f32 1.442695, %v4588_v60  ;;  %v5067_v13 = vadd.f32 %v4588_v60, %v9036_v37  ;;  %v9967_v60 = vld [vmem:[#allocation44_spill] sm:$0xff] }
 0xa17   : > { %v7617_v11 = vpop.eup %7616  ;;  %v4583_v16 = vadd.f32 %v9428_v58, %v4582_v1  ;;  %v4933_v54 = vadd.f32 %v4787_v32, %v9072_v9  ;;  %v7236_v28 = vpop.f32.mrf.mxu0  ;;  %v4792_v9 = vadd.f32 %v9442_v62, %v4791_v33 }
 0xa18   : > { %5091 = vst [vmem:[%s9434_s20 + $0x10] sm:$0xff] %v5027_v5  ;;  %v5026_v44 = vmul.f32 %v7617_v11, %v4930_v59  ;;  %v9477_v23 = vpop.f32.mrf.mxu1  ;;  %7630 = vpow2.f32 %v4980_v22  ;;  %5131 = vst [vmem:[%s9434_s20 + $0x98] sm:$0xff] %v5067_v13  ;;  %v4598_v37 = vadd.f32 %v7236_v28, %v9428_v58  ;;  %v4932_v5 = vadd.f32 %v4782_v49, %v9967_v60  ;;  %v9968_v11 = vld [vmem:[#allocation15_spill] sm:$0xff] }
 0xa19   : > { %v7619_v21 = vpop.eup %7618  ;;  %v4978_v40 = vmul.f32 1.442695, %v4583_v16  ;;  %v5066_v53 = vadd.f32 %v4583_v16, %v9050_v39  ;;  %v4592_v45 = vpop.f32.mrf.mxu0  ;;  %v4935_v16 = vadd.f32 %v4797_v61, %v9097_v3  ;;  %v4807_v49 = vadd.f32 %v7310_v10, %v9442_v62 }
 0xa1a   : > { %5090 = vst [vmem:[%s9434_s20] sm:$0xff] %v5026_v44  ;;  %v5029_v55 = vmul.f32 %v7619_v21, %v4933_v54  ;;  %v9485_v32 = vpop.f32.mrf.mxu1  ;;  %v4984_v1 = vmul.f32 1.442695, %v4598_v37  ;;  %v5069_v22 = vadd.f32 %v4598_v37, %v9968_v11  ;;  %v4593_v39 = vadd.f32 %v9428_v58, %v4592_v45  ;;  %v9969_v21 = vld [vmem:[#allocation16_spill] sm:$0xff]  ;;  %v9970_v45 = vld [vmem:[#allocation45_spill] sm:$0xff] }
 0xa1b   : > { %v7621_v59 = vpop.eup %7620  ;;  %7632 = vpow2.f32 %v4978_v40  ;;  %5130 = vst [vmem:[%s9434_s20 + $0x88] sm:$0xff] %v5066_v53  ;;  %v7239_v33 = vpop.f32.mrf.mxu0  ;;  %v4802_v3 = vadd.f32 %v9442_v62, %v9455_v36  ;;  %v4817_v36 = vadd.f32 %v9464_v12, %v9442_v62  ;;  %v4812_v12 = vadd.f32 %v9442_v62, %v9470_v51 }
 0xa1c   : > { %5093 = vst [vmem:[%s9434_s20 + $0x30] sm:$0xff] %v5029_v55  ;;  %v5028_v13 = vmul.f32 %v7621_v59, %v4932_v5  ;;  %v9493_v44 = vpop.f32.mrf.mxu1  ;;  %7634 = vpow2.f32 %v4984_v1  ;;  %5133 = vst [vmem:[%s9434_s20 + $0xb8] sm:$0xff] %v5069_v22  ;;  %v4982_v28 = vmul.f32 1.442695, %v4593_v39  ;;  %v5068_v40 = vadd.f32 %v4593_v39, %v9969_v21  ;;  %v9972_v21 = vld [vmem:[#allocation18_spill] sm:$0xff] }
 0xa1d   : > { %v7623_v54 = vpop.eup %7622  ;;  %v4608_v53 = vadd.f32 %v7239_v33, %v9428_v58  ;;  %v4934_v55 = vadd.f32 %v4792_v9, %v9095_v46  ;;  %v4602_v10 = vpop.f32.mrf.mxu0  ;;  %v4937_v46 = vadd.f32 %v4807_v49, %v9121_v29  ;;  %v4936_v29 = vadd.f32 %v4802_v3, %v9972_v21 }
 0xa1e   : > { %5092 = vst [vmem:[%s9434_s20 + $0x20] sm:$0xff] %v5028_v13  ;;  %v5031_v37 = vmul.f32 %v7623_v54, %v4935_v16  ;;  %v9502_v61 = vpop.f32.mrf.mxu1  ;;  %7636 = vpow2.f32 %v4982_v28  ;;  %5132 = vst [vmem:[%s9434_s20 + $0xa8] sm:$0xff] %v5068_v40  ;;  %v4603_v1 = vadd.f32 %v9428_v58, %v4602_v10  ;;  %v9971_v16 = vld [vmem:[#allocation17_spill] sm:$0xff]  ;;  %v4939_v3 = vadd.f32 %v4817_v36, %v9150_v19 }
 0xa1f   : > { %v7625_v60 = vpop.eup %7624  ;;  %v4988_v5 = vmul.f32 1.442695, %v4608_v53  ;;  %v5071_v59 = vadd.f32 %v4608_v53, %v9970_v45  ;;  %v7242_v9 = vpop.f32.mrf.mxu0  ;;  %v4827_v51 = vadd.f32 %v9477_v23, %v9442_v62  ;;  %v4822_v19 = vadd.f32 %v9442_v62, %v9485_v32 }
 0xa20   : > { %5095 = vst [vmem:[%s9434_s20 + $0x50] sm:$0xff] %v5031_v37  ;;  %v5030_v11 = vmul.f32 %v7625_v60, %v4934_v55  ;;  %v9511_v22 = vpop.f32.mrf.mxu1  ;;  %v4986_v13 = vmul.f32 1.442695, %v4603_v1  ;;  %v5070_v33 = vadd.f32 %v4603_v1, %v9971_v16  ;;  %v4618_v54 = vadd.f32 %v7242_v9, %v9428_v58  ;;  %v9973_v55 = vld [vmem:[#allocation46_spill] sm:$0xff] }
 0xa21   : > { %v7627_v39 = vpop.eup %7626  ;;  %7638 = vpow2.f32 %v4988_v5  ;;  %5135 = vst [vmem:[%s9434_s20 + $0xd8] sm:$0xff] %v5071_v59  ;;  %v4612_v49 = vpop.f32.mrf.mxu0  ;;  %v9974_v59 = vld [vmem:[#allocation47_spill] sm:$0xff]  ;;  %v4938_v16 = vadd.f32 %v4812_v12, %v9148_v31  ;;  %v4941_v31 = vadd.f32 %v4827_v51, %v9176_v52  ;;  %v4837_v32 = vadd.f32 %v9493_v44, %v9442_v62 }
 0xa22   : > { %5094 = vst [vmem:[%s9434_s20 + $0x40] sm:$0xff] %v5030_v11  ;;  %v5033_v28 = vmul.f32 %v7627_v39, %v4937_v46  ;;  %v9520_v40 = vpop.f32.mrf.mxu1  ;;  %7640 = vpow2.f32 %v4986_v13  ;;  %5134 = vst [vmem:[%s9434_s20 + $0xc8] sm:$0xff] %v5070_v33  ;;  %v4992_v37 = vmul.f32 1.442695, %v4618_v54  ;;  %v5073_v10 = vadd.f32 %v4618_v54, %v9973_v55 }
 0xa23   : > { %v7629_v53 = vpop.eup %7628  ;;  %v4613_v60 = vadd.f32 %v9428_v58, %v4612_v49  ;;  %v7245_v11 = vpop.f32.mrf.mxu0  ;;  %v4940_v52 = vadd.f32 %v4822_v19, %v9174_v43  ;;  %v4832_v44 = vadd.f32 %v9442_v62, %v9502_v61  ;;  %v4943_v43 = vadd.f32 %v4837_v32, %v9202_v8 }
 0xa24   : > { %5097 = vst [vmem:[%s9434_s20 + $0x70] sm:$0xff] %v5033_v28  ;;  %v5032_v5 = vmul.f32 %v7629_v53, %v4936_v29  ;;  %7642 = vpow2.f32 %v4992_v37  ;;  %5137 = vst [vmem:[%s9434_s20 + $0xf8] sm:$0xff] %v5073_v10  ;;  %v9531_v46 = vpop.f32.mrf.mxu1  ;;  %v4628_v39 = vadd.f32 %v7245_v11, %v9428_v58  ;;  %v9975_v28 = vld [vmem:[#allocation19_spill] sm:$0xff]  ;;  %v9976_v10 = vld [vmem:[#allocation48_spill] sm:$0xff]  ;;  %v4847_v61 = vadd.f32 %v9511_v22, %v9442_v62 }
 0xa25   : > { %v4990_v45 = vmul.f32 1.442695, %v4613_v60  ;;  %v5072_v1 = vadd.f32 %v4613_v60, %v9974_v59  ;;  %v7631_v9 = vpop.eup %7630  ;;  %v4622_v23 = vpop.f32.mrf.mxu0  ;;  %v9977_v11 = vld [vmem:[#allocation20_spill] sm:$0xff]  ;;  %v4942_v8 = vadd.f32 %v4832_v44, %v9198_v35  ;;  %v4842_v22 = vadd.f32 %v9442_v62, %v9520_v40 }
 0xa26   : > { %5096 = vst [vmem:[%s9434_s20 + $0x60] sm:$0xff] %v5032_v5  ;;  %v5035_v13 = vmul.f32 %v7631_v9, %v4939_v3  ;;  %v9539_v36 = vpop.f32.mrf.mxu1  ;;  %v4996_v54 = vmul.f32 1.442695, %v4628_v39  ;;  %v5075_v21 = vadd.f32 %v4628_v39, %v9975_v28  ;;  %v4623_v29 = vadd.f32 %v9428_v58, %v4622_v23 }
 0xa27   : > { %7644 = vpow2.f32 %v4990_v45  ;;  %5136 = vst [vmem:[%s9434_s20 + $0xe8] sm:$0xff] %v5072_v1  ;;  %v7248_v12 = vpop.f32.mrf.mxu0  ;;  %v4945_v35 = vadd.f32 %v4847_v61, %v9226_v17  ;;  %v4857_v40 = vadd.f32 %v9531_v46, %v9442_v62  ;;  %v4944_v17 = vadd.f32 %v4842_v22, %v9224_v38 }
 0xa28   : > { %v7633_v33 = vpop.eup %7632  ;;  %5099 = vst [vmem:[%s9434_s20 + $0x90] sm:$0xff] %v5035_v13  ;;  %v9547_v53 = vpop.f32.mrf.mxu1  ;;  %7646 = vpow2.f32 %v4996_v54  ;;  %5139 = vst [vmem:[%s9434_s20 + $0x118] sm:$0xff] %v5075_v21  ;;  %v4994_v55 = vmul.f32 1.442695, %v4623_v29  ;;  %v5074_v60 = vadd.f32 %v4623_v29, %v9976_v10  ;;  %v4638_v5 = vadd.f32 %v7248_v12, %v9428_v58  ;;  %v9978_v54 = vld [vmem:[#allocation49_spill] sm:$0xff] }
 0xa29   : > { %v5034_v49 = vmul.f32 %v7633_v33, %v4938_v16  ;;  %v7635_v37 = vpop.eup %7634  ;;  %v4632_v51 = vpop.f32.mrf.mxu0  ;;  %v4852_v46 = vadd.f32 %v9442_v62, %v9539_v36  ;;  %v4947_v38 = vadd.f32 %v4857_v40, %v9256_v57  ;;  %v4867_v36 = vadd.f32 %v9547_v53, %v9442_v62 }
 0xa2a   : > { %v5037_v3 = vmul.f32 %v7635_v37, %v4941_v31  ;;  %v9556_v45 = vpop.f32.mrf.mxu1  ;;  %7648 = vpow2.f32 %v4994_v55  ;;  %5138 = vst [vmem:[%s9434_s20 + $0x108] sm:$0xff] %v5074_v60  ;;  %v5000_v1 = vmul.f32 1.442695, %v4638_v5  ;;  %v5077_v9 = vadd.f32 %v4638_v5, %v9977_v11  ;;  %v9979_v37 = vld [vmem:[#allocation21_spill] sm:$0xff] }
 0xa2b   : > { %5098 = vst [vmem:[%s9434_s20 + $0x80] sm:$0xff] %v5034_v49  ;;  %v7637_v59 = vpop.eup %7636  ;;  %v4633_v39 = vadd.f32 %v9428_v58, %v4632_v51  ;;  %v7251_v16 = vpop.f32.mrf.mxu0  ;;  %v4862_v57 = vadd.f32 %v9442_v62, %v9556_v45 }
 0xa2c   : > { %5101 = vst [vmem:[%s9434_s20 + $0xb0] sm:$0xff] %v5037_v3  ;;  %v5036_v13 = vmul.f32 %v7637_v59, %v4940_v52  ;;  %v9565_v19 = vpop.f32.mrf.mxu1  ;;  %7650 = vpow2.f32 %v5000_v1  ;;  %5141 = vst [vmem:[%s9434_s20 + $0x138] sm:$0xff] %v5077_v9  ;;  %v4648_v21 = vadd.f32 %v7251_v16, %v9428_v58 }
 0xa2d   : > { %v4998_v33 = vmul.f32 1.442695, %v4633_v39  ;;  %v5076_v28 = vadd.f32 %v4633_v39, %v9978_v54  ;;  %v4642_v49 = vpop.f32.mrf.mxu0  ;;  %v9980_v54 = vld [vmem:[#allocation50_spill] sm:$0xff]  ;;  %v4877_v45 = vadd.f32 %v9565_v19, %v9442_v62  ;;  %v4948_v19 = vadd.f32 %v4862_v57, %v9276_v7 }
 0xa2e   : > { %v7639_v23 = vpop.eup %7638  ;;  %5100 = vst [vmem:[%s9434_s20 + $0xa0] sm:$0xff] %v5036_v13  ;;  %v9574_v31 = vpop.f32.mrf.mxu1  ;;  %v5004_v12 = vmul.f32 1.442695, %v4648_v21  ;;  %v5079_v55 = vadd.f32 %v4648_v21, %v9979_v37  ;;  %v4643_v10 = vadd.f32 %v9428_v58, %v4642_v49 }
 0xa2f   : > { %v5039_v29 = vmul.f32 %v7639_v23, %v4943_v43  ;;  %v7641_v32 = vpop.eup %7640  ;;  %7652 = vpow2.f32 %v4998_v33  ;;  %5140 = vst [vmem:[%s9434_s20 + $0x128] sm:$0xff] %v5076_v28  ;;  %v7254_v5 = vpop.f32.mrf.mxu0 }
 0xa30   : > { %v5038_v60 = vmul.f32 %v7641_v32, %v4942_v8  ;;  %v9583_v3 = vpop.f32.mrf.mxu1  ;;  %7654 = vpow2.f32 %v5004_v12  ;;  %5143 = vst [vmem:[%s9434_s20 + $0x158] sm:$0xff] %v5079_v55  ;;  %v5002_v44 = vmul.f32 1.442695, %v4643_v10  ;;  %v5078_v51 = vadd.f32 %v4643_v10, %v9204_v48  ;;  %v9981_v32 = vld [vmem:[#allocation22_spill] sm:$0xff] }
 0xa31   : > { %5103 = vst [vmem:[%s9434_s20 + $0xd0] sm:$0xff] %v5039_v29  ;;  %v7643_v52 = vpop.eup %7642  ;;  %v4658_v59 = vadd.f32 %v7254_v5, %v9428_v58  ;;  %v4652_v11 = vpop.f32.mrf.mxu0  ;;  %v4946_v29 = vadd.f32 %v4852_v46, %v9254_v63  ;;  %v4949_v55 = vadd.f32 %v4867_v36, %v9278_v20  ;;  %v4872_v20 = vadd.f32 %v9442_v62, %v9574_v31 }
 0xa32   : > { %5102 = vst [vmem:[%s9434_s20 + $0xc0] sm:$0xff] %v5038_v60  ;;  %v5041_v1 = vmul.f32 %v7643_v52, %v4945_v35  ;;  %v9592_v9 = vpop.f32.mrf.mxu1  ;;  %7656 = vpow2.f32 %v5002_v44  ;;  %5142 = vst [vmem:[%s9434_s20 + $0x148] sm:$0xff] %v5078_v51  ;;  %v4653_v43 = vadd.f32 %v9428_v58, %v4652_v11  ;;  %v4887_v11 = vadd.f32 %v9583_v3, %v9442_v62 }
 0xa33   : > { %v5008_v13 = vmul.f32 1.442695, %v4658_v59  ;;  %v5081_v48 = vadd.f32 %v4658_v59, %v9209_v4  ;;  %v7257_v16 = vpop.f32.mrf.mxu0  ;;  %v4950_v3 = vadd.f32 %v4872_v20, %v9298_v27 }
 0xa34   : > { %v7645_v39 = vpop.eup %7644  ;;  %5105 = vst [vmem:[%s9434_s20 + $0xf0] sm:$0xff] %v5041_v1  ;;  %v9601_v23 = vpop.f32.mrf.mxu1  ;;  %v5006_v33 = vmul.f32 1.442695, %v4653_v43  ;;  %v5080_v28 = vadd.f32 %v4653_v43, %v9980_v54  ;;  %v4668_v4 = vadd.f32 %v7257_v16, %v9428_v58 }
 0xa35   : > { %v5040_v61 = vmul.f32 %v7645_v39, %v4944_v17  ;;  %7658 = vpow2.f32 %v5008_v13  ;;  %5145 = vst [vmem:[%s9434_s20 + $0x178] sm:$0xff] %v5081_v48  ;;  %v7647_v21 = vpop.eup %7646  ;;  %v4662_v53 = vpop.f32.mrf.mxu0  ;;  %v4951_v13 = vadd.f32 %v4877_v45, %v9300_v47  ;;  %v4882_v47 = vadd.f32 %v9442_v62, %v9592_v9 }
 0xa36   : > { %v9610_v8 = vpop.f32.mrf.mxu1  ;;  %v5043_v22 = vmul.f32 %v7647_v21, %v4947_v38  ;;  %7660 = vpow2.f32 %v5006_v33  ;;  %5144 = vst [vmem:[%s9434_s20 + $0x168] sm:$0xff] %v5080_v28  ;;  %v5012_v49 = vmul.f32 1.442695, %v4668_v4  ;;  %v5083_v12 = vadd.f32 %v4668_v4, %v9981_v32 }
 0xa37   : > { %5104 = vst [vmem:[%s9434_s20 + $0xe0] sm:$0xff] %v5040_v61  ;;  %v7649_v37 = vpop.eup %7648  ;;  %v4663_v10 = vadd.f32 %v9428_v58, %v4662_v53  ;;  %v7260_v63 = vpop.f32.mrf.mxu0  ;;  %v4953_v28 = vadd.f32 %v4887_v11, %v9317_v30  ;;  %v4897_v21 = vadd.f32 %v9601_v23, %v9442_v62 }
 0xa38   : > { %5107 = vst [vmem:[%s9434_s20 + $0x110] sm:$0xff] %v5043_v22  ;;  %v5042_v60 = vmul.f32 %v7649_v37, %v4946_v29  ;;  %7662 = vpow2.f32 %v5012_v49  ;;  %5147 = vst [vmem:[%s9434_s20 + $0x198] sm:$0xff] %v5083_v12  ;;  %v4678_v35 = vadd.f32 %v7260_v63, %v9428_v58  ;;  %v9621_v40 = vpop.f32.mrf.mxu1  ;;  %v4952_v49 = vadd.f32 %v4882_v47, %v9315_v26 }
 0xa39   : > { %v7651_v5 = vpop.eup %7650  ;;  %v5010_v52 = vmul.f32 1.442695, %v4663_v10  ;;  %v5082_v44 = vadd.f32 %v4663_v10, %v9252_v25  ;;  %v4672_v51 = vpop.f32.mrf.mxu0  ;;  %v4892_v37 = vadd.f32 %v9442_v62, %v9610_v8  ;;  %v4955_v10 = vadd.f32 %v4897_v21, %v9328_v24 }
 0xa3a   : > { %5106 = vst [vmem:[%s9434_s20 + $0x100] sm:$0xff] %v5042_v60  ;;  %v5045_v59 = vmul.f32 %v7651_v5, %v4949_v55  ;;  %v5016_v1 = vmul.f32 1.442695, %v4678_v35  ;;  %v5085_v17 = vadd.f32 %v4678_v35, %v9258_v50  ;;  %v4673_v31 = vadd.f32 %v9428_v58, %v4672_v51  ;;  %v4901_v7 = vpop.f32.mrf.mxu1 }
 0xa3b   : > { %7664 = vpow2.f32 %v5010_v52  ;;  %5146 = vst [vmem:[%s9434_s20 + $0x188] sm:$0xff] %v5082_v44  ;;  %v7263_v39 = vpop.f32.mrf.mxu0  ;;  %v4907_v26 = vadd.f32 %v9621_v40, %v9442_v62  ;;  %v4902_v35 = vadd.f32 %v9442_v62, %v4901_v7 }
 0xa3c   : > { %v7653_v46 = vpop.eup %7652  ;;  %5109 = vst [vmem:[%s9434_s20 + $0x130] sm:$0xff] %v5045_v59  ;;  %7666 = vpow2.f32 %v5016_v1  ;;  %5149 = vst [vmem:[%s9434_s20 + $0x1b8] sm:$0xff] %v5085_v17  ;;  %v4688_v50 = vadd.f32 %v7263_v39, %v9428_v58  ;;  %v5014_v43 = vmul.f32 1.442695, %v4673_v31  ;;  %v5084_v61 = vadd.f32 %v4673_v31, %v9274_v56  ;;  %v7343_v9 = vpop.f32.mrf.mxu1 }
 0xa3d   : > { %v5044_v25 = vmul.f32 %v7653_v46, %v4948_v19  ;;  %v7655_v48 = vpop.eup %7654  ;;  %v4682_v38 = vpop.f32.mrf.mxu0  ;;  %v4957_v40 = vadd.f32 %v4907_v26, %v9338_v0  ;;  %v4917_v5 = vadd.f32 %v7343_v9, %v9442_v62 }
 0xa3e   : > { %v5047_v36 = vmul.f32 %v7655_v48, %v4951_v13  ;;  %v5020_v16 = vmul.f32 1.442695, %v4688_v50  ;;  %v5087_v33 = vadd.f32 %v4688_v50, %v9280_v14  ;;  %7668 = vpow2.f32 %v5014_v43  ;;  %5148 = vst [vmem:[%s9434_s20 + $0x1a8] sm:$0xff] %v5084_v61  ;;  %v4911_v63 = vpop.f32.mrf.mxu1  ;;  %v9983_v48 = vld [vmem:[#allocation23_spill] sm:$0xff] }
 0xa3f   : > { %5108 = vst [vmem:[%s9434_s20 + $0x120] sm:$0xff] %v5044_v25  ;;  %v7657_v54 = vpop.eup %7656  ;;  %v4683_v27 = vadd.f32 %v9428_v58, %v4682_v38  ;;  %v7266_v4 = vpop.f32.mrf.mxu0  ;;  %v4912_v51 = vadd.f32 %v9442_v62, %v4911_v63  ;;  %v4959_v19 = vadd.f32 %v4917_v5, %v9348_v18  ;;  %v9982_v25 = vld [vmem:[#allocation51_spill] sm:$0xff] }
 0xa40   : > { %5111 = vst [vmem:[%s9434_s20 + $0x150] sm:$0xff] %v5047_v36  ;;  %v5046_v56 = vmul.f32 %v7657_v54, %v4950_v3  ;;  %7670 = vpow2.f32 %v5020_v16  ;;  %5151 = vst [vmem:[%s9434_s20 + $0x1d8] sm:$0xff] %v5087_v33  ;;  %v4698_v14 = vadd.f32 %v7266_v4, %v9428_v58  ;;  %v7346_v20 = vpop.f32.mrf.mxu1 }
 0xa41   : > { %v5018_v30 = vmul.f32 1.442695, %v4683_v27  ;;  %v5086_v57 = vadd.f32 %v4683_v27, %v9296_v42  ;;  %v4692_v53 = vpop.f32.mrf.mxu0  ;;  %v4927_v0 = vadd.f32 %v7346_v20, %v9442_v62  ;;  %v4958_v31 = vadd.f32 %v4912_v51, %v9346_v2 }
 0xa42   : > { %v7659_v29 = vpop.eup %7658  ;;  %5110 = vst [vmem:[%s9434_s20 + $0x140] sm:$0xff] %v5046_v56  ;;  %v5024_v32 = vmul.f32 1.442695, %v4698_v14  ;;  %v5089_v23 = vadd.f32 %v4698_v14, %v9302_v34  ;;  %v4693_v55 = vadd.f32 %v9428_v58, %v4692_v53  ;;  %v4954_v58 = vadd.f32 %v4892_v37, %v9326_v6  ;;  %v4921_v1 = vpop.f32.mrf.mxu1 }
 0xa43   : > { %v5049_v22 = vmul.f32 %v7659_v29, %v4953_v28  ;;  %v7661_v12 = vpop.eup %7660  ;;  %7672 = vpow2.f32 %v5018_v30  ;;  %5150 = vst [vmem:[%s9434_s20 + $0x1c8] sm:$0xff] %v5086_v57  ;;  %v4956_v6 = vadd.f32 %v4902_v35, %v9336_v15  ;;  %v4922_v15 = vadd.f32 %v9442_v62, %v4921_v1 }
 0xa44   : > { %v5048_v42 = vmul.f32 %v7661_v12, %v4952_v49  ;;  %7674 = vpow2.f32 %v5024_v32  ;;  %5153 = vst [vmem:[%s9434_s20 + $0x1f8] sm:$0xff] %v5089_v23  ;;  %v5022_v60 = vmul.f32 1.442695, %v4693_v55  ;;  %v5088_v8 = vadd.f32 %v4693_v55, %v9313_v41 }
 0xa45   : > { %5113 = vst [vmem:[%s9434_s20 + $0x170] sm:$0xff] %v5049_v22  ;;  %v7663_v34 = vpop.eup %7662  ;;  %v4961_v13 = vadd.f32 %v4927_v0, %v9982_v25  ;;  %v4960_v3 = vadd.f32 %v4922_v15, %v9983_v48 }
 0xa46   : > { %5112 = vst [vmem:[%s9434_s20 + $0x160] sm:$0xff] %v5048_v42  ;;  %v5051_v45 = vmul.f32 %v7663_v34, %v4955_v10  ;;  %7676 = vpow2.f32 %v5022_v60  ;;  %5152 = vst [vmem:[%s9434_s20 + $0x1e8] sm:$0xff] %v5088_v8 }
 0xa48   : > { %v7665_v24 = vpop.eup %7664  ;;  %5115 = vst [vmem:[%s9434_s20 + $0x190] sm:$0xff] %v5051_v45 }
 0xa49   : > { %v7667_v52 = vpop.eup %7666  ;;  %v5050_v44 = vmul.f32 %v7665_v24, %v4954_v58 }
 0xa4a   : > { %v5053_v41 = vmul.f32 %v7667_v52, %v4957_v40 }
 0xa4b   : > { %5114 = vst [vmem:[%s9434_s20 + $0x180] sm:$0xff] %v5050_v44  ;;  %v7669_v59 = vpop.eup %7668 }
 0xa4c   : > { %5117 = vst [vmem:[%s9434_s20 + $0x1b0] sm:$0xff] %v5053_v41  ;;  %v5052_v46 = vmul.f32 %v7669_v59, %v4956_v6 }
 0xa4d   : > { %v7671_v17 = vpop.eup %7670 }
 0xa4e   : > { %v5055_v11 = vmul.f32 %v7671_v17, %v4959_v19  ;;  %5116 = vst [vmem:[%s9434_s20 + $0x1a0] sm:$0xff] %v5052_v46 }
 0xa50   : > { %v7673_v39 = vpop.eup %7672  ;;  %5119 = vst [vmem:[%s9434_s20 + $0x1d0] sm:$0xff] %v5055_v11 }
 0xa51   : > { %v7675_v18 = vpop.eup %7674  ;;  %v5054_v7 = vmul.f32 %v7673_v39, %v4958_v31 }
 0xa52   : > { %v5057_v50 = vmul.f32 %v7675_v18, %v4961_v13 }
 0xa53   : > { %5118 = vst [vmem:[%s9434_s20 + $0x1c0] sm:$0xff] %v5054_v7  ;;  %v7677_v43 = vpop.eup %7676 }
 0xa54   : > { %5121 = vst [vmem:[%s9434_s20 + $0x1f0] sm:$0xff] %v5057_v50  ;;  %v5056_v2 = vmul.f32 %v7677_v43, %v4960_v3 }
 0xa56   : > { %5120 = vst [vmem:[%s9434_s20 + $0x1e0] sm:$0xff] %v5056_v2 }
 0xa57   : > { %7803 = shalt.err (!%p7800_p9)
}
 0xa58   : > { %s7804_s25 = scalar_lea.hbm %s9691_s10, 8192  ;;  %s7808_s6 = scalar_lea.hbm %s9740_s3, 16384 }
 0xa59   : > { %p7805_p13 = scmp.ne.s32.totalorder %s9691_s10, %s7804_s25  ;;  %p7809_p4 = scmp.lt.s32.totalorder %s9691_s10, %s9740_s3 }
 0xa5a   : > { %p7810_p8 = scmp.lt.s32.totalorder %s7808_s6, %s7804_s25 }
 0xa5b   : > { %p7806_p5 = pnand %p7805_p13, %p9984_p10 }
 0xa5c   : > { %p7811_p7 = por %p7810_p8, %p7809_p4 }
 0xa5d   : > { %p7807_p0 = pneg %p7806_p5 }
 0xa5f   : > { %p7812_p11 = pnand %p7811_p7, %p7807_p0 }
 0xa61   : > { %7815 = shalt.err (!%p7812_p11)
}
 0xa62   : > { %s7870_s18 = smov 256   ;;  %s7871_s20 = smov 16  }
 0xa63   : > { %7357 = dma.vmem_to_hbm [thread:$0]  (%p9984_p10), %s9693_s29, 8192, %s9691_s10, %s5155_s16, %s7870_s18, %s7870_s18, %s7871_s20  }
 0xa64 PF: > { %s5184_s27 = sand.u32 1, %s7846_s12   ;;  %p9985_p1 = scmp.ne.s32.totalorder %s9808_s19, 0 }
 0xa65   : > { %p9986_p2 = scmp.ge.s32.totalorder %s7858_s15, 2  ;;  %s5185_s30 = scalar_lea.sflag [#allocation4], %s5184_s27 }
 0xa67   : > { %p7371_p6 = pnand %p9986_p2, %p9985_p1 }
 0xa69   : > { %p7372_p12 = pneg %p7371_p6 }
 0xa6b   : > { %7841 = dma.done.wait (%p7372_p12), %s5185_s30, 8192  }
 0xa6c   : > { %7843 = vsyncadd (%p7372_p12), %s5185_s30, 4294959104  ;;  %p17_p3 = scmp.ge.s32.totalorder %s7964_s9, 4   ;;  %s9987_s12 = smov %s7850_s13 }
 0xa6d   : > { %s9988_s13 = smov %s7854_s14  ;;  %s9989_s14 = smov %s7973_s17 }
 0xa6e   : > { %s9990_s15 = smov %s7964_s9  ;;  %19 = sbr.rel (!%p17_p3) target bundleno = 6 (0x6), region = 91 }
 0xa73   :  { %5190 = vsyncpa [#allocation3], 1 }
 0xa74   :  { %5192 = vsyncpa [#allocation3 + $0x1], 1 }
 0xa75   :  { %5193 = vsyncpa [#allocation6], 1 }
 0xa76   :  { %5194 = vsyncpa [#allocation4], 1 }
 0xa77   :  { %5196 = vsyncpa [#allocation4 + $0x1], 1 }

</bundles_post_ra>
